<compile_context>
chip_gen: v6e
topology: v6e:2x2x1
jax: 0.10.0
libtpu: 0.0.40
codegen_flags: <defaults>
</compile_context>

<pallas_src>
import functools
import math

import jax
import jax.numpy as jnp
from jax import lax
from jax.experimental import pallas as pl
from jax.experimental.pallas import tpu as pltpu

# ----- scaled-down BERT config -----
VOCAB = 128
MAX_POS = 16
TYPE_VOCAB = 2
HIDDEN = 32
N_HEADS = 4
HEAD_DIM = HIDDEN // N_HEADS
INTERMEDIATE = 64
N_LAYERS = 2
N_CLASSES = 3
LN_EPS = 1e-12

B = 2
S = 8


# --------------------------------------------------------------------------------------
# In-kernel helpers (traced inside the Pallas kernel)
# --------------------------------------------------------------------------------------
def _layernorm(x, g, b):
    mean = jnp.mean(x, axis=-1, keepdims=True)
    c = x - mean
    var = jnp.mean(c * c, axis=-1, keepdims=True)
    return (c * lax.rsqrt(var + LN_EPS)) * g + b


def _gelu_exact(x):
    # Exact (erf-based) BERT GELU.  erf via Abramowitz–Stegun 7.1.26 rational approximation
    # (|err| < 1.5e-7): lowers entirely to VPU/EUP ops (exp, mul/add, select) inside the kernel.
    z = x * (1.0 / math.sqrt(2.0))
    a = jnp.abs(z)
    t = 1.0 / (1.0 + 0.3275911 * a)
    poly = t * (0.254829592 + t * (-0.284496736 + t * (1.421413741
               + t * (-1.453152027 + t * 1.061405429))))
    erf_abs = 1.0 - poly * jnp.exp(-a * a)
    erf_z = jnp.where(z >= 0.0, erf_abs, -erf_abs)
    return 0.5 * x * (1.0 + erf_z)


# --------------------------------------------------------------------------------------
# The fused forward kernel
# --------------------------------------------------------------------------------------
def _review_classifier_kernel(
    # inputs
    emb_ref, mask_ref, eg_ref, eb_ref,
    wq_ref, bq_ref, wk_ref, bk_ref, wv_ref, bv_ref, wo_ref, bo_ref,
    ln1g_ref, ln1b_ref, w1_ref, b1_ref, w2_ref, b2_ref, ln2g_ref, ln2b_ref,
    sel_ref, wp_ref, bp_ref, wout_ref, bout_ref,
    # outputs
    logits_ref,
    *, batch, seq):
    scale = 1.0 / math.sqrt(HEAD_DIM)
    dg = (((1,), (0,)), ((), ()))       # a @ b
    dg_t = (((1,), (1,)), ((), ()))     # a @ b.T (no explicit transpose emitted)
    rows = batch * seq

    mask = mask_ref[...]                # (B*S, B*S) additive: block-diag + key-padding

    # --- BERT embeddings LayerNorm (dropout = identity at inference) ---
    h = _layernorm(emb_ref[...], eg_ref[...], eb_ref[...])

    # --- encoder layers, fully unrolled; all intermediates stay in vregs ---
    for l in range(N_LAYERS):
        # Multi-head self-attention for ALL batch rows at once (block-diagonal mask).
        # Per-head output projection is folded in as a sum over heads:
        #   attn_out = sum_h (ctx_h @ Wo[h]) + bo
        acc = jnp.zeros((rows, HIDDEN), jnp.float32)
        for hd in range(N_HEADS):
            i = l * N_HEADS + hd
            q = lax.dot_general(h, wq_ref[i], dg, preferred_element_type=jnp.float32) + bq_ref[i]
            k = lax.dot_general(h, wk_ref[i], dg, preferred_element_type=jnp.float32) + bk_ref[i]
            v = lax.dot_general(h, wv_ref[i], dg, preferred_element_type=jnp.float32) + bv_ref[i]
            s = lax.dot_general(q, k, dg_t, preferred_element_type=jnp.float32) * scale + mask
            s = s - jnp.max(s, axis=-1, keepdims=True)          # stable softmax
            p = jnp.exp(s)
            p = p * pl.reciprocal(jnp.sum(p, axis=-1, keepdims=True), approx=True)
            ctx = lax.dot_general(p, v, dg, preferred_element_type=jnp.float32)     # (B*S, Dh)
            acc = acc + lax.dot_general(ctx, wo_ref[i], dg, preferred_element_type=jnp.float32)

        h1 = _layernorm(acc + bo_ref[l] + h, ln1g_ref[l], ln1b_ref[l])   # residual + LN (fused)

        # feed-forward with fused exact GELU, then residual + LN (fused)
        ff = _gelu_exact(
            lax.dot_general(h1, w1_ref[l], dg, preferred_element_type=jnp.float32) + b1_ref[l])
        ff = lax.dot_general(ff, w2_ref[l], dg, preferred_element_type=jnp.float32) + b2_ref[l]
        h = _layernorm(ff + h1, ln2g_ref[l], ln2b_ref[l])

    # --- pooler: tanh(Linear(hidden[:, 0])), dropout(p=0.3) = identity at eval, classifier ---
    # CLS rows gathered with a tiny one-hot selection matmul (MXU) — no masked row loads.
    cls = lax.dot_general(sel_ref[...], h, dg, preferred_element_type=jnp.float32)     # (B, H)
    pooled = jnp.tanh(
        lax.dot_general(cls, wp_ref[...], dg, preferred_element_type=jnp.float32) + bp_ref[...])
    # TODO(synk): training-mode dropout (p=0.3) would use pltpu.prng_seed / stateful_bernoulli.
    logits_ref[...] = (
        lax.dot_general(pooled, wout_ref[...], dg, preferred_element_type=jnp.float32)
        + bout_ref[...]).astype(logits_ref.dtype)


def review_classifier_pallas(params, emb, big_mask, cls_sel, batch, seq):
    args = (
        emb, big_mask, params["emb_ln_g"], params["emb_ln_b"],
        params["wq"], params["bq"], params["wk"], params["bk"],
        params["wv"], params["bv"], params["wo"], params["bo"],
        params["ln1_g"], params["ln1_b"], params["w1"], params["b1"],
        params["w2"], params["b2"], params["ln2_g"], params["ln2_b"],
        cls_sel, params["wp"], params["bp"], params["wout"], params["bout"],
    )

    def full_spec(a):
        nd = a.ndim
        return pl.BlockSpec(a.shape, lambda i, nd=nd: (0,) * nd)

    kern = functools.partial(_review_classifier_kernel, batch=batch, seq=seq)
    return pl.pallas_call(
        kern,
        out_shape=jax.ShapeDtypeStruct((batch, N_CLASSES), jnp.float32),
        grid=(1,),
        in_specs=[full_spec(a) for a in args],
        out_specs=pl.BlockSpec((batch, N_CLASSES), lambda i: (0, 0)),
        compiler_params=pltpu.CompilerParams(dimension_semantics=("arbitrary",)),
    )(*args)


# --------------------------------------------------------------------------------------
# Deterministic parameter init (synthetic stand-in for bert-base-uncased weights),
# stored directly in the fused / stacked layout the kernel consumes.
# --------------------------------------------------------------------------------------
def init_params(key):
    def nrm(k, shape):
        return 0.02 * jax.random.normal(k, shape, dtype=jnp.float32)

    keys = iter(jax.random.split(key, 16))
    LH = N_LAYERS * N_HEADS
    return {
        "word_emb": nrm(next(keys), (VOCAB, HIDDEN)),
        "pos_emb": nrm(next(keys), (MAX_POS, HIDDEN)),
        "type_emb": nrm(next(keys), (TYPE_VOCAB, HIDDEN)),
        "emb_ln_g": jnp.ones((1, HIDDEN), jnp.float32),
        "emb_ln_b": jnp.zeros((1, HIDDEN), jnp.float32),
        # per-(layer, head) attention projections, stacked on a single leading axis
        "wq": nrm(next(keys), (LH, HIDDEN, HEAD_DIM)),
        "bq": jnp.zeros((LH, 1, HEAD_DIM), jnp.float32),
        "wk": nrm(next(keys), (LH, HIDDEN, HEAD_DIM)),
        "bk": jnp.zeros((LH, 1, HEAD_DIM), jnp.float32),
        "wv": nrm(next(keys), (LH, HIDDEN, HEAD_DIM)),
        "bv": jnp.zeros((LH, 1, HEAD_DIM), jnp.float32),
        "wo": nrm(next(keys), (LH, HEAD_DIM, HIDDEN)),
        "bo": jnp.zeros((N_LAYERS, 1, HIDDEN), jnp.float32),
        "ln1_g": jnp.ones((N_LAYERS, 1, HIDDEN), jnp.float32),
        "ln1_b": jnp.zeros((N_LAYERS, 1, HIDDEN), jnp.float32),
        "w1": nrm(next(keys), (N_LAYERS, HIDDEN, INTERMEDIATE)),
        "b1": jnp.zeros((N_LAYERS, 1, INTERMEDIATE), jnp.float32),
        "w2": nrm(next(keys), (N_LAYERS, INTERMEDIATE, HIDDEN)),
        "b2": jnp.zeros((N_LAYERS, 1, HIDDEN), jnp.float32),
        "ln2_g": jnp.ones((N_LAYERS, 1, HIDDEN), jnp.float32),
        "ln2_b": jnp.zeros((N_LAYERS, 1, HIDDEN), jnp.float32),
        "wp": nrm(next(keys), (HIDDEN, HIDDEN)),
        "bp": jnp.zeros((1, HIDDEN), jnp.float32),
        "wout": nrm(next(keys), (HIDDEN, N_CLASSES)),
        "bout": jnp.zeros((1, N_CLASSES), jnp.float32),
    }


# --------------------------------------------------------------------------------------
# Forward pass: ReviewClassifier.forward(input_ids, attention_mask)
# --------------------------------------------------------------------------------------
def review_classifier_forward(params, input_ids, attention_mask):
    Bb, Ss = input_ids.shape

    # BERT embeddings: gathers are plain-JAX glue (tiny); everything else is in the kernel.
    tok = jnp.take(params["word_emb"], input_ids, axis=0)            # (B,S,H)
    pos = params["pos_emb"][:Ss][None, :, :]                         # (1,S,H)
    typ = params["type_emb"][0][None, None, :]                       # token_type_ids = 0
    emb = (tok + pos + typ).reshape(Bb * Ss, HIDDEN).astype(jnp.float32)

    # Combined additive score mask (B*S, B*S): block-diagonal over the batch (so the kernel can
    # treat all rows as one attention problem) + BERT's (1 - attention_mask) * -10000 key mask.
    batch_idx = jnp.repeat(jnp.arange(Bb), Ss)                       # (B*S,)
    same_batch = batch_idx[:, None] == batch_idx[None, :]
    key_valid = attention_mask.reshape(-1) > 0
    big_mask = jnp.where(same_batch & key_valid[None, :], 0.0, -10000.0).astype(jnp.float32)

    # one-hot row selector for the CLS token of every batch element (constant under jit)
    cls_sel = jax.nn.one_hot(jnp.arange(Bb) * Ss, Bb * Ss, dtype=jnp.float32)   # (B, B*S)

    return review_classifier_pallas(params, emb, big_mask, cls_sel, Bb, Ss)


# --------------------------------------------------------------------------------------
if __name__ == "__main__":
    key = jax.random.PRNGKey(0)
    pkey, ikey = jax.random.split(key)
    params = init_params(pkey)

    input_ids = jax.random.randint(ikey, (B, S), 0, VOCAB, dtype=jnp.int32)
    attention_mask = jnp.ones((B, S), dtype=jnp.int32)
    attention_mask = attention_mask.at[1, S - 2:].set(0)   # some padding in batch 1

    fwd = jax.jit(review_classifier_forward)
    logits = fwd(params, input_ids, attention_mask)
    jax.block_until_ready(logits)

    assert logits.shape == (B, N_CLASSES)
    assert bool(jnp.all(jnp.isfinite(logits)))
    print("KERNEL_OK")
</pallas_src>

<mosaic_0001>
module attributes {stable_mosaic.version = 11 : i64} {
  func.func @_review_classifier_kernel(%arg0: i32, %arg1: memref<16x32xf32, #tpu.memory_space<vmem>>, %arg2: memref<16x16xf32, #tpu.memory_space<vmem>>, %arg3: memref<1x32xf32, #tpu.memory_space<vmem>>, %arg4: memref<1x32xf32, #tpu.memory_space<vmem>>, %arg5: memref<8x32x8xf32, #tpu.memory_space<vmem>>, %arg6: memref<8x1x8xf32, #tpu.memory_space<vmem>>, %arg7: memref<8x32x8xf32, #tpu.memory_space<vmem>>, %arg8: memref<8x1x8xf32, #tpu.memory_space<vmem>>, %arg9: memref<8x32x8xf32, #tpu.memory_space<vmem>>, %arg10: memref<8x1x8xf32, #tpu.memory_space<vmem>>, %arg11: memref<8x8x32xf32, #tpu.memory_space<vmem>>, %arg12: memref<2x1x32xf32, #tpu.memory_space<vmem>>, %arg13: memref<2x1x32xf32, #tpu.memory_space<vmem>>, %arg14: memref<2x1x32xf32, #tpu.memory_space<vmem>>, %arg15: memref<2x32x64xf32, #tpu.memory_space<vmem>>, %arg16: memref<2x1x64xf32, #tpu.memory_space<vmem>>, %arg17: memref<2x64x32xf32, #tpu.memory_space<vmem>>, %arg18: memref<2x1x32xf32, #tpu.memory_space<vmem>>, %arg19: memref<2x1x32xf32, #tpu.memory_space<vmem>>, %arg20: memref<2x1x32xf32, #tpu.memory_space<vmem>>, %arg21: memref<2x16xf32, #tpu.memory_space<vmem>>, %arg22: memref<32x32xf32, #tpu.memory_space<vmem>>, %arg23: memref<1x32xf32, #tpu.memory_space<vmem>>, %arg24: memref<32x3xf32, #tpu.memory_space<vmem>>, %arg25: memref<1x3xf32, #tpu.memory_space<vmem>>, %arg26: memref<2x3xf32, #tpu.memory_space<vmem>>) attributes {dimension_semantics = [#tpu.dimension_semantics<arbitrary>], iteration_bounds = array<i64: 1>, scalar_prefetch = 0 : i64, scratch_operands = 0 : i64, tpu.core_type = #tpu.core_type<tc>, window_params = [{pipeline_mode = #tpu.pipeline_mode<synchronous>, transform_indices = @transform_0, window_bounds = array<i64: 16, 32>}, {pipeline_mode = #tpu.pipeline_mode<synchronous>, transform_indices = @transform_1, window_bounds = array<i64: 16, 16>}, {pipeline_mode = #tpu.pipeline_mode<synchronous>, transform_indices = @transform_2, window_bounds = array<i64: 1, 32>}, {pipeline_mode = #tpu.pipeline_mode<synchronous>, transform_indices = @transform_3, window_bounds = array<i64: 1, 32>}, {pipeline_mode = #tpu.pipeline_mode<synchronous>, transform_indices = @transform_4, window_bounds = array<i64: 8, 32, 8>}, {pipeline_mode = #tpu.pipeline_mode<synchronous>, transform_indices = @transform_5, window_bounds = array<i64: 8, 1, 8>}, {pipeline_mode = #tpu.pipeline_mode<synchronous>, transform_indices = @transform_6, window_bounds = array<i64: 8, 32, 8>}, {pipeline_mode = #tpu.pipeline_mode<synchronous>, transform_indices = @transform_7, window_bounds = array<i64: 8, 1, 8>}, {pipeline_mode = #tpu.pipeline_mode<synchronous>, transform_indices = @transform_8, window_bounds = array<i64: 8, 32, 8>}, {pipeline_mode = #tpu.pipeline_mode<synchronous>, transform_indices = @transform_9, window_bounds = array<i64: 8, 1, 8>}, {pipeline_mode = #tpu.pipeline_mode<synchronous>, transform_indices = @transform_10, window_bounds = array<i64: 8, 8, 32>}, {pipeline_mode = #tpu.pipeline_mode<synchronous>, transform_indices = @transform_11, window_bounds = array<i64: 2, 1, 32>}, {pipeline_mode = #tpu.pipeline_mode<synchronous>, transform_indices = @transform_12, window_bounds = array<i64: 2, 1, 32>}, {pipeline_mode = #tpu.pipeline_mode<synchronous>, transform_indices = @transform_13, window_bounds = array<i64: 2, 1, 32>}, {pipeline_mode = #tpu.pipeline_mode<synchronous>, transform_indices = @transform_14, window_bounds = array<i64: 2, 32, 64>}, {pipeline_mode = #tpu.pipeline_mode<synchronous>, transform_indices = @transform_15, window_bounds = array<i64: 2, 1, 64>}, {pipeline_mode = #tpu.pipeline_mode<synchronous>, transform_indices = @transform_16, window_bounds = array<i64: 2, 64, 32>}, {pipeline_mode = #tpu.pipeline_mode<synchronous>, transform_indices = @transform_17, window_bounds = array<i64: 2, 1, 32>}, {pipeline_mode = #tpu.pipeline_mode<synchronous>, transform_indices = @transform_18, window_bounds = array<i64: 2, 1, 32>}, {pipeline_mode = #tpu.pipeline_mode<synchronous>, transform_indices = @transform_19, window_bounds = array<i64: 2, 1, 32>}, {pipeline_mode = #tpu.pipeline_mode<synchronous>, transform_indices = @transform_20, window_bounds = array<i64: 2, 16>}, {pipeline_mode = #tpu.pipeline_mode<synchronous>, transform_indices = @transform_21, window_bounds = array<i64: 32, 32>}, {pipeline_mode = #tpu.pipeline_mode<synchronous>, transform_indices = @transform_22, window_bounds = array<i64: 1, 32>}, {pipeline_mode = #tpu.pipeline_mode<synchronous>, transform_indices = @transform_23, window_bounds = array<i64: 32, 3>}, {pipeline_mode = #tpu.pipeline_mode<synchronous>, transform_indices = @transform_24, window_bounds = array<i64: 1, 3>}, {pipeline_mode = #tpu.pipeline_mode<synchronous>, transform_indices = @transform_25, window_bounds = array<i64: 2, 3>}]} {
    %c0 = arith.constant 0 : index
    %c0_0 = arith.constant 0 : index
    %0 = vector.load %arg2[%c0, %c0_0] : memref<16x16xf32, #tpu.memory_space<vmem>>, vector<16x16xf32>
    %c0_1 = arith.constant 0 : index
    %c0_2 = arith.constant 0 : index
    %1 = vector.load %arg1[%c0_1, %c0_2] : memref<16x32xf32, #tpu.memory_space<vmem>>, vector<16x32xf32>
    %c0_3 = arith.constant 0 : index
    %c0_4 = arith.constant 0 : index
    %2 = vector.load %arg3[%c0_3, %c0_4] : memref<1x32xf32, #tpu.memory_space<vmem>>, vector<1x32xf32>
    %c0_5 = arith.constant 0 : index
    %c0_6 = arith.constant 0 : index
    %3 = vector.load %arg4[%c0_5, %c0_6] : memref<1x32xf32, #tpu.memory_space<vmem>>, vector<1x32xf32>
    %cst = arith.constant dense<0.000000e+00> : vector<16xf32>
    %4 = vector.multi_reduction <add>, %1, %cst [1] : vector<16x32xf32> to vector<16xf32>
    %5 = vector.shape_cast %4 : vector<16xf32> to vector<16x1xf32>
    %cst_7 = arith.constant 3.200000e+01 : f32
    %6 = vector.broadcast %cst_7 : f32 to vector<16x1xf32>
    %7 = arith.divf %5, %6 : vector<16x1xf32>
    %8 = vector.broadcast %7 : vector<16x1xf32> to vector<16x32xf32>
    %9 = arith.subf %1, %8 : vector<16x32xf32>
    %10 = arith.mulf %9, %9 : vector<16x32xf32>
    %cst_8 = arith.constant dense<0.000000e+00> : vector<16xf32>
    %11 = vector.multi_reduction <add>, %10, %cst_8 [1] : vector<16x32xf32> to vector<16xf32>
    %12 = vector.shape_cast %11 : vector<16xf32> to vector<16x1xf32>
    %cst_9 = arith.constant 3.200000e+01 : f32
    %13 = vector.broadcast %cst_9 : f32 to vector<16x1xf32>
    %14 = arith.divf %12, %13 : vector<16x1xf32>
    %cst_10 = arith.constant 9.99999996E-13 : f32
    %15 = vector.broadcast %cst_10 : f32 to vector<16x1xf32>
    %16 = arith.addf %14, %15 : vector<16x1xf32>
    %17 = math.rsqrt %16 : vector<16x1xf32>
    %18 = vector.broadcast %17 : vector<16x1xf32> to vector<16x32xf32>
    %19 = arith.mulf %9, %18 : vector<16x32xf32>
    %20 = vector.broadcast %2 : vector<1x32xf32> to vector<16x32xf32>
    %21 = arith.mulf %19, %20 : vector<16x32xf32>
    %22 = vector.broadcast %3 : vector<1x32xf32> to vector<16x32xf32>
    %23 = arith.addf %21, %22 : vector<16x32xf32>
    %cst_11 = arith.constant 0.000000e+00 : f32
    %24 = vector.broadcast %cst_11 : f32 to vector<16x32xf32>
    %c0_12 = arith.constant 0 : index
    %c0_13 = arith.constant 0 : index
    %c0_14 = arith.constant 0 : index
    %25 = vector.load %arg5[%c0_12, %c0_13, %c0_14] : memref<8x32x8xf32, #tpu.memory_space<vmem>>, vector<1x32x8xf32>
    %26 = vector.shape_cast %25 : vector<1x32x8xf32> to vector<32x8xf32>
    %cst_15 = arith.constant dense<0.000000e+00> : vector<16x8xf32>
    %27 = tpu.matmul %23, %26, %cst_15 {dimension_numbers = #tpu.dot_dimension_numbers<[1], [0], [0], [1], [0, 0, 1, 1], [], []>} : vector<16x32xf32>, vector<32x8xf32>, vector<16x8xf32> -> vector<16x8xf32>
    %c0_16 = arith.constant 0 : index
    %c0_17 = arith.constant 0 : index
    %c0_18 = arith.constant 0 : index
    %28 = vector.load %arg6[%c0_16, %c0_17, %c0_18] : memref<8x1x8xf32, #tpu.memory_space<vmem>>, vector<1x1x8xf32>
    %29 = vector.shape_cast %28 : vector<1x1x8xf32> to vector<1x8xf32>
    %30 = vector.broadcast %29 : vector<1x8xf32> to vector<16x8xf32>
    %31 = arith.addf %27, %30 : vector<16x8xf32>
    %c0_19 = arith.constant 0 : index
    %c0_20 = arith.constant 0 : index
    %c0_21 = arith.constant 0 : index
    %32 = vector.load %arg7[%c0_19, %c0_20, %c0_21] : memref<8x32x8xf32, #tpu.memory_space<vmem>>, vector<1x32x8xf32>
    %33 = vector.shape_cast %32 : vector<1x32x8xf32> to vector<32x8xf32>
    %cst_22 = arith.constant dense<0.000000e+00> : vector<16x8xf32>
    %34 = tpu.matmul %23, %33, %cst_22 {dimension_numbers = #tpu.dot_dimension_numbers<[1], [0], [0], [1], [0, 0, 1, 1], [], []>} : vector<16x32xf32>, vector<32x8xf32>, vector<16x8xf32> -> vector<16x8xf32>
    %c0_23 = arith.constant 0 : index
    %c0_24 = arith.constant 0 : index
    %c0_25 = arith.constant 0 : index
    %35 = vector.load %arg8[%c0_23, %c0_24, %c0_25] : memref<8x1x8xf32, #tpu.memory_space<vmem>>, vector<1x1x8xf32>
    %36 = vector.shape_cast %35 : vector<1x1x8xf32> to vector<1x8xf32>
    %37 = vector.broadcast %36 : vector<1x8xf32> to vector<16x8xf32>
    %38 = arith.addf %34, %37 : vector<16x8xf32>
    %c0_26 = arith.constant 0 : index
    %c0_27 = arith.constant 0 : index
    %c0_28 = arith.constant 0 : index
    %39 = vector.load %arg9[%c0_26, %c0_27, %c0_28] : memref<8x32x8xf32, #tpu.memory_space<vmem>>, vector<1x32x8xf32>
    %40 = vector.shape_cast %39 : vector<1x32x8xf32> to vector<32x8xf32>
    %cst_29 = arith.constant dense<0.000000e+00> : vector<16x8xf32>
    %41 = tpu.matmul %23, %40, %cst_29 {dimension_numbers = #tpu.dot_dimension_numbers<[1], [0], [0], [1], [0, 0, 1, 1], [], []>} : vector<16x32xf32>, vector<32x8xf32>, vector<16x8xf32> -> vector<16x8xf32>
    %c0_30 = arith.constant 0 : index
    %c0_31 = arith.constant 0 : index
    %c0_32 = arith.constant 0 : index
    %42 = vector.load %arg10[%c0_30, %c0_31, %c0_32] : memref<8x1x8xf32, #tpu.memory_space<vmem>>, vector<1x1x8xf32>
    %43 = vector.shape_cast %42 : vector<1x1x8xf32> to vector<1x8xf32>
    %44 = vector.broadcast %43 : vector<1x8xf32> to vector<16x8xf32>
    %45 = arith.addf %41, %44 : vector<16x8xf32>
    %cst_33 = arith.constant dense<0.000000e+00> : vector<16x16xf32>
    %46 = tpu.matmul %31, %38, %cst_33 {dimension_numbers = #tpu.dot_dimension_numbers<[1], [1], [0], [0], [0, 0, 1, 0], [], []>} : vector<16x8xf32>, vector<16x8xf32>, vector<16x16xf32> -> vector<16x16xf32>
    %cst_34 = arith.constant 0.353553385 : f32
    %47 = vector.broadcast %cst_34 : f32 to vector<16x16xf32>
    %48 = arith.mulf %46, %47 : vector<16x16xf32>
    %49 = arith.addf %48, %0 : vector<16x16xf32>
    %cst_35 = arith.constant dense<0xFF800000> : vector<16xf32>
    %50 = vector.multi_reduction <maximumf>, %49, %cst_35 [1] : vector<16x16xf32> to vector<16xf32>
    %51 = vector.shape_cast %50 : vector<16xf32> to vector<16x1xf32>
    %52 = vector.broadcast %51 : vector<16x1xf32> to vector<16x16xf32>
    %53 = arith.subf %49, %52 : vector<16x16xf32>
    %54 = math.exp %53 : vector<16x16xf32>
    %cst_36 = arith.constant dense<0.000000e+00> : vector<16xf32>
    %55 = vector.multi_reduction <add>, %54, %cst_36 [1] : vector<16x16xf32> to vector<16xf32>
    %56 = vector.shape_cast %55 : vector<16xf32> to vector<16x1xf32>
    %57 = tpu.reciprocal %56 {approx = true} : vector<16x1xf32> -> vector<16x1xf32>
    %58 = vector.broadcast %57 : vector<16x1xf32> to vector<16x16xf32>
    %59 = arith.mulf %54, %58 : vector<16x16xf32>
    %cst_37 = arith.constant dense<0.000000e+00> : vector<16x8xf32>
    %60 = tpu.matmul %59, %45, %cst_37 {dimension_numbers = #tpu.dot_dimension_numbers<[1], [0], [0], [1], [0, 0, 1, 1], [], []>} : vector<16x16xf32>, vector<16x8xf32>, vector<16x8xf32> -> vector<16x8xf32>
    %c0_38 = arith.constant 0 : index
    %c0_39 = arith.constant 0 : index
    %c0_40 = arith.constant 0 : index
    %61 = vector.load %arg11[%c0_38, %c0_39, %c0_40] : memref<8x8x32xf32, #tpu.memory_space<vmem>>, vector<1x8x32xf32>
    %62 = vector.shape_cast %61 : vector<1x8x32xf32> to vector<8x32xf32>
    %cst_41 = arith.constant dense<0.000000e+00> : vector<16x32xf32>
    %63 = tpu.matmul %60, %62, %cst_41 {dimension_numbers = #tpu.dot_dimension_numbers<[1], [0], [0], [1], [0, 0, 1, 1], [], []>} : vector<16x8xf32>, vector<8x32xf32>, vector<16x32xf32> -> vector<16x32xf32>
    %64 = arith.addf %24, %63 : vector<16x32xf32>
    %c1 = arith.constant 1 : index
    %c0_42 = arith.constant 0 : index
    %c0_43 = arith.constant 0 : index
    %65 = vector.load %arg5[%c1, %c0_42, %c0_43] : memref<8x32x8xf32, #tpu.memory_space<vmem>>, vector<1x32x8xf32>
    %66 = vector.shape_cast %65 : vector<1x32x8xf32> to vector<32x8xf32>
    %cst_44 = arith.constant dense<0.000000e+00> : vector<16x8xf32>
    %67 = tpu.matmul %23, %66, %cst_44 {dimension_numbers = #tpu.dot_dimension_numbers<[1], [0], [0], [1], [0, 0, 1, 1], [], []>} : vector<16x32xf32>, vector<32x8xf32>, vector<16x8xf32> -> vector<16x8xf32>
    %c1_45 = arith.constant 1 : index
    %c0_46 = arith.constant 0 : index
    %c0_47 = arith.constant 0 : index
    %68 = vector.load %arg6[%c1_45, %c0_46, %c0_47] : memref<8x1x8xf32, #tpu.memory_space<vmem>>, vector<1x1x8xf32>
    %69 = vector.shape_cast %68 : vector<1x1x8xf32> to vector<1x8xf32>
    %70 = vector.broadcast %69 : vector<1x8xf32> to vector<16x8xf32>
    %71 = arith.addf %67, %70 : vector<16x8xf32>
    %c1_48 = arith.constant 1 : index
    %c0_49 = arith.constant 0 : index
    %c0_50 = arith.constant 0 : index
    %72 = vector.load %arg7[%c1_48, %c0_49, %c0_50] : memref<8x32x8xf32, #tpu.memory_space<vmem>>, vector<1x32x8xf32>
    %73 = vector.shape_cast %72 : vector<1x32x8xf32> to vector<32x8xf32>
    %cst_51 = arith.constant dense<0.000000e+00> : vector<16x8xf32>
    %74 = tpu.matmul %23, %73, %cst_51 {dimension_numbers = #tpu.dot_dimension_numbers<[1], [0], [0], [1], [0, 0, 1, 1], [], []>} : vector<16x32xf32>, vector<32x8xf32>, vector<16x8xf32> -> vector<16x8xf32>
    %c1_52 = arith.constant 1 : index
    %c0_53 = arith.constant 0 : index
    %c0_54 = arith.constant 0 : index
    %75 = vector.load %arg8[%c1_52, %c0_53, %c0_54] : memref<8x1x8xf32, #tpu.memory_space<vmem>>, vector<1x1x8xf32>
    %76 = vector.shape_cast %75 : vector<1x1x8xf32> to vector<1x8xf32>
    %77 = vector.broadcast %76 : vector<1x8xf32> to vector<16x8xf32>
    %78 = arith.addf %74, %77 : vector<16x8xf32>
    %c1_55 = arith.constant 1 : index
    %c0_56 = arith.constant 0 : index
    %c0_57 = arith.constant 0 : index
    %79 = vector.load %arg9[%c1_55, %c0_56, %c0_57] : memref<8x32x8xf32, #tpu.memory_space<vmem>>, vector<1x32x8xf32>
    %80 = vector.shape_cast %79 : vector<1x32x8xf32> to vector<32x8xf32>
    %cst_58 = arith.constant dense<0.000000e+00> : vector<16x8xf32>
    %81 = tpu.matmul %23, %80, %cst_58 {dimension_numbers = #tpu.dot_dimension_numbers<[1], [0], [0], [1], [0, 0, 1, 1], [], []>} : vector<16x32xf32>, vector<32x8xf32>, vector<16x8xf32> -> vector<16x8xf32>
    %c1_59 = arith.constant 1 : index
    %c0_60 = arith.constant 0 : index
    %c0_61 = arith.constant 0 : index
    %82 = vector.load %arg10[%c1_59, %c0_60, %c0_61] : memref<8x1x8xf32, #tpu.memory_space<vmem>>, vector<1x1x8xf32>
    %83 = vector.shape_cast %82 : vector<1x1x8xf32> to vector<1x8xf32>
    %84 = vector.broadcast %83 : vector<1x8xf32> to vector<16x8xf32>
    %85 = arith.addf %81, %84 : vector<16x8xf32>
    %cst_62 = arith.constant dense<0.000000e+00> : vector<16x16xf32>
    %86 = tpu.matmul %71, %78, %cst_62 {dimension_numbers = #tpu.dot_dimension_numbers<[1], [1], [0], [0], [0, 0, 1, 0], [], []>} : vector<16x8xf32>, vector<16x8xf32>, vector<16x16xf32> -> vector<16x16xf32>
    %cst_63 = arith.constant 0.353553385 : f32
    %87 = vector.broadcast %cst_63 : f32 to vector<16x16xf32>
    %88 = arith.mulf %86, %87 : vector<16x16xf32>
    %89 = arith.addf %88, %0 : vector<16x16xf32>
    %cst_64 = arith.constant dense<0xFF800000> : vector<16xf32>
    %90 = vector.multi_reduction <maximumf>, %89, %cst_64 [1] : vector<16x16xf32> to vector<16xf32>
    %91 = vector.shape_cast %90 : vector<16xf32> to vector<16x1xf32>
    %92 = vector.broadcast %91 : vector<16x1xf32> to vector<16x16xf32>
    %93 = arith.subf %89, %92 : vector<16x16xf32>
    %94 = math.exp %93 : vector<16x16xf32>
    %cst_65 = arith.constant dense<0.000000e+00> : vector<16xf32>
    %95 = vector.multi_reduction <add>, %94, %cst_65 [1] : vector<16x16xf32> to vector<16xf32>
    %96 = vector.shape_cast %95 : vector<16xf32> to vector<16x1xf32>
    %97 = tpu.reciprocal %96 {approx = true} : vector<16x1xf32> -> vector<16x1xf32>
    %98 = vector.broadcast %97 : vector<16x1xf32> to vector<16x16xf32>
    %99 = arith.mulf %94, %98 : vector<16x16xf32>
    %cst_66 = arith.constant dense<0.000000e+00> : vector<16x8xf32>
    %100 = tpu.matmul %99, %85, %cst_66 {dimension_numbers = #tpu.dot_dimension_numbers<[1], [0], [0], [1], [0, 0, 1, 1], [], []>} : vector<16x16xf32>, vector<16x8xf32>, vector<16x8xf32> -> vector<16x8xf32>
    %c1_67 = arith.constant 1 : index
    %c0_68 = arith.constant 0 : index
    %c0_69 = arith.constant 0 : index
    %101 = vector.load %arg11[%c1_67, %c0_68, %c0_69] : memref<8x8x32xf32, #tpu.memory_space<vmem>>, vector<1x8x32xf32>
    %102 = vector.shape_cast %101 : vector<1x8x32xf32> to vector<8x32xf32>
    %cst_70 = arith.constant dense<0.000000e+00> : vector<16x32xf32>
    %103 = tpu.matmul %100, %102, %cst_70 {dimension_numbers = #tpu.dot_dimension_numbers<[1], [0], [0], [1], [0, 0, 1, 1], [], []>} : vector<16x8xf32>, vector<8x32xf32>, vector<16x32xf32> -> vector<16x32xf32>
    %104 = arith.addf %64, %103 : vector<16x32xf32>
    %c2 = arith.constant 2 : index
    %c0_71 = arith.constant 0 : index
    %c0_72 = arith.constant 0 : index
    %105 = vector.load %arg5[%c2, %c0_71, %c0_72] : memref<8x32x8xf32, #tpu.memory_space<vmem>>, vector<1x32x8xf32>
    %106 = vector.shape_cast %105 : vector<1x32x8xf32> to vector<32x8xf32>
    %cst_73 = arith.constant dense<0.000000e+00> : vector<16x8xf32>
    %107 = tpu.matmul %23, %106, %cst_73 {dimension_numbers = #tpu.dot_dimension_numbers<[1], [0], [0], [1], [0, 0, 1, 1], [], []>} : vector<16x32xf32>, vector<32x8xf32>, vector<16x8xf32> -> vector<16x8xf32>
    %c2_74 = arith.constant 2 : index
    %c0_75 = arith.constant 0 : index
    %c0_76 = arith.constant 0 : index
    %108 = vector.load %arg6[%c2_74, %c0_75, %c0_76] : memref<8x1x8xf32, #tpu.memory_space<vmem>>, vector<1x1x8xf32>
    %109 = vector.shape_cast %108 : vector<1x1x8xf32> to vector<1x8xf32>
    %110 = vector.broadcast %109 : vector<1x8xf32> to vector<16x8xf32>
    %111 = arith.addf %107, %110 : vector<16x8xf32>
    %c2_77 = arith.constant 2 : index
    %c0_78 = arith.constant 0 : index
    %c0_79 = arith.constant 0 : index
    %112 = vector.load %arg7[%c2_77, %c0_78, %c0_79] : memref<8x32x8xf32, #tpu.memory_space<vmem>>, vector<1x32x8xf32>
    %113 = vector.shape_cast %112 : vector<1x32x8xf32> to vector<32x8xf32>
    %cst_80 = arith.constant dense<0.000000e+00> : vector<16x8xf32>
    %114 = tpu.matmul %23, %113, %cst_80 {dimension_numbers = #tpu.dot_dimension_numbers<[1], [0], [0], [1], [0, 0, 1, 1], [], []>} : vector<16x32xf32>, vector<32x8xf32>, vector<16x8xf32> -> vector<16x8xf32>
    %c2_81 = arith.constant 2 : index
    %c0_82 = arith.constant 0 : index
    %c0_83 = arith.constant 0 : index
    %115 = vector.load %arg8[%c2_81, %c0_82, %c0_83] : memref<8x1x8xf32, #tpu.memory_space<vmem>>, vector<1x1x8xf32>
    %116 = vector.shape_cast %115 : vector<1x1x8xf32> to vector<1x8xf32>
    %117 = vector.broadcast %116 : vector<1x8xf32> to vector<16x8xf32>
    %118 = arith.addf %114, %117 : vector<16x8xf32>
    %c2_84 = arith.constant 2 : index
    %c0_85 = arith.constant 0 : index
    %c0_86 = arith.constant 0 : index
    %119 = vector.load %arg9[%c2_84, %c0_85, %c0_86] : memref<8x32x8xf32, #tpu.memory_space<vmem>>, vector<1x32x8xf32>
    %120 = vector.shape_cast %119 : vector<1x32x8xf32> to vector<32x8xf32>
    %cst_87 = arith.constant dense<0.000000e+00> : vector<16x8xf32>
    %121 = tpu.matmul %23, %120, %cst_87 {dimension_numbers = #tpu.dot_dimension_numbers<[1], [0], [0], [1], [0, 0, 1, 1], [], []>} : vector<16x32xf32>, vector<32x8xf32>, vector<16x8xf32> -> vector<16x8xf32>
    %c2_88 = arith.constant 2 : index
    %c0_89 = arith.constant 0 : index
    %c0_90 = arith.constant 0 : index
    %122 = vector.load %arg10[%c2_88, %c0_89, %c0_90] : memref<8x1x8xf32, #tpu.memory_space<vmem>>, vector<1x1x8xf32>
    %123 = vector.shape_cast %122 : vector<1x1x8xf32> to vector<1x8xf32>
    %124 = vector.broadcast %123 : vector<1x8xf32> to vector<16x8xf32>
    %125 = arith.addf %121, %124 : vector<16x8xf32>
    %cst_91 = arith.constant dense<0.000000e+00> : vector<16x16xf32>
    %126 = tpu.matmul %111, %118, %cst_91 {dimension_numbers = #tpu.dot_dimension_numbers<[1], [1], [0], [0], [0, 0, 1, 0], [], []>} : vector<16x8xf32>, vector<16x8xf32>, vector<16x16xf32> -> vector<16x16xf32>
    %cst_92 = arith.constant 0.353553385 : f32
    %127 = vector.broadcast %cst_92 : f32 to vector<16x16xf32>
    %128 = arith.mulf %126, %127 : vector<16x16xf32>
    %129 = arith.addf %128, %0 : vector<16x16xf32>
    %cst_93 = arith.constant dense<0xFF800000> : vector<16xf32>
    %130 = vector.multi_reduction <maximumf>, %129, %cst_93 [1] : vector<16x16xf32> to vector<16xf32>
    %131 = vector.shape_cast %130 : vector<16xf32> to vector<16x1xf32>
    %132 = vector.broadcast %131 : vector<16x1xf32> to vector<16x16xf32>
    %133 = arith.subf %129, %132 : vector<16x16xf32>
    %134 = math.exp %133 : vector<16x16xf32>
    %cst_94 = arith.constant dense<0.000000e+00> : vector<16xf32>
    %135 = vector.multi_reduction <add>, %134, %cst_94 [1] : vector<16x16xf32> to vector<16xf32>
    %136 = vector.shape_cast %135 : vector<16xf32> to vector<16x1xf32>
    %137 = tpu.reciprocal %136 {approx = true} : vector<16x1xf32> -> vector<16x1xf32>
    %138 = vector.broadcast %137 : vector<16x1xf32> to vector<16x16xf32>
    %139 = arith.mulf %134, %138 : vector<16x16xf32>
    %cst_95 = arith.constant dense<0.000000e+00> : vector<16x8xf32>
    %140 = tpu.matmul %139, %125, %cst_95 {dimension_numbers = #tpu.dot_dimension_numbers<[1], [0], [0], [1], [0, 0, 1, 1], [], []>} : vector<16x16xf32>, vector<16x8xf32>, vector<16x8xf32> -> vector<16x8xf32>
    %c2_96 = arith.constant 2 : index
    %c0_97 = arith.constant 0 : index
    %c0_98 = arith.constant 0 : index
    %141 = vector.load %arg11[%c2_96, %c0_97, %c0_98] : memref<8x8x32xf32, #tpu.memory_space<vmem>>, vector<1x8x32xf32>
    %142 = vector.shape_cast %141 : vector<1x8x32xf32> to vector<8x32xf32>
    %cst_99 = arith.constant dense<0.000000e+00> : vector<16x32xf32>
    %143 = tpu.matmul %140, %142, %cst_99 {dimension_numbers = #tpu.dot_dimension_numbers<[1], [0], [0], [1], [0, 0, 1, 1], [], []>} : vector<16x8xf32>, vector<8x32xf32>, vector<16x32xf32> -> vector<16x32xf32>
    %144 = arith.addf %104, %143 : vector<16x32xf32>
    %c3 = arith.constant 3 : index
    %c0_100 = arith.constant 0 : index
    %c0_101 = arith.constant 0 : index
    %145 = vector.load %arg5[%c3, %c0_100, %c0_101] : memref<8x32x8xf32, #tpu.memory_space<vmem>>, vector<1x32x8xf32>
    %146 = vector.shape_cast %145 : vector<1x32x8xf32> to vector<32x8xf32>
    %cst_102 = arith.constant dense<0.000000e+00> : vector<16x8xf32>
    %147 = tpu.matmul %23, %146, %cst_102 {dimension_numbers = #tpu.dot_dimension_numbers<[1], [0], [0], [1], [0, 0, 1, 1], [], []>} : vector<16x32xf32>, vector<32x8xf32>, vector<16x8xf32> -> vector<16x8xf32>
    %c3_103 = arith.constant 3 : index
    %c0_104 = arith.constant 0 : index
    %c0_105 = arith.constant 0 : index
    %148 = vector.load %arg6[%c3_103, %c0_104, %c0_105] : memref<8x1x8xf32, #tpu.memory_space<vmem>>, vector<1x1x8xf32>
    %149 = vector.shape_cast %148 : vector<1x1x8xf32> to vector<1x8xf32>
    %150 = vector.broadcast %149 : vector<1x8xf32> to vector<16x8xf32>
    %151 = arith.addf %147, %150 : vector<16x8xf32>
    %c3_106 = arith.constant 3 : index
    %c0_107 = arith.constant 0 : index
    %c0_108 = arith.constant 0 : index
    %152 = vector.load %arg7[%c3_106, %c0_107, %c0_108] : memref<8x32x8xf32, #tpu.memory_space<vmem>>, vector<1x32x8xf32>
    %153 = vector.shape_cast %152 : vector<1x32x8xf32> to vector<32x8xf32>
    %cst_109 = arith.constant dense<0.000000e+00> : vector<16x8xf32>
    %154 = tpu.matmul %23, %153, %cst_109 {dimension_numbers = #tpu.dot_dimension_numbers<[1], [0], [0], [1], [0, 0, 1, 1], [], []>} : vector<16x32xf32>, vector<32x8xf32>, vector<16x8xf32> -> vector<16x8xf32>
    %c3_110 = arith.constant 3 : index
    %c0_111 = arith.constant 0 : index
    %c0_112 = arith.constant 0 : index
    %155 = vector.load %arg8[%c3_110, %c0_111, %c0_112] : memref<8x1x8xf32, #tpu.memory_space<vmem>>, vector<1x1x8xf32>
    %156 = vector.shape_cast %155 : vector<1x1x8xf32> to vector<1x8xf32>
    %157 = vector.broadcast %156 : vector<1x8xf32> to vector<16x8xf32>
    %158 = arith.addf %154, %157 : vector<16x8xf32>
    %c3_113 = arith.constant 3 : index
    %c0_114 = arith.constant 0 : index
    %c0_115 = arith.constant 0 : index
    %159 = vector.load %arg9[%c3_113, %c0_114, %c0_115] : memref<8x32x8xf32, #tpu.memory_space<vmem>>, vector<1x32x8xf32>
    %160 = vector.shape_cast %159 : vector<1x32x8xf32> to vector<32x8xf32>
    %cst_116 = arith.constant dense<0.000000e+00> : vector<16x8xf32>
    %161 = tpu.matmul %23, %160, %cst_116 {dimension_numbers = #tpu.dot_dimension_numbers<[1], [0], [0], [1], [0, 0, 1, 1], [], []>} : vector<16x32xf32>, vector<32x8xf32>, vector<16x8xf32> -> vector<16x8xf32>
    %c3_117 = arith.constant 3 : index
    %c0_118 = arith.constant 0 : index
    %c0_119 = arith.constant 0 : index
    %162 = vector.load %arg10[%c3_117, %c0_118, %c0_119] : memref<8x1x8xf32, #tpu.memory_space<vmem>>, vector<1x1x8xf32>
    %163 = vector.shape_cast %162 : vector<1x1x8xf32> to vector<1x8xf32>
    %164 = vector.broadcast %163 : vector<1x8xf32> to vector<16x8xf32>
    %165 = arith.addf %161, %164 : vector<16x8xf32>
    %cst_120 = arith.constant dense<0.000000e+00> : vector<16x16xf32>
    %166 = tpu.matmul %151, %158, %cst_120 {dimension_numbers = #tpu.dot_dimension_numbers<[1], [1], [0], [0], [0, 0, 1, 0], [], []>} : vector<16x8xf32>, vector<16x8xf32>, vector<16x16xf32> -> vector<16x16xf32>
    %cst_121 = arith.constant 0.353553385 : f32
    %167 = vector.broadcast %cst_121 : f32 to vector<16x16xf32>
    %168 = arith.mulf %166, %167 : vector<16x16xf32>
    %169 = arith.addf %168, %0 : vector<16x16xf32>
    %cst_122 = arith.constant dense<0xFF800000> : vector<16xf32>
    %170 = vector.multi_reduction <maximumf>, %169, %cst_122 [1] : vector<16x16xf32> to vector<16xf32>
    %171 = vector.shape_cast %170 : vector<16xf32> to vector<16x1xf32>
    %172 = vector.broadcast %171 : vector<16x1xf32> to vector<16x16xf32>
    %173 = arith.subf %169, %172 : vector<16x16xf32>
    %174 = math.exp %173 : vector<16x16xf32>
    %cst_123 = arith.constant dense<0.000000e+00> : vector<16xf32>
    %175 = vector.multi_reduction <add>, %174, %cst_123 [1] : vector<16x16xf32> to vector<16xf32>
    %176 = vector.shape_cast %175 : vector<16xf32> to vector<16x1xf32>
    %177 = tpu.reciprocal %176 {approx = true} : vector<16x1xf32> -> vector<16x1xf32>
    %178 = vector.broadcast %177 : vector<16x1xf32> to vector<16x16xf32>
    %179 = arith.mulf %174, %178 : vector<16x16xf32>
    %cst_124 = arith.constant dense<0.000000e+00> : vector<16x8xf32>
    %180 = tpu.matmul %179, %165, %cst_124 {dimension_numbers = #tpu.dot_dimension_numbers<[1], [0], [0], [1], [0, 0, 1, 1], [], []>} : vector<16x16xf32>, vector<16x8xf32>, vector<16x8xf32> -> vector<16x8xf32>
    %c3_125 = arith.constant 3 : index
    %c0_126 = arith.constant 0 : index
    %c0_127 = arith.constant 0 : index
    %181 = vector.load %arg11[%c3_125, %c0_126, %c0_127] : memref<8x8x32xf32, #tpu.memory_space<vmem>>, vector<1x8x32xf32>
    %182 = vector.shape_cast %181 : vector<1x8x32xf32> to vector<8x32xf32>
    %cst_128 = arith.constant dense<0.000000e+00> : vector<16x32xf32>
    %183 = tpu.matmul %180, %182, %cst_128 {dimension_numbers = #tpu.dot_dimension_numbers<[1], [0], [0], [1], [0, 0, 1, 1], [], []>} : vector<16x8xf32>, vector<8x32xf32>, vector<16x32xf32> -> vector<16x32xf32>
    %184 = arith.addf %144, %183 : vector<16x32xf32>
    %c0_129 = arith.constant 0 : index
    %c0_130 = arith.constant 0 : index
    %c0_131 = arith.constant 0 : index
    %185 = vector.load %arg12[%c0_129, %c0_130, %c0_131] : memref<2x1x32xf32, #tpu.memory_space<vmem>>, vector<1x1x32xf32>
    %186 = vector.shape_cast %185 : vector<1x1x32xf32> to vector<1x32xf32>
    %187 = vector.broadcast %186 : vector<1x32xf32> to vector<16x32xf32>
    %188 = arith.addf %184, %187 : vector<16x32xf32>
    %189 = arith.addf %188, %23 : vector<16x32xf32>
    %c0_132 = arith.constant 0 : index
    %c0_133 = arith.constant 0 : index
    %c0_134 = arith.constant 0 : index
    %190 = vector.load %arg13[%c0_132, %c0_133, %c0_134] : memref<2x1x32xf32, #tpu.memory_space<vmem>>, vector<1x1x32xf32>
    %191 = vector.shape_cast %190 : vector<1x1x32xf32> to vector<1x32xf32>
    %c0_135 = arith.constant 0 : index
    %c0_136 = arith.constant 0 : index
    %c0_137 = arith.constant 0 : index
    %192 = vector.load %arg14[%c0_135, %c0_136, %c0_137] : memref<2x1x32xf32, #tpu.memory_space<vmem>>, vector<1x1x32xf32>
    %193 = vector.shape_cast %192 : vector<1x1x32xf32> to vector<1x32xf32>
    %cst_138 = arith.constant dense<0.000000e+00> : vector<16xf32>
    %194 = vector.multi_reduction <add>, %189, %cst_138 [1] : vector<16x32xf32> to vector<16xf32>
    %195 = vector.shape_cast %194 : vector<16xf32> to vector<16x1xf32>
    %cst_139 = arith.constant 3.200000e+01 : f32
    %196 = vector.broadcast %cst_139 : f32 to vector<16x1xf32>
    %197 = arith.divf %195, %196 : vector<16x1xf32>
    %198 = vector.broadcast %197 : vector<16x1xf32> to vector<16x32xf32>
    %199 = arith.subf %189, %198 : vector<16x32xf32>
    %200 = arith.mulf %199, %199 : vector<16x32xf32>
    %cst_140 = arith.constant dense<0.000000e+00> : vector<16xf32>
    %201 = vector.multi_reduction <add>, %200, %cst_140 [1] : vector<16x32xf32> to vector<16xf32>
    %202 = vector.shape_cast %201 : vector<16xf32> to vector<16x1xf32>
    %cst_141 = arith.constant 3.200000e+01 : f32
    %203 = vector.broadcast %cst_141 : f32 to vector<16x1xf32>
    %204 = arith.divf %202, %203 : vector<16x1xf32>
    %cst_142 = arith.constant 9.99999996E-13 : f32
    %205 = vector.broadcast %cst_142 : f32 to vector<16x1xf32>
    %206 = arith.addf %204, %205 : vector<16x1xf32>
    %207 = math.rsqrt %206 : vector<16x1xf32>
    %208 = vector.broadcast %207 : vector<16x1xf32> to vector<16x32xf32>
    %209 = arith.mulf %199, %208 : vector<16x32xf32>
    %210 = vector.broadcast %191 : vector<1x32xf32> to vector<16x32xf32>
    %211 = arith.mulf %209, %210 : vector<16x32xf32>
    %212 = vector.broadcast %193 : vector<1x32xf32> to vector<16x32xf32>
    %213 = arith.addf %211, %212 : vector<16x32xf32>
    %c0_143 = arith.constant 0 : index
    %c0_144 = arith.constant 0 : index
    %c0_145 = arith.constant 0 : index
    %214 = vector.load %arg15[%c0_143, %c0_144, %c0_145] : memref<2x32x64xf32, #tpu.memory_space<vmem>>, vector<1x32x64xf32>
    %215 = vector.shape_cast %214 : vector<1x32x64xf32> to vector<32x64xf32>
    %cst_146 = arith.constant dense<0.000000e+00> : vector<16x64xf32>
    %216 = tpu.matmul %213, %215, %cst_146 {dimension_numbers = #tpu.dot_dimension_numbers<[1], [0], [0], [1], [0, 0, 1, 1], [], []>} : vector<16x32xf32>, vector<32x64xf32>, vector<16x64xf32> -> vector<16x64xf32>
    %c0_147 = arith.constant 0 : index
    %c0_148 = arith.constant 0 : index
    %c0_149 = arith.constant 0 : index
    %217 = vector.load %arg16[%c0_147, %c0_148, %c0_149] : memref<2x1x64xf32, #tpu.memory_space<vmem>>, vector<1x1x64xf32>
    %218 = vector.shape_cast %217 : vector<1x1x64xf32> to vector<1x64xf32>
    %219 = vector.broadcast %218 : vector<1x64xf32> to vector<16x64xf32>
    %220 = arith.addf %216, %219 : vector<16x64xf32>
    %cst_150 = arith.constant 0.707106769 : f32
    %221 = vector.broadcast %cst_150 : f32 to vector<16x64xf32>
    %222 = arith.mulf %220, %221 : vector<16x64xf32>
    %223 = math.absf %222 : vector<16x64xf32>
    %cst_151 = arith.constant 0.327591091 : f32
    %224 = vector.broadcast %cst_151 : f32 to vector<16x64xf32>
    %225 = arith.mulf %224, %223 : vector<16x64xf32>
    %cst_152 = arith.constant 1.000000e+00 : f32
    %226 = vector.broadcast %cst_152 : f32 to vector<16x64xf32>
    %227 = arith.addf %226, %225 : vector<16x64xf32>
    %cst_153 = arith.constant 1.000000e+00 : f32
    %228 = vector.broadcast %cst_153 : f32 to vector<16x64xf32>
    %229 = arith.divf %228, %227 : vector<16x64xf32>
    %cst_154 = arith.constant 1.06140542 : f32
    %230 = vector.broadcast %cst_154 : f32 to vector<16x64xf32>
    %231 = arith.mulf %229, %230 : vector<16x64xf32>
    %cst_155 = arith.constant -1.45315206 : f32
    %232 = vector.broadcast %cst_155 : f32 to vector<16x64xf32>
    %233 = arith.addf %232, %231 : vector<16x64xf32>
    %234 = arith.mulf %229, %233 : vector<16x64xf32>
    %cst_156 = arith.constant 1.42141378 : f32
    %235 = vector.broadcast %cst_156 : f32 to vector<16x64xf32>
    %236 = arith.addf %235, %234 : vector<16x64xf32>
    %237 = arith.mulf %229, %236 : vector<16x64xf32>
    %cst_157 = arith.constant -0.284496725 : f32
    %238 = vector.broadcast %cst_157 : f32 to vector<16x64xf32>
    %239 = arith.addf %238, %237 : vector<16x64xf32>
    %240 = arith.mulf %229, %239 : vector<16x64xf32>
    %cst_158 = arith.constant 0.254829586 : f32
    %241 = vector.broadcast %cst_158 : f32 to vector<16x64xf32>
    %242 = arith.addf %241, %240 : vector<16x64xf32>
    %243 = arith.mulf %229, %242 : vector<16x64xf32>
    %cst_159 = arith.constant 0.000000e+00 : f32
    %244 = vector.broadcast %cst_159 : f32 to vector<16x64xf32>
    %245 = arith.subf %244, %223 : vector<16x64xf32>
    %246 = arith.mulf %245, %223 : vector<16x64xf32>
    %247 = math.exp %246 : vector<16x64xf32>
    %248 = arith.mulf %243, %247 : vector<16x64xf32>
    %cst_160 = arith.constant 1.000000e+00 : f32
    %249 = vector.broadcast %cst_160 : f32 to vector<16x64xf32>
    %250 = arith.subf %249, %248 : vector<16x64xf32>
    %cst_161 = arith.constant 0.000000e+00 : f32
    %251 = vector.broadcast %cst_161 : f32 to vector<16x64xf32>
    %252 = arith.cmpf oge, %222, %251 : vector<16x64xf32>
    %cst_162 = arith.constant 0.000000e+00 : f32
    %253 = vector.broadcast %cst_162 : f32 to vector<16x64xf32>
    %254 = arith.subf %253, %250 : vector<16x64xf32>
    %255 = arith.select %252, %250, %254 : vector<16x64xi1>, vector<16x64xf32>
    %cst_163 = arith.constant 5.000000e-01 : f32
    %256 = vector.broadcast %cst_163 : f32 to vector<16x64xf32>
    %257 = arith.mulf %256, %220 : vector<16x64xf32>
    %cst_164 = arith.constant 1.000000e+00 : f32
    %258 = vector.broadcast %cst_164 : f32 to vector<16x64xf32>
    %259 = arith.addf %258, %255 : vector<16x64xf32>
    %260 = arith.mulf %257, %259 : vector<16x64xf32>
    %c0_165 = arith.constant 0 : index
    %c0_166 = arith.constant 0 : index
    %c0_167 = arith.constant 0 : index
    %261 = vector.load %arg17[%c0_165, %c0_166, %c0_167] : memref<2x64x32xf32, #tpu.memory_space<vmem>>, vector<1x64x32xf32>
    %262 = vector.shape_cast %261 : vector<1x64x32xf32> to vector<64x32xf32>
    %cst_168 = arith.constant dense<0.000000e+00> : vector<16x32xf32>
    %263 = tpu.matmul %260, %262, %cst_168 {dimension_numbers = #tpu.dot_dimension_numbers<[1], [0], [0], [1], [0, 0, 1, 1], [], []>} : vector<16x64xf32>, vector<64x32xf32>, vector<16x32xf32> -> vector<16x32xf32>
    %c0_169 = arith.constant 0 : index
    %c0_170 = arith.constant 0 : index
    %c0_171 = arith.constant 0 : index
    %264 = vector.load %arg18[%c0_169, %c0_170, %c0_171] : memref<2x1x32xf32, #tpu.memory_space<vmem>>, vector<1x1x32xf32>
    %265 = vector.shape_cast %264 : vector<1x1x32xf32> to vector<1x32xf32>
    %266 = vector.broadcast %265 : vector<1x32xf32> to vector<16x32xf32>
    %267 = arith.addf %263, %266 : vector<16x32xf32>
    %268 = arith.addf %267, %213 : vector<16x32xf32>
    %c0_172 = arith.constant 0 : index
    %c0_173 = arith.constant 0 : index
    %c0_174 = arith.constant 0 : index
    %269 = vector.load %arg19[%c0_172, %c0_173, %c0_174] : memref<2x1x32xf32, #tpu.memory_space<vmem>>, vector<1x1x32xf32>
    %270 = vector.shape_cast %269 : vector<1x1x32xf32> to vector<1x32xf32>
    %c0_175 = arith.constant 0 : index
    %c0_176 = arith.constant 0 : index
    %c0_177 = arith.constant 0 : index
    %271 = vector.load %arg20[%c0_175, %c0_176, %c0_177] : memref<2x1x32xf32, #tpu.memory_space<vmem>>, vector<1x1x32xf32>
    %272 = vector.shape_cast %271 : vector<1x1x32xf32> to vector<1x32xf32>
    %cst_178 = arith.constant dense<0.000000e+00> : vector<16xf32>
    %273 = vector.multi_reduction <add>, %268, %cst_178 [1] : vector<16x32xf32> to vector<16xf32>
    %274 = vector.shape_cast %273 : vector<16xf32> to vector<16x1xf32>
    %cst_179 = arith.constant 3.200000e+01 : f32
    %275 = vector.broadcast %cst_179 : f32 to vector<16x1xf32>
    %276 = arith.divf %274, %275 : vector<16x1xf32>
    %277 = vector.broadcast %276 : vector<16x1xf32> to vector<16x32xf32>
    %278 = arith.subf %268, %277 : vector<16x32xf32>
    %279 = arith.mulf %278, %278 : vector<16x32xf32>
    %cst_180 = arith.constant dense<0.000000e+00> : vector<16xf32>
    %280 = vector.multi_reduction <add>, %279, %cst_180 [1] : vector<16x32xf32> to vector<16xf32>
    %281 = vector.shape_cast %280 : vector<16xf32> to vector<16x1xf32>
    %cst_181 = arith.constant 3.200000e+01 : f32
    %282 = vector.broadcast %cst_181 : f32 to vector<16x1xf32>
    %283 = arith.divf %281, %282 : vector<16x1xf32>
    %cst_182 = arith.constant 9.99999996E-13 : f32
    %284 = vector.broadcast %cst_182 : f32 to vector<16x1xf32>
    %285 = arith.addf %283, %284 : vector<16x1xf32>
    %286 = math.rsqrt %285 : vector<16x1xf32>
    %287 = vector.broadcast %286 : vector<16x1xf32> to vector<16x32xf32>
    %288 = arith.mulf %278, %287 : vector<16x32xf32>
    %289 = vector.broadcast %270 : vector<1x32xf32> to vector<16x32xf32>
    %290 = arith.mulf %288, %289 : vector<16x32xf32>
    %291 = vector.broadcast %272 : vector<1x32xf32> to vector<16x32xf32>
    %292 = arith.addf %290, %291 : vector<16x32xf32>
    %cst_183 = arith.constant 0.000000e+00 : f32
    %293 = vector.broadcast %cst_183 : f32 to vector<16x32xf32>
    %c4 = arith.constant 4 : index
    %c0_184 = arith.constant 0 : index
    %c0_185 = arith.constant 0 : index
    %294 = vector.load %arg5[%c4, %c0_184, %c0_185] : memref<8x32x8xf32, #tpu.memory_space<vmem>>, vector<1x32x8xf32>
    %295 = vector.shape_cast %294 : vector<1x32x8xf32> to vector<32x8xf32>
    %cst_186 = arith.constant dense<0.000000e+00> : vector<16x8xf32>
    %296 = tpu.matmul %292, %295, %cst_186 {dimension_numbers = #tpu.dot_dimension_numbers<[1], [0], [0], [1], [0, 0, 1, 1], [], []>} : vector<16x32xf32>, vector<32x8xf32>, vector<16x8xf32> -> vector<16x8xf32>
    %c4_187 = arith.constant 4 : index
    %c0_188 = arith.constant 0 : index
    %c0_189 = arith.constant 0 : index
    %297 = vector.load %arg6[%c4_187, %c0_188, %c0_189] : memref<8x1x8xf32, #tpu.memory_space<vmem>>, vector<1x1x8xf32>
    %298 = vector.shape_cast %297 : vector<1x1x8xf32> to vector<1x8xf32>
    %299 = vector.broadcast %298 : vector<1x8xf32> to vector<16x8xf32>
    %300 = arith.addf %296, %299 : vector<16x8xf32>
    %c4_190 = arith.constant 4 : index
    %c0_191 = arith.constant 0 : index
    %c0_192 = arith.constant 0 : index
    %301 = vector.load %arg7[%c4_190, %c0_191, %c0_192] : memref<8x32x8xf32, #tpu.memory_space<vmem>>, vector<1x32x8xf32>
    %302 = vector.shape_cast %301 : vector<1x32x8xf32> to vector<32x8xf32>
    %cst_193 = arith.constant dense<0.000000e+00> : vector<16x8xf32>
    %303 = tpu.matmul %292, %302, %cst_193 {dimension_numbers = #tpu.dot_dimension_numbers<[1], [0], [0], [1], [0, 0, 1, 1], [], []>} : vector<16x32xf32>, vector<32x8xf32>, vector<16x8xf32> -> vector<16x8xf32>
    %c4_194 = arith.constant 4 : index
    %c0_195 = arith.constant 0 : index
    %c0_196 = arith.constant 0 : index
    %304 = vector.load %arg8[%c4_194, %c0_195, %c0_196] : memref<8x1x8xf32, #tpu.memory_space<vmem>>, vector<1x1x8xf32>
    %305 = vector.shape_cast %304 : vector<1x1x8xf32> to vector<1x8xf32>
    %306 = vector.broadcast %305 : vector<1x8xf32> to vector<16x8xf32>
    %307 = arith.addf %303, %306 : vector<16x8xf32>
    %c4_197 = arith.constant 4 : index
    %c0_198 = arith.constant 0 : index
    %c0_199 = arith.constant 0 : index
    %308 = vector.load %arg9[%c4_197, %c0_198, %c0_199] : memref<8x32x8xf32, #tpu.memory_space<vmem>>, vector<1x32x8xf32>
    %309 = vector.shape_cast %308 : vector<1x32x8xf32> to vector<32x8xf32>
    %cst_200 = arith.constant dense<0.000000e+00> : vector<16x8xf32>
    %310 = tpu.matmul %292, %309, %cst_200 {dimension_numbers = #tpu.dot_dimension_numbers<[1], [0], [0], [1], [0, 0, 1, 1], [], []>} : vector<16x32xf32>, vector<32x8xf32>, vector<16x8xf32> -> vector<16x8xf32>
    %c4_201 = arith.constant 4 : index
    %c0_202 = arith.constant 0 : index
    %c0_203 = arith.constant 0 : index
    %311 = vector.load %arg10[%c4_201, %c0_202, %c0_203] : memref<8x1x8xf32, #tpu.memory_space<vmem>>, vector<1x1x8xf32>
    %312 = vector.shape_cast %311 : vector<1x1x8xf32> to vector<1x8xf32>
    %313 = vector.broadcast %312 : vector<1x8xf32> to vector<16x8xf32>
    %314 = arith.addf %310, %313 : vector<16x8xf32>
    %cst_204 = arith.constant dense<0.000000e+00> : vector<16x16xf32>
    %315 = tpu.matmul %300, %307, %cst_204 {dimension_numbers = #tpu.dot_dimension_numbers<[1], [1], [0], [0], [0, 0, 1, 0], [], []>} : vector<16x8xf32>, vector<16x8xf32>, vector<16x16xf32> -> vector<16x16xf32>
    %cst_205 = arith.constant 0.353553385 : f32
    %316 = vector.broadcast %cst_205 : f32 to vector<16x16xf32>
    %317 = arith.mulf %315, %316 : vector<16x16xf32>
    %318 = arith.addf %317, %0 : vector<16x16xf32>
    %cst_206 = arith.constant dense<0xFF800000> : vector<16xf32>
    %319 = vector.multi_reduction <maximumf>, %318, %cst_206 [1] : vector<16x16xf32> to vector<16xf32>
    %320 = vector.shape_cast %319 : vector<16xf32> to vector<16x1xf32>
    %321 = vector.broadcast %320 : vector<16x1xf32> to vector<16x16xf32>
    %322 = arith.subf %318, %321 : vector<16x16xf32>
    %323 = math.exp %322 : vector<16x16xf32>
    %cst_207 = arith.constant dense<0.000000e+00> : vector<16xf32>
    %324 = vector.multi_reduction <add>, %323, %cst_207 [1] : vector<16x16xf32> to vector<16xf32>
    %325 = vector.shape_cast %324 : vector<16xf32> to vector<16x1xf32>
    %326 = tpu.reciprocal %325 {approx = true} : vector<16x1xf32> -> vector<16x1xf32>
    %327 = vector.broadcast %326 : vector<16x1xf32> to vector<16x16xf32>
    %328 = arith.mulf %323, %327 : vector<16x16xf32>
    %cst_208 = arith.constant dense<0.000000e+00> : vector<16x8xf32>
    %329 = tpu.matmul %328, %314, %cst_208 {dimension_numbers = #tpu.dot_dimension_numbers<[1], [0], [0], [1], [0, 0, 1, 1], [], []>} : vector<16x16xf32>, vector<16x8xf32>, vector<16x8xf32> -> vector<16x8xf32>
    %c4_209 = arith.constant 4 : index
    %c0_210 = arith.constant 0 : index
    %c0_211 = arith.constant 0 : index
    %330 = vector.load %arg11[%c4_209, %c0_210, %c0_211] : memref<8x8x32xf32, #tpu.memory_space<vmem>>, vector<1x8x32xf32>
    %331 = vector.shape_cast %330 : vector<1x8x32xf32> to vector<8x32xf32>
    %cst_212 = arith.constant dense<0.000000e+00> : vector<16x32xf32>
    %332 = tpu.matmul %329, %331, %cst_212 {dimension_numbers = #tpu.dot_dimension_numbers<[1], [0], [0], [1], [0, 0, 1, 1], [], []>} : vector<16x8xf32>, vector<8x32xf32>, vector<16x32xf32> -> vector<16x32xf32>
    %333 = arith.addf %293, %332 : vector<16x32xf32>
    %c5 = arith.constant 5 : index
    %c0_213 = arith.constant 0 : index
    %c0_214 = arith.constant 0 : index
    %334 = vector.load %arg5[%c5, %c0_213, %c0_214] : memref<8x32x8xf32, #tpu.memory_space<vmem>>, vector<1x32x8xf32>
    %335 = vector.shape_cast %334 : vector<1x32x8xf32> to vector<32x8xf32>
    %cst_215 = arith.constant dense<0.000000e+00> : vector<16x8xf32>
    %336 = tpu.matmul %292, %335, %cst_215 {dimension_numbers = #tpu.dot_dimension_numbers<[1], [0], [0], [1], [0, 0, 1, 1], [], []>} : vector<16x32xf32>, vector<32x8xf32>, vector<16x8xf32> -> vector<16x8xf32>
    %c5_216 = arith.constant 5 : index
    %c0_217 = arith.constant 0 : index
    %c0_218 = arith.constant 0 : index
    %337 = vector.load %arg6[%c5_216, %c0_217, %c0_218] : memref<8x1x8xf32, #tpu.memory_space<vmem>>, vector<1x1x8xf32>
    %338 = vector.shape_cast %337 : vector<1x1x8xf32> to vector<1x8xf32>
    %339 = vector.broadcast %338 : vector<1x8xf32> to vector<16x8xf32>
    %340 = arith.addf %336, %339 : vector<16x8xf32>
    %c5_219 = arith.constant 5 : index
    %c0_220 = arith.constant 0 : index
    %c0_221 = arith.constant 0 : index
    %341 = vector.load %arg7[%c5_219, %c0_220, %c0_221] : memref<8x32x8xf32, #tpu.memory_space<vmem>>, vector<1x32x8xf32>
    %342 = vector.shape_cast %341 : vector<1x32x8xf32> to vector<32x8xf32>
    %cst_222 = arith.constant dense<0.000000e+00> : vector<16x8xf32>
    %343 = tpu.matmul %292, %342, %cst_222 {dimension_numbers = #tpu.dot_dimension_numbers<[1], [0], [0], [1], [0, 0, 1, 1], [], []>} : vector<16x32xf32>, vector<32x8xf32>, vector<16x8xf32> -> vector<16x8xf32>
    %c5_223 = arith.constant 5 : index
    %c0_224 = arith.constant 0 : index
    %c0_225 = arith.constant 0 : index
    %344 = vector.load %arg8[%c5_223, %c0_224, %c0_225] : memref<8x1x8xf32, #tpu.memory_space<vmem>>, vector<1x1x8xf32>
    %345 = vector.shape_cast %344 : vector<1x1x8xf32> to vector<1x8xf32>
    %346 = vector.broadcast %345 : vector<1x8xf32> to vector<16x8xf32>
    %347 = arith.addf %343, %346 : vector<16x8xf32>
    %c5_226 = arith.constant 5 : index
    %c0_227 = arith.constant 0 : index
    %c0_228 = arith.constant 0 : index
    %348 = vector.load %arg9[%c5_226, %c0_227, %c0_228] : memref<8x32x8xf32, #tpu.memory_space<vmem>>, vector<1x32x8xf32>
    %349 = vector.shape_cast %348 : vector<1x32x8xf32> to vector<32x8xf32>
    %cst_229 = arith.constant dense<0.000000e+00> : vector<16x8xf32>
    %350 = tpu.matmul %292, %349, %cst_229 {dimension_numbers = #tpu.dot_dimension_numbers<[1], [0], [0], [1], [0, 0, 1, 1], [], []>} : vector<16x32xf32>, vector<32x8xf32>, vector<16x8xf32> -> vector<16x8xf32>
    %c5_230 = arith.constant 5 : index
    %c0_231 = arith.constant 0 : index
    %c0_232 = arith.constant 0 : index
    %351 = vector.load %arg10[%c5_230, %c0_231, %c0_232] : memref<8x1x8xf32, #tpu.memory_space<vmem>>, vector<1x1x8xf32>
    %352 = vector.shape_cast %351 : vector<1x1x8xf32> to vector<1x8xf32>
    %353 = vector.broadcast %352 : vector<1x8xf32> to vector<16x8xf32>
    %354 = arith.addf %350, %353 : vector<16x8xf32>
    %cst_233 = arith.constant dense<0.000000e+00> : vector<16x16xf32>
    %355 = tpu.matmul %340, %347, %cst_233 {dimension_numbers = #tpu.dot_dimension_numbers<[1], [1], [0], [0], [0, 0, 1, 0], [], []>} : vector<16x8xf32>, vector<16x8xf32>, vector<16x16xf32> -> vector<16x16xf32>
    %cst_234 = arith.constant 0.353553385 : f32
    %356 = vector.broadcast %cst_234 : f32 to vector<16x16xf32>
    %357 = arith.mulf %355, %356 : vector<16x16xf32>
    %358 = arith.addf %357, %0 : vector<16x16xf32>
    %cst_235 = arith.constant dense<0xFF800000> : vector<16xf32>
    %359 = vector.multi_reduction <maximumf>, %358, %cst_235 [1] : vector<16x16xf32> to vector<16xf32>
    %360 = vector.shape_cast %359 : vector<16xf32> to vector<16x1xf32>
    %361 = vector.broadcast %360 : vector<16x1xf32> to vector<16x16xf32>
    %362 = arith.subf %358, %361 : vector<16x16xf32>
    %363 = math.exp %362 : vector<16x16xf32>
    %cst_236 = arith.constant dense<0.000000e+00> : vector<16xf32>
    %364 = vector.multi_reduction <add>, %363, %cst_236 [1] : vector<16x16xf32> to vector<16xf32>
    %365 = vector.shape_cast %364 : vector<16xf32> to vector<16x1xf32>
    %366 = tpu.reciprocal %365 {approx = true} : vector<16x1xf32> -> vector<16x1xf32>
    %367 = vector.broadcast %366 : vector<16x1xf32> to vector<16x16xf32>
    %368 = arith.mulf %363, %367 : vector<16x16xf32>
    %cst_237 = arith.constant dense<0.000000e+00> : vector<16x8xf32>
    %369 = tpu.matmul %368, %354, %cst_237 {dimension_numbers = #tpu.dot_dimension_numbers<[1], [0], [0], [1], [0, 0, 1, 1], [], []>} : vector<16x16xf32>, vector<16x8xf32>, vector<16x8xf32> -> vector<16x8xf32>
    %c5_238 = arith.constant 5 : index
    %c0_239 = arith.constant 0 : index
    %c0_240 = arith.constant 0 : index
    %370 = vector.load %arg11[%c5_238, %c0_239, %c0_240] : memref<8x8x32xf32, #tpu.memory_space<vmem>>, vector<1x8x32xf32>
    %371 = vector.shape_cast %370 : vector<1x8x32xf32> to vector<8x32xf32>
    %cst_241 = arith.constant dense<0.000000e+00> : vector<16x32xf32>
    %372 = tpu.matmul %369, %371, %cst_241 {dimension_numbers = #tpu.dot_dimension_numbers<[1], [0], [0], [1], [0, 0, 1, 1], [], []>} : vector<16x8xf32>, vector<8x32xf32>, vector<16x32xf32> -> vector<16x32xf32>
    %373 = arith.addf %333, %372 : vector<16x32xf32>
    %c6 = arith.constant 6 : index
    %c0_242 = arith.constant 0 : index
    %c0_243 = arith.constant 0 : index
    %374 = vector.load %arg5[%c6, %c0_242, %c0_243] : memref<8x32x8xf32, #tpu.memory_space<vmem>>, vector<1x32x8xf32>
    %375 = vector.shape_cast %374 : vector<1x32x8xf32> to vector<32x8xf32>
    %cst_244 = arith.constant dense<0.000000e+00> : vector<16x8xf32>
    %376 = tpu.matmul %292, %375, %cst_244 {dimension_numbers = #tpu.dot_dimension_numbers<[1], [0], [0], [1], [0, 0, 1, 1], [], []>} : vector<16x32xf32>, vector<32x8xf32>, vector<16x8xf32> -> vector<16x8xf32>
    %c6_245 = arith.constant 6 : index
    %c0_246 = arith.constant 0 : index
    %c0_247 = arith.constant 0 : index
    %377 = vector.load %arg6[%c6_245, %c0_246, %c0_247] : memref<8x1x8xf32, #tpu.memory_space<vmem>>, vector<1x1x8xf32>
    %378 = vector.shape_cast %377 : vector<1x1x8xf32> to vector<1x8xf32>
    %379 = vector.broadcast %378 : vector<1x8xf32> to vector<16x8xf32>
    %380 = arith.addf %376, %379 : vector<16x8xf32>
    %c6_248 = arith.constant 6 : index
    %c0_249 = arith.constant 0 : index
    %c0_250 = arith.constant 0 : index
    %381 = vector.load %arg7[%c6_248, %c0_249, %c0_250] : memref<8x32x8xf32, #tpu.memory_space<vmem>>, vector<1x32x8xf32>
    %382 = vector.shape_cast %381 : vector<1x32x8xf32> to vector<32x8xf32>
    %cst_251 = arith.constant dense<0.000000e+00> : vector<16x8xf32>
    %383 = tpu.matmul %292, %382, %cst_251 {dimension_numbers = #tpu.dot_dimension_numbers<[1], [0], [0], [1], [0, 0, 1, 1], [], []>} : vector<16x32xf32>, vector<32x8xf32>, vector<16x8xf32> -> vector<16x8xf32>
    %c6_252 = arith.constant 6 : index
    %c0_253 = arith.constant 0 : index
    %c0_254 = arith.constant 0 : index
    %384 = vector.load %arg8[%c6_252, %c0_253, %c0_254] : memref<8x1x8xf32, #tpu.memory_space<vmem>>, vector<1x1x8xf32>
    %385 = vector.shape_cast %384 : vector<1x1x8xf32> to vector<1x8xf32>
    %386 = vector.broadcast %385 : vector<1x8xf32> to vector<16x8xf32>
    %387 = arith.addf %383, %386 : vector<16x8xf32>
    %c6_255 = arith.constant 6 : index
    %c0_256 = arith.constant 0 : index
    %c0_257 = arith.constant 0 : index
    %388 = vector.load %arg9[%c6_255, %c0_256, %c0_257] : memref<8x32x8xf32, #tpu.memory_space<vmem>>, vector<1x32x8xf32>
    %389 = vector.shape_cast %388 : vector<1x32x8xf32> to vector<32x8xf32>
    %cst_258 = arith.constant dense<0.000000e+00> : vector<16x8xf32>
    %390 = tpu.matmul %292, %389, %cst_258 {dimension_numbers = #tpu.dot_dimension_numbers<[1], [0], [0], [1], [0, 0, 1, 1], [], []>} : vector<16x32xf32>, vector<32x8xf32>, vector<16x8xf32> -> vector<16x8xf32>
    %c6_259 = arith.constant 6 : index
    %c0_260 = arith.constant 0 : index
    %c0_261 = arith.constant 0 : index
    %391 = vector.load %arg10[%c6_259, %c0_260, %c0_261] : memref<8x1x8xf32, #tpu.memory_space<vmem>>, vector<1x1x8xf32>
    %392 = vector.shape_cast %391 : vector<1x1x8xf32> to vector<1x8xf32>
    %393 = vector.broadcast %392 : vector<1x8xf32> to vector<16x8xf32>
    %394 = arith.addf %390, %393 : vector<16x8xf32>
    %cst_262 = arith.constant dense<0.000000e+00> : vector<16x16xf32>
    %395 = tpu.matmul %380, %387, %cst_262 {dimension_numbers = #tpu.dot_dimension_numbers<[1], [1], [0], [0], [0, 0, 1, 0], [], []>} : vector<16x8xf32>, vector<16x8xf32>, vector<16x16xf32> -> vector<16x16xf32>
    %cst_263 = arith.constant 0.353553385 : f32
    %396 = vector.broadcast %cst_263 : f32 to vector<16x16xf32>
    %397 = arith.mulf %395, %396 : vector<16x16xf32>
    %398 = arith.addf %397, %0 : vector<16x16xf32>
    %cst_264 = arith.constant dense<0xFF800000> : vector<16xf32>
    %399 = vector.multi_reduction <maximumf>, %398, %cst_264 [1] : vector<16x16xf32> to vector<16xf32>
    %400 = vector.shape_cast %399 : vector<16xf32> to vector<16x1xf32>
    %401 = vector.broadcast %400 : vector<16x1xf32> to vector<16x16xf32>
    %402 = arith.subf %398, %401 : vector<16x16xf32>
    %403 = math.exp %402 : vector<16x16xf32>
    %cst_265 = arith.constant dense<0.000000e+00> : vector<16xf32>
    %404 = vector.multi_reduction <add>, %403, %cst_265 [1] : vector<16x16xf32> to vector<16xf32>
    %405 = vector.shape_cast %404 : vector<16xf32> to vector<16x1xf32>
    %406 = tpu.reciprocal %405 {approx = true} : vector<16x1xf32> -> vector<16x1xf32>
    %407 = vector.broadcast %406 : vector<16x1xf32> to vector<16x16xf32>
    %408 = arith.mulf %403, %407 : vector<16x16xf32>
    %cst_266 = arith.constant dense<0.000000e+00> : vector<16x8xf32>
    %409 = tpu.matmul %408, %394, %cst_266 {dimension_numbers = #tpu.dot_dimension_numbers<[1], [0], [0], [1], [0, 0, 1, 1], [], []>} : vector<16x16xf32>, vector<16x8xf32>, vector<16x8xf32> -> vector<16x8xf32>
    %c6_267 = arith.constant 6 : index
    %c0_268 = arith.constant 0 : index
    %c0_269 = arith.constant 0 : index
    %410 = vector.load %arg11[%c6_267, %c0_268, %c0_269] : memref<8x8x32xf32, #tpu.memory_space<vmem>>, vector<1x8x32xf32>
    %411 = vector.shape_cast %410 : vector<1x8x32xf32> to vector<8x32xf32>
    %cst_270 = arith.constant dense<0.000000e+00> : vector<16x32xf32>
    %412 = tpu.matmul %409, %411, %cst_270 {dimension_numbers = #tpu.dot_dimension_numbers<[1], [0], [0], [1], [0, 0, 1, 1], [], []>} : vector<16x8xf32>, vector<8x32xf32>, vector<16x32xf32> -> vector<16x32xf32>
    %413 = arith.addf %373, %412 : vector<16x32xf32>
    %c7 = arith.constant 7 : index
    %c0_271 = arith.constant 0 : index
    %c0_272 = arith.constant 0 : index
    %414 = vector.load %arg5[%c7, %c0_271, %c0_272] : memref<8x32x8xf32, #tpu.memory_space<vmem>>, vector<1x32x8xf32>
    %415 = vector.shape_cast %414 : vector<1x32x8xf32> to vector<32x8xf32>
    %cst_273 = arith.constant dense<0.000000e+00> : vector<16x8xf32>
    %416 = tpu.matmul %292, %415, %cst_273 {dimension_numbers = #tpu.dot_dimension_numbers<[1], [0], [0], [1], [0, 0, 1, 1], [], []>} : vector<16x32xf32>, vector<32x8xf32>, vector<16x8xf32> -> vector<16x8xf32>
    %c7_274 = arith.constant 7 : index
    %c0_275 = arith.constant 0 : index
    %c0_276 = arith.constant 0 : index
    %417 = vector.load %arg6[%c7_274, %c0_275, %c0_276] : memref<8x1x8xf32, #tpu.memory_space<vmem>>, vector<1x1x8xf32>
    %418 = vector.shape_cast %417 : vector<1x1x8xf32> to vector<1x8xf32>
    %419 = vector.broadcast %418 : vector<1x8xf32> to vector<16x8xf32>
    %420 = arith.addf %416, %419 : vector<16x8xf32>
    %c7_277 = arith.constant 7 : index
    %c0_278 = arith.constant 0 : index
    %c0_279 = arith.constant 0 : index
    %421 = vector.load %arg7[%c7_277, %c0_278, %c0_279] : memref<8x32x8xf32, #tpu.memory_space<vmem>>, vector<1x32x8xf32>
    %422 = vector.shape_cast %421 : vector<1x32x8xf32> to vector<32x8xf32>
    %cst_280 = arith.constant dense<0.000000e+00> : vector<16x8xf32>
    %423 = tpu.matmul %292, %422, %cst_280 {dimension_numbers = #tpu.dot_dimension_numbers<[1], [0], [0], [1], [0, 0, 1, 1], [], []>} : vector<16x32xf32>, vector<32x8xf32>, vector<16x8xf32> -> vector<16x8xf32>
    %c7_281 = arith.constant 7 : index
    %c0_282 = arith.constant 0 : index
    %c0_283 = arith.constant 0 : index
    %424 = vector.load %arg8[%c7_281, %c0_282, %c0_283] : memref<8x1x8xf32, #tpu.memory_space<vmem>>, vector<1x1x8xf32>
    %425 = vector.shape_cast %424 : vector<1x1x8xf32> to vector<1x8xf32>
    %426 = vector.broadcast %425 : vector<1x8xf32> to vector<16x8xf32>
    %427 = arith.addf %423, %426 : vector<16x8xf32>
    %c7_284 = arith.constant 7 : index
    %c0_285 = arith.constant 0 : index
    %c0_286 = arith.constant 0 : index
    %428 = vector.load %arg9[%c7_284, %c0_285, %c0_286] : memref<8x32x8xf32, #tpu.memory_space<vmem>>, vector<1x32x8xf32>
    %429 = vector.shape_cast %428 : vector<1x32x8xf32> to vector<32x8xf32>
    %cst_287 = arith.constant dense<0.000000e+00> : vector<16x8xf32>
    %430 = tpu.matmul %292, %429, %cst_287 {dimension_numbers = #tpu.dot_dimension_numbers<[1], [0], [0], [1], [0, 0, 1, 1], [], []>} : vector<16x32xf32>, vector<32x8xf32>, vector<16x8xf32> -> vector<16x8xf32>
    %c7_288 = arith.constant 7 : index
    %c0_289 = arith.constant 0 : index
    %c0_290 = arith.constant 0 : index
    %431 = vector.load %arg10[%c7_288, %c0_289, %c0_290] : memref<8x1x8xf32, #tpu.memory_space<vmem>>, vector<1x1x8xf32>
    %432 = vector.shape_cast %431 : vector<1x1x8xf32> to vector<1x8xf32>
    %433 = vector.broadcast %432 : vector<1x8xf32> to vector<16x8xf32>
    %434 = arith.addf %430, %433 : vector<16x8xf32>
    %cst_291 = arith.constant dense<0.000000e+00> : vector<16x16xf32>
    %435 = tpu.matmul %420, %427, %cst_291 {dimension_numbers = #tpu.dot_dimension_numbers<[1], [1], [0], [0], [0, 0, 1, 0], [], []>} : vector<16x8xf32>, vector<16x8xf32>, vector<16x16xf32> -> vector<16x16xf32>
    %cst_292 = arith.constant 0.353553385 : f32
    %436 = vector.broadcast %cst_292 : f32 to vector<16x16xf32>
    %437 = arith.mulf %435, %436 : vector<16x16xf32>
    %438 = arith.addf %437, %0 : vector<16x16xf32>
    %cst_293 = arith.constant dense<0xFF800000> : vector<16xf32>
    %439 = vector.multi_reduction <maximumf>, %438, %cst_293 [1] : vector<16x16xf32> to vector<16xf32>
    %440 = vector.shape_cast %439 : vector<16xf32> to vector<16x1xf32>
    %441 = vector.broadcast %440 : vector<16x1xf32> to vector<16x16xf32>
    %442 = arith.subf %438, %441 : vector<16x16xf32>
    %443 = math.exp %442 : vector<16x16xf32>
    %cst_294 = arith.constant dense<0.000000e+00> : vector<16xf32>
    %444 = vector.multi_reduction <add>, %443, %cst_294 [1] : vector<16x16xf32> to vector<16xf32>
    %445 = vector.shape_cast %444 : vector<16xf32> to vector<16x1xf32>
    %446 = tpu.reciprocal %445 {approx = true} : vector<16x1xf32> -> vector<16x1xf32>
    %447 = vector.broadcast %446 : vector<16x1xf32> to vector<16x16xf32>
    %448 = arith.mulf %443, %447 : vector<16x16xf32>
    %cst_295 = arith.constant dense<0.000000e+00> : vector<16x8xf32>
    %449 = tpu.matmul %448, %434, %cst_295 {dimension_numbers = #tpu.dot_dimension_numbers<[1], [0], [0], [1], [0, 0, 1, 1], [], []>} : vector<16x16xf32>, vector<16x8xf32>, vector<16x8xf32> -> vector<16x8xf32>
    %c7_296 = arith.constant 7 : index
    %c0_297 = arith.constant 0 : index
    %c0_298 = arith.constant 0 : index
    %450 = vector.load %arg11[%c7_296, %c0_297, %c0_298] : memref<8x8x32xf32, #tpu.memory_space<vmem>>, vector<1x8x32xf32>
    %451 = vector.shape_cast %450 : vector<1x8x32xf32> to vector<8x32xf32>
    %cst_299 = arith.constant dense<0.000000e+00> : vector<16x32xf32>
    %452 = tpu.matmul %449, %451, %cst_299 {dimension_numbers = #tpu.dot_dimension_numbers<[1], [0], [0], [1], [0, 0, 1, 1], [], []>} : vector<16x8xf32>, vector<8x32xf32>, vector<16x32xf32> -> vector<16x32xf32>
    %453 = arith.addf %413, %452 : vector<16x32xf32>
    %c1_300 = arith.constant 1 : index
    %c0_301 = arith.constant 0 : index
    %c0_302 = arith.constant 0 : index
    %454 = vector.load %arg12[%c1_300, %c0_301, %c0_302] : memref<2x1x32xf32, #tpu.memory_space<vmem>>, vector<1x1x32xf32>
    %455 = vector.shape_cast %454 : vector<1x1x32xf32> to vector<1x32xf32>
    %456 = vector.broadcast %455 : vector<1x32xf32> to vector<16x32xf32>
    %457 = arith.addf %453, %456 : vector<16x32xf32>
    %458 = arith.addf %457, %292 : vector<16x32xf32>
    %c1_303 = arith.constant 1 : index
    %c0_304 = arith.constant 0 : index
    %c0_305 = arith.constant 0 : index
    %459 = vector.load %arg13[%c1_303, %c0_304, %c0_305] : memref<2x1x32xf32, #tpu.memory_space<vmem>>, vector<1x1x32xf32>
    %460 = vector.shape_cast %459 : vector<1x1x32xf32> to vector<1x32xf32>
    %c1_306 = arith.constant 1 : index
    %c0_307 = arith.constant 0 : index
    %c0_308 = arith.constant 0 : index
    %461 = vector.load %arg14[%c1_306, %c0_307, %c0_308] : memref<2x1x32xf32, #tpu.memory_space<vmem>>, vector<1x1x32xf32>
    %462 = vector.shape_cast %461 : vector<1x1x32xf32> to vector<1x32xf32>
    %cst_309 = arith.constant dense<0.000000e+00> : vector<16xf32>
    %463 = vector.multi_reduction <add>, %458, %cst_309 [1] : vector<16x32xf32> to vector<16xf32>
    %464 = vector.shape_cast %463 : vector<16xf32> to vector<16x1xf32>
    %cst_310 = arith.constant 3.200000e+01 : f32
    %465 = vector.broadcast %cst_310 : f32 to vector<16x1xf32>
    %466 = arith.divf %464, %465 : vector<16x1xf32>
    %467 = vector.broadcast %466 : vector<16x1xf32> to vector<16x32xf32>
    %468 = arith.subf %458, %467 : vector<16x32xf32>
    %469 = arith.mulf %468, %468 : vector<16x32xf32>
    %cst_311 = arith.constant dense<0.000000e+00> : vector<16xf32>
    %470 = vector.multi_reduction <add>, %469, %cst_311 [1] : vector<16x32xf32> to vector<16xf32>
    %471 = vector.shape_cast %470 : vector<16xf32> to vector<16x1xf32>
    %cst_312 = arith.constant 3.200000e+01 : f32
    %472 = vector.broadcast %cst_312 : f32 to vector<16x1xf32>
    %473 = arith.divf %471, %472 : vector<16x1xf32>
    %cst_313 = arith.constant 9.99999996E-13 : f32
    %474 = vector.broadcast %cst_313 : f32 to vector<16x1xf32>
    %475 = arith.addf %473, %474 : vector<16x1xf32>
    %476 = math.rsqrt %475 : vector<16x1xf32>
    %477 = vector.broadcast %476 : vector<16x1xf32> to vector<16x32xf32>
    %478 = arith.mulf %468, %477 : vector<16x32xf32>
    %479 = vector.broadcast %460 : vector<1x32xf32> to vector<16x32xf32>
    %480 = arith.mulf %478, %479 : vector<16x32xf32>
    %481 = vector.broadcast %462 : vector<1x32xf32> to vector<16x32xf32>
    %482 = arith.addf %480, %481 : vector<16x32xf32>
    %c1_314 = arith.constant 1 : index
    %c0_315 = arith.constant 0 : index
    %c0_316 = arith.constant 0 : index
    %483 = vector.load %arg15[%c1_314, %c0_315, %c0_316] : memref<2x32x64xf32, #tpu.memory_space<vmem>>, vector<1x32x64xf32>
    %484 = vector.shape_cast %483 : vector<1x32x64xf32> to vector<32x64xf32>
    %cst_317 = arith.constant dense<0.000000e+00> : vector<16x64xf32>
    %485 = tpu.matmul %482, %484, %cst_317 {dimension_numbers = #tpu.dot_dimension_numbers<[1], [0], [0], [1], [0, 0, 1, 1], [], []>} : vector<16x32xf32>, vector<32x64xf32>, vector<16x64xf32> -> vector<16x64xf32>
    %c1_318 = arith.constant 1 : index
    %c0_319 = arith.constant 0 : index
    %c0_320 = arith.constant 0 : index
    %486 = vector.load %arg16[%c1_318, %c0_319, %c0_320] : memref<2x1x64xf32, #tpu.memory_space<vmem>>, vector<1x1x64xf32>
    %487 = vector.shape_cast %486 : vector<1x1x64xf32> to vector<1x64xf32>
    %488 = vector.broadcast %487 : vector<1x64xf32> to vector<16x64xf32>
    %489 = arith.addf %485, %488 : vector<16x64xf32>
    %cst_321 = arith.constant 0.707106769 : f32
    %490 = vector.broadcast %cst_321 : f32 to vector<16x64xf32>
    %491 = arith.mulf %489, %490 : vector<16x64xf32>
    %492 = math.absf %491 : vector<16x64xf32>
    %cst_322 = arith.constant 0.327591091 : f32
    %493 = vector.broadcast %cst_322 : f32 to vector<16x64xf32>
    %494 = arith.mulf %493, %492 : vector<16x64xf32>
    %cst_323 = arith.constant 1.000000e+00 : f32
    %495 = vector.broadcast %cst_323 : f32 to vector<16x64xf32>
    %496 = arith.addf %495, %494 : vector<16x64xf32>
    %cst_324 = arith.constant 1.000000e+00 : f32
    %497 = vector.broadcast %cst_324 : f32 to vector<16x64xf32>
    %498 = arith.divf %497, %496 : vector<16x64xf32>
    %cst_325 = arith.constant 1.06140542 : f32
    %499 = vector.broadcast %cst_325 : f32 to vector<16x64xf32>
    %500 = arith.mulf %498, %499 : vector<16x64xf32>
    %cst_326 = arith.constant -1.45315206 : f32
    %501 = vector.broadcast %cst_326 : f32 to vector<16x64xf32>
    %502 = arith.addf %501, %500 : vector<16x64xf32>
    %503 = arith.mulf %498, %502 : vector<16x64xf32>
    %cst_327 = arith.constant 1.42141378 : f32
    %504 = vector.broadcast %cst_327 : f32 to vector<16x64xf32>
    %505 = arith.addf %504, %503 : vector<16x64xf32>
    %506 = arith.mulf %498, %505 : vector<16x64xf32>
    %cst_328 = arith.constant -0.284496725 : f32
    %507 = vector.broadcast %cst_328 : f32 to vector<16x64xf32>
    %508 = arith.addf %507, %506 : vector<16x64xf32>
    %509 = arith.mulf %498, %508 : vector<16x64xf32>
    %cst_329 = arith.constant 0.254829586 : f32
    %510 = vector.broadcast %cst_329 : f32 to vector<16x64xf32>
    %511 = arith.addf %510, %509 : vector<16x64xf32>
    %512 = arith.mulf %498, %511 : vector<16x64xf32>
    %cst_330 = arith.constant 0.000000e+00 : f32
    %513 = vector.broadcast %cst_330 : f32 to vector<16x64xf32>
    %514 = arith.subf %513, %492 : vector<16x64xf32>
    %515 = arith.mulf %514, %492 : vector<16x64xf32>
    %516 = math.exp %515 : vector<16x64xf32>
    %517 = arith.mulf %512, %516 : vector<16x64xf32>
    %cst_331 = arith.constant 1.000000e+00 : f32
    %518 = vector.broadcast %cst_331 : f32 to vector<16x64xf32>
    %519 = arith.subf %518, %517 : vector<16x64xf32>
    %cst_332 = arith.constant 0.000000e+00 : f32
    %520 = vector.broadcast %cst_332 : f32 to vector<16x64xf32>
    %521 = arith.cmpf oge, %491, %520 : vector<16x64xf32>
    %cst_333 = arith.constant 0.000000e+00 : f32
    %522 = vector.broadcast %cst_333 : f32 to vector<16x64xf32>
    %523 = arith.subf %522, %519 : vector<16x64xf32>
    %524 = arith.select %521, %519, %523 : vector<16x64xi1>, vector<16x64xf32>
    %cst_334 = arith.constant 5.000000e-01 : f32
    %525 = vector.broadcast %cst_334 : f32 to vector<16x64xf32>
    %526 = arith.mulf %525, %489 : vector<16x64xf32>
    %cst_335 = arith.constant 1.000000e+00 : f32
    %527 = vector.broadcast %cst_335 : f32 to vector<16x64xf32>
    %528 = arith.addf %527, %524 : vector<16x64xf32>
    %529 = arith.mulf %526, %528 : vector<16x64xf32>
    %c1_336 = arith.constant 1 : index
    %c0_337 = arith.constant 0 : index
    %c0_338 = arith.constant 0 : index
    %530 = vector.load %arg17[%c1_336, %c0_337, %c0_338] : memref<2x64x32xf32, #tpu.memory_space<vmem>>, vector<1x64x32xf32>
    %531 = vector.shape_cast %530 : vector<1x64x32xf32> to vector<64x32xf32>
    %cst_339 = arith.constant dense<0.000000e+00> : vector<16x32xf32>
    %532 = tpu.matmul %529, %531, %cst_339 {dimension_numbers = #tpu.dot_dimension_numbers<[1], [0], [0], [1], [0, 0, 1, 1], [], []>} : vector<16x64xf32>, vector<64x32xf32>, vector<16x32xf32> -> vector<16x32xf32>
    %c1_340 = arith.constant 1 : index
    %c0_341 = arith.constant 0 : index
    %c0_342 = arith.constant 0 : index
    %533 = vector.load %arg18[%c1_340, %c0_341, %c0_342] : memref<2x1x32xf32, #tpu.memory_space<vmem>>, vector<1x1x32xf32>
    %534 = vector.shape_cast %533 : vector<1x1x32xf32> to vector<1x32xf32>
    %535 = vector.broadcast %534 : vector<1x32xf32> to vector<16x32xf32>
    %536 = arith.addf %532, %535 : vector<16x32xf32>
    %537 = arith.addf %536, %482 : vector<16x32xf32>
    %c1_343 = arith.constant 1 : index
    %c0_344 = arith.constant 0 : index
    %c0_345 = arith.constant 0 : index
    %538 = vector.load %arg19[%c1_343, %c0_344, %c0_345] : memref<2x1x32xf32, #tpu.memory_space<vmem>>, vector<1x1x32xf32>
    %539 = vector.shape_cast %538 : vector<1x1x32xf32> to vector<1x32xf32>
    %c1_346 = arith.constant 1 : index
    %c0_347 = arith.constant 0 : index
    %c0_348 = arith.constant 0 : index
    %540 = vector.load %arg20[%c1_346, %c0_347, %c0_348] : memref<2x1x32xf32, #tpu.memory_space<vmem>>, vector<1x1x32xf32>
    %541 = vector.shape_cast %540 : vector<1x1x32xf32> to vector<1x32xf32>
    %cst_349 = arith.constant dense<0.000000e+00> : vector<16xf32>
    %542 = vector.multi_reduction <add>, %537, %cst_349 [1] : vector<16x32xf32> to vector<16xf32>
    %543 = vector.shape_cast %542 : vector<16xf32> to vector<16x1xf32>
    %cst_350 = arith.constant 3.200000e+01 : f32
    %544 = vector.broadcast %cst_350 : f32 to vector<16x1xf32>
    %545 = arith.divf %543, %544 : vector<16x1xf32>
    %546 = vector.broadcast %545 : vector<16x1xf32> to vector<16x32xf32>
    %547 = arith.subf %537, %546 : vector<16x32xf32>
    %548 = arith.mulf %547, %547 : vector<16x32xf32>
    %cst_351 = arith.constant dense<0.000000e+00> : vector<16xf32>
    %549 = vector.multi_reduction <add>, %548, %cst_351 [1] : vector<16x32xf32> to vector<16xf32>
    %550 = vector.shape_cast %549 : vector<16xf32> to vector<16x1xf32>
    %cst_352 = arith.constant 3.200000e+01 : f32
    %551 = vector.broadcast %cst_352 : f32 to vector<16x1xf32>
    %552 = arith.divf %550, %551 : vector<16x1xf32>
    %cst_353 = arith.constant 9.99999996E-13 : f32
    %553 = vector.broadcast %cst_353 : f32 to vector<16x1xf32>
    %554 = arith.addf %552, %553 : vector<16x1xf32>
    %555 = math.rsqrt %554 : vector<16x1xf32>
    %556 = vector.broadcast %555 : vector<16x1xf32> to vector<16x32xf32>
    %557 = arith.mulf %547, %556 : vector<16x32xf32>
    %558 = vector.broadcast %539 : vector<1x32xf32> to vector<16x32xf32>
    %559 = arith.mulf %557, %558 : vector<16x32xf32>
    %560 = vector.broadcast %541 : vector<1x32xf32> to vector<16x32xf32>
    %561 = arith.addf %559, %560 : vector<16x32xf32>
    %c0_354 = arith.constant 0 : index
    %c0_355 = arith.constant 0 : index
    %562 = vector.load %arg21[%c0_354, %c0_355] : memref<2x16xf32, #tpu.memory_space<vmem>>, vector<2x16xf32>
    %cst_356 = arith.constant dense<0.000000e+00> : vector<2x32xf32>
    %563 = tpu.matmul %562, %561, %cst_356 {dimension_numbers = #tpu.dot_dimension_numbers<[1], [0], [0], [1], [0, 0, 1, 1], [], []>} : vector<2x16xf32>, vector<16x32xf32>, vector<2x32xf32> -> vector<2x32xf32>
    %c0_357 = arith.constant 0 : index
    %c0_358 = arith.constant 0 : index
    %564 = vector.load %arg22[%c0_357, %c0_358] : memref<32x32xf32, #tpu.memory_space<vmem>>, vector<32x32xf32>
    %cst_359 = arith.constant dense<0.000000e+00> : vector<2x32xf32>
    %565 = tpu.matmul %563, %564, %cst_359 {dimension_numbers = #tpu.dot_dimension_numbers<[1], [0], [0], [1], [0, 0, 1, 1], [], []>} : vector<2x32xf32>, vector<32x32xf32>, vector<2x32xf32> -> vector<2x32xf32>
    %c0_360 = arith.constant 0 : index
    %c0_361 = arith.constant 0 : index
    %566 = vector.load %arg23[%c0_360, %c0_361] : memref<1x32xf32, #tpu.memory_space<vmem>>, vector<1x32xf32>
    %567 = vector.broadcast %566 : vector<1x32xf32> to vector<2x32xf32>
    %568 = arith.addf %565, %567 : vector<2x32xf32>
    %569 = math.tanh %568 : vector<2x32xf32>
    %c0_362 = arith.constant 0 : index
    %c0_363 = arith.constant 0 : index
    %570 = vector.load %arg24[%c0_362, %c0_363] : memref<32x3xf32, #tpu.memory_space<vmem>>, vector<32x3xf32>
    %cst_364 = arith.constant dense<0.000000e+00> : vector<2x3xf32>
    %571 = tpu.matmul %569, %570, %cst_364 {dimension_numbers = #tpu.dot_dimension_numbers<[1], [0], [0], [1], [0, 0, 1, 1], [], []>} : vector<2x32xf32>, vector<32x3xf32>, vector<2x3xf32> -> vector<2x3xf32>
    %c0_365 = arith.constant 0 : index
    %c0_366 = arith.constant 0 : index
    %572 = vector.load %arg25[%c0_365, %c0_366] : memref<1x3xf32, #tpu.memory_space<vmem>>, vector<1x3xf32>
    %573 = vector.broadcast %572 : vector<1x3xf32> to vector<2x3xf32>
    %574 = arith.addf %571, %573 : vector<2x3xf32>
    %c0_367 = arith.constant 0 : index
    %c0_368 = arith.constant 0 : index
    %575 = vector.load %arg26[%c0_367, %c0_368] : memref<2x3xf32, #tpu.memory_space<vmem>>, vector<2x3xf32>
    tpu.vector_store %arg26[%c0_367, %c0_368], %574 {strides = array<i32>} : memref<2x3xf32, #tpu.memory_space<vmem>>, vector<2x3xf32>,
    return
  }
  func.func @transform_0(%arg0: i32) -> (i32, i32) {
    %c0_i32 = arith.constant 0 : i32
    %c0_i32_0 = arith.constant 0 : i32
    %c0_i32_1 = arith.constant 0 : i32
    return %c0_i32, %c0_i32_0 : i32, i32
  }
  func.func @transform_1(%arg0: i32) -> (i32, i32) {
    %c0_i32 = arith.constant 0 : i32
    %c0_i32_0 = arith.constant 0 : i32
    %c0_i32_1 = arith.constant 0 : i32
    return %c0_i32, %c0_i32_0 : i32, i32
  }
  func.func @transform_2(%arg0: i32) -> (i32, i32) {
    %c0_i32 = arith.constant 0 : i32
    %c0_i32_0 = arith.constant 0 : i32
    %c0_i32_1 = arith.constant 0 : i32
    return %c0_i32, %c0_i32_0 : i32, i32
  }
  func.func @transform_3(%arg0: i32) -> (i32, i32) {
    %c0_i32 = arith.constant 0 : i32
    %c0_i32_0 = arith.constant 0 : i32
    %c0_i32_1 = arith.constant 0 : i32
    return %c0_i32, %c0_i32_0 : i32, i32
  }
  func.func @transform_4(%arg0: i32) -> (i32, i32, i32) {
    %c0_i32 = arith.constant 0 : i32
    %c0_i32_0 = arith.constant 0 : i32
    %c0_i32_1 = arith.constant 0 : i32
    %c0_i32_2 = arith.constant 0 : i32
    return %c0_i32, %c0_i32_0, %c0_i32_1 : i32, i32, i32
  }
  func.func @transform_5(%arg0: i32) -> (i32, i32, i32) {
    %c0_i32 = arith.constant 0 : i32
    %c0_i32_0 = arith.constant 0 : i32
    %c0_i32_1 = arith.constant 0 : i32
    %c0_i32_2 = arith.constant 0 : i32
    return %c0_i32, %c0_i32_0, %c0_i32_1 : i32, i32, i32
  }
  func.func @transform_6(%arg0: i32) -> (i32, i32, i32) {
    %c0_i32 = arith.constant 0 : i32
    %c0_i32_0 = arith.constant 0 : i32
    %c0_i32_1 = arith.constant 0 : i32
    %c0_i32_2 = arith.constant 0 : i32
    return %c0_i32, %c0_i32_0, %c0_i32_1 : i32, i32, i32
  }
  func.func @transform_7(%arg0: i32) -> (i32, i32, i32) {
    %c0_i32 = arith.constant 0 : i32
    %c0_i32_0 = arith.constant 0 : i32
    %c0_i32_1 = arith.constant 0 : i32
    %c0_i32_2 = arith.constant 0 : i32
    return %c0_i32, %c0_i32_0, %c0_i32_1 : i32, i32, i32
  }
  func.func @transform_8(%arg0: i32) -> (i32, i32, i32) {
    %c0_i32 = arith.constant 0 : i32
    %c0_i32_0 = arith.constant 0 : i32
    %c0_i32_1 = arith.constant 0 : i32
    %c0_i32_2 = arith.constant 0 : i32
    return %c0_i32, %c0_i32_0, %c0_i32_1 : i32, i32, i32
  }
  func.func @transform_9(%arg0: i32) -> (i32, i32, i32) {
    %c0_i32 = arith.constant 0 : i32
    %c0_i32_0 = arith.constant 0 : i32
    %c0_i32_1 = arith.constant 0 : i32
    %c0_i32_2 = arith.constant 0 : i32
    return %c0_i32, %c0_i32_0, %c0_i32_1 : i32, i32, i32
  }
  func.func @transform_10(%arg0: i32) -> (i32, i32, i32) {
    %c0_i32 = arith.constant 0 : i32
    %c0_i32_0 = arith.constant 0 : i32
    %c0_i32_1 = arith.constant 0 : i32
    %c0_i32_2 = arith.constant 0 : i32
    return %c0_i32, %c0_i32_0, %c0_i32_1 : i32, i32, i32
  }
  func.func @transform_11(%arg0: i32) -> (i32, i32, i32) {
    %c0_i32 = arith.constant 0 : i32
    %c0_i32_0 = arith.constant 0 : i32
    %c0_i32_1 = arith.constant 0 : i32
    %c0_i32_2 = arith.constant 0 : i32
    return %c0_i32, %c0_i32_0, %c0_i32_1 : i32, i32, i32
  }
  func.func @transform_12(%arg0: i32) -> (i32, i32, i32) {
    %c0_i32 = arith.constant 0 : i32
    %c0_i32_0 = arith.constant 0 : i32
    %c0_i32_1 = arith.constant 0 : i32
    %c0_i32_2 = arith.constant 0 : i32
    return %c0_i32, %c0_i32_0, %c0_i32_1 : i32, i32, i32
  }
  func.func @transform_13(%arg0: i32) -> (i32, i32, i32) {
    %c0_i32 = arith.constant 0 : i32
    %c0_i32_0 = arith.constant 0 : i32
    %c0_i32_1 = arith.constant 0 : i32
    %c0_i32_2 = arith.constant 0 : i32
    return %c0_i32, %c0_i32_0, %c0_i32_1 : i32, i32, i32
  }
  func.func @transform_14(%arg0: i32) -> (i32, i32, i32) {
    %c0_i32 = arith.constant 0 : i32
    %c0_i32_0 = arith.constant 0 : i32
    %c0_i32_1 = arith.constant 0 : i32
    %c0_i32_2 = arith.constant 0 : i32
    return %c0_i32, %c0_i32_0, %c0_i32_1 : i32, i32, i32
  }
  func.func @transform_15(%arg0: i32) -> (i32, i32, i32) {
    %c0_i32 = arith.constant 0 : i32
    %c0_i32_0 = arith.constant 0 : i32
    %c0_i32_1 = arith.constant 0 : i32
    %c0_i32_2 = arith.constant 0 : i32
    return %c0_i32, %c0_i32_0, %c0_i32_1 : i32, i32, i32
  }
  func.func @transform_16(%arg0: i32) -> (i32, i32, i32) {
    %c0_i32 = arith.constant 0 : i32
    %c0_i32_0 = arith.constant 0 : i32
    %c0_i32_1 = arith.constant 0 : i32
    %c0_i32_2 = arith.constant 0 : i32
    return %c0_i32, %c0_i32_0, %c0_i32_1 : i32, i32, i32
  }
  func.func @transform_17(%arg0: i32) -> (i32, i32, i32) {
    %c0_i32 = arith.constant 0 : i32
    %c0_i32_0 = arith.constant 0 : i32
    %c0_i32_1 = arith.constant 0 : i32
    %c0_i32_2 = arith.constant 0 : i32
    return %c0_i32, %c0_i32_0, %c0_i32_1 : i32, i32, i32
  }
  func.func @transform_18(%arg0: i32) -> (i32, i32, i32) {
    %c0_i32 = arith.constant 0 : i32
    %c0_i32_0 = arith.constant 0 : i32
    %c0_i32_1 = arith.constant 0 : i32
    %c0_i32_2 = arith.constant 0 : i32
    return %c0_i32, %c0_i32_0, %c0_i32_1 : i32, i32, i32
  }
  func.func @transform_19(%arg0: i32) -> (i32, i32, i32) {
    %c0_i32 = arith.constant 0 : i32
    %c0_i32_0 = arith.constant 0 : i32
    %c0_i32_1 = arith.constant 0 : i32
    %c0_i32_2 = arith.constant 0 : i32
    return %c0_i32, %c0_i32_0, %c0_i32_1 : i32, i32, i32
  }
  func.func @transform_20(%arg0: i32) -> (i32, i32) {
    %c0_i32 = arith.constant 0 : i32
    %c0_i32_0 = arith.constant 0 : i32
    %c0_i32_1 = arith.constant 0 : i32
    return %c0_i32, %c0_i32_0 : i32, i32
  }
  func.func @transform_21(%arg0: i32) -> (i32, i32) {
    %c0_i32 = arith.constant 0 : i32
    %c0_i32_0 = arith.constant 0 : i32
    %c0_i32_1 = arith.constant 0 : i32
    return %c0_i32, %c0_i32_0 : i32, i32
  }
  func.func @transform_22(%arg0: i32) -> (i32, i32) {
    %c0_i32 = arith.constant 0 : i32
    %c0_i32_0 = arith.constant 0 : i32
    %c0_i32_1 = arith.constant 0 : i32
    return %c0_i32, %c0_i32_0 : i32, i32
  }
  func.func @transform_23(%arg0: i32) -> (i32, i32) {
    %c0_i32 = arith.constant 0 : i32
    %c0_i32_0 = arith.constant 0 : i32
    %c0_i32_1 = arith.constant 0 : i32
    return %c0_i32, %c0_i32_0 : i32, i32
  }
  func.func @transform_24(%arg0: i32) -> (i32, i32) {
    %c0_i32 = arith.constant 0 : i32
    %c0_i32_0 = arith.constant 0 : i32
    %c0_i32_1 = arith.constant 0 : i32
    return %c0_i32, %c0_i32_0 : i32, i32
  }
  func.func @transform_25(%arg0: i32) -> (i32, i32) {
    %c0_i32 = arith.constant 0 : i32
    %c0_i32_0 = arith.constant 0 : i32
    %c0_i32_1 = arith.constant 0 : i32
    return %c0_i32, %c0_i32_0 : i32, i32
  }
}

</mosaic_0001>

<bundles_post_ra>
// kernel: review_classifier_forward.1
= control target key start
LH: loop header
LB: loop body
LE: loop exit
PB: predicated region body
PF: predicated region fallthrough
CT: control target
= control target key end

     0   :  { %s7645_s0 = inlined_call_operand.vmem [shape: f32[16,32], index: 0, kind: input, shape index: {}]   ;;  %s7646_s1 = inlined_call_operand.vmem [shape: f32[16,16], index: 1, kind: input, shape index: {}]   ;;  %s7647_s2 = inlined_call_operand.vmem [shape: f32[1,32], index: 2, kind: input, shape index: {}]   ;;  %s7648_s3 = inlined_call_operand.vmem [shape: f32[1,32], index: 3, kind: input, shape index: {}]   ;;  %s7649_s4 = inlined_call_operand.vmem [shape: f32[8,32,8], index: 4, kind: input, shape index: {}]   ;;  %s7650_s5 = inlined_call_operand.vmem [shape: f32[8,1,8], index: 5, kind: input, shape index: {}]   ;;  %s7651_s6 = inlined_call_operand.vmem [shape: f32[8,32,8], index: 6, kind: input, shape index: {}]   ;;  %s7652_s7 = inlined_call_operand.vmem [shape: f32[8,1,8], index: 7, kind: input, shape index: {}]   ;;  %s7653_s8 = inlined_call_operand.vmem [shape: f32[8,32,8], index: 8, kind: input, shape index: {}]   ;;  %s7654_s9 = inlined_call_operand.vmem [shape: f32[8,1,8], index: 9, kind: input, shape index: {}]   ;;  %s7655_s10 = inlined_call_operand.vmem [shape: f32[8,8,32], index: 10, kind: input, shape index: {}]   ;;  %s7656_s11 = inlined_call_operand.vmem [shape: f32[2,1,32], index: 11, kind: input, shape index: {}]   ;;  %s7657_s12 = inlined_call_operand.vmem [shape: f32[2,1,32], index: 12, kind: input, shape index: {}]   ;;  %s7658_s13 = inlined_call_operand.vmem [shape: f32[2,1,32], index: 13, kind: input, shape index: {}]   ;;  %s7659_s14 = inlined_call_operand.vmem [shape: f32[2,32,64], index: 14, kind: input, shape index: {}]   ;;  %s7660_s15 = inlined_call_operand.vmem [shape: f32[2,1,64], index: 15, kind: input, shape index: {}]   ;;  %s7661_s16 = inlined_call_operand.vmem [shape: f32[2,64,32], index: 16, kind: input, shape index: {}]   ;;  %s7662_s17 = inlined_call_operand.vmem [shape: f32[2,1,32], index: 17, kind: input, shape index: {}]   ;;  %s7663_s18 = inlined_call_operand.vmem [shape: f32[2,1,32], index: 18, kind: input, shape index: {}]   ;;  %s7664_s19 = inlined_call_operand.vmem [shape: f32[2,1,32], index: 19, kind: input, shape index: {}]   ;;  %s7665_s20 = inlined_call_operand.vmem [shape: f32[2,16], index: 20, kind: input, shape index: {}]   ;;  %s7666_s21 = inlined_call_operand.vmem [shape: f32[32,32], index: 21, kind: input, shape index: {}]   ;;  %s7667_s22 = inlined_call_operand.vmem [shape: f32[1,32], index: 22, kind: input, shape index: {}]   ;;  %s7668_s23 = inlined_call_operand.vmem [shape: f32[32,3], index: 23, kind: input, shape index: {}]   ;;  %s7669_s24 = inlined_call_operand.vmem [shape: f32[1,3], index: 24, kind: input, shape index: {}]   ;;  %s7670_s25 = inlined_call_operand.hbm [shape: f32[2,3], index: 25, kind: output, shape index: {}]  }
   0x1   :  { %7679 = sst [smem:[#allocation5_spill]] %s7645_s0 }
   0x2   :  { %7680 = sst [smem:[#allocation6_spill]] %s7646_s1 }
   0x3   :  { %7681 = sst [smem:[#allocation7_spill]] %s7647_s2 }
   0x4   :  { %7682 = sst [smem:[#allocation8_spill]] %s7648_s3 }
   0x5   :  { %7683 = sst [smem:[#allocation9_spill]] %s7649_s4 }
   0x6   :  { %7684 = sst [smem:[#allocation10_spill]] %s7650_s5 }
   0x7   :  { %7685 = sst [smem:[#allocation11_spill]] %s7651_s6 }
   0x8   :  { %7686 = sst [smem:[#allocation12_spill]] %s7652_s7 }
   0x9   :  { %7687 = sst [smem:[#allocation13_spill]] %s7653_s8 }
   0xa   :  { %7688 = sst [smem:[#allocation14_spill]] %s7654_s9 }
   0xb   :  { %s7689_s6 = sld [smem:[#allocation5_spill]]  ;;  %vm87_vm0 = vcmask 261120  }
  0x11   :  { %v83_v0 = vld [vmem:[%s7689_s6] sm:$0xff]  ;;  %v84_v1 = vld [vmem:[%s7689_s6 + $0x8] sm:$0xff] }
  0x12   :  { %30 = vsyncpa [#allocation3], 0  ;;  %v88_v2 = vsel %vm87_vm0, %v83_v0, 0.0  ;;  %v91_v3 = vsel %vm87_vm0, %v84_v1, 0.0  ;;  %s7690_s1 = sld [smem:[#allocation9_spill]]  ;;  %vm395_vm1 = vcmask 64512  }
  0x13   :  { %89 = vadd.xlane.f32.xlu0 %v88_v2  ;;  %s7691_s4 = sld [smem:[#allocation11_spill]]  ;;  %vm487_vm2 = vcmask 130048   ;;  %vm2516_vm5 = vcmask 523264   ;;  %vm6637_vm8 = vmmov 0   ;;  %vm5413_vm9 = vcmask 17408  }
  0x14   :  { %s7692_s9 = sld [smem:[#allocation13_spill]] }
  0x15   :  { %s7693_s29 = sld [smem:[#allocation7_spill]] }
  0x16   :  { %s7694_s30 = sld [smem:[#allocation8_spill]] }
  0x17   :  { %92 = vadd.xlane.f32.xlu0 %v91_v3  ;;  %s7697_s26 = sld [smem:[#allocation14_spill]] }
  0x18   :  { %v134_v14 = vld [vmem:[%s7690_s1 + $0x18] sm:$0xff]  ;;  %v133_v16 = vld [vmem:[%s7690_s1 + $0x10] sm:$0xff]  ;;  %v132_v18 = vld [vmem:[%s7690_s1 + $0x8] sm:$0xff]  ;;  %s7698_s8 = sld [smem:[#allocation6_spill]] }
  0x19   :  { %6002 = vmatprep.subr.mxu0 %v134_v14  ;;  %v226_v15 = vld [vmem:[%s7691_s4 + $0x18] sm:$0xff]  ;;  %v225_v17 = vld [vmem:[%s7691_s4 + $0x10] sm:$0xff]  ;;  %v224_v19 = vld [vmem:[%s7691_s4 + $0x8] sm:$0xff] }
  0x1a   :  { %6003 = vmatpush3.msra.mxu0 %v134_v14  ;;  %6013 = vmatprep.subr.mxu1 %v226_v15  ;;  %v131_v20 = vld [vmem:[%s7690_s1] sm:$0xff]  ;;  %v312_v22 = vld [vmem:[%s7692_s9 + $0x18] sm:$0xff]  ;;  %v311_v39 = vld [vmem:[%s7692_s9 + $0x10] sm:$0xff] }
  0x1b   :  { %6004 = vmatprep.subr.mxu0 %v133_v16  ;;  %6014 = vmatpush3.msra.mxu1 %v226_v15  ;;  %v223_v21 = vld [vmem:[%s7691_s4] sm:$0xff]  ;;  %v310_v40 = vld [vmem:[%s7692_s9 + $0x8] sm:$0xff]  ;;  %v5449_v52 = vld [vmem:[%s7690_s1 + $0x38] sm:$0xff] }
  0x1c   :  { %6005 = vmatpush3.msra.mxu0 %v133_v16  ;;  %6015 = vmatprep.subr.mxu1 %v225_v17  ;;  %v5429_v30 = vld [vmem:[%s7693_s29] ss:$0 sm:$0xff]  ;;  %s7695_s29 = sld [smem:[#allocation12_spill]]  ;;  %v5448_v58 = vld [vmem:[%s7690_s1 + $0x30] sm:$0xff]  ;;  %v5447_v59 = vld [vmem:[%s7690_s1 + $0x28] sm:$0xff] }
  0x1d   :  { %6006 = vmatprep.subr.mxu0 %v132_v18  ;;  %6016 = vmatpush3.msra.mxu1 %v225_v17  ;;  %v5430_v32 = vld [vmem:[%s7694_s30] ss:$0 sm:$0xff]  ;;  %s7696_s30 = sld [smem:[#allocation10_spill]]  ;;  %v5465_v61 = vld [vmem:[%s7692_s9 + $0x38] sm:$0xff]  ;;  %v5464_v62 = vld [vmem:[%s7692_s9 + $0x30] sm:$0xff] }
  0x1e   :  { %6007 = vmatpush3.msra.mxu0 %v132_v18  ;;  %6017 = vmatprep.subr.mxu1 %v224_v19  ;;  %v309_v41 = vld [vmem:[%s7692_s9] sm:$0xff]  ;;  %v5463_v63 = vld [vmem:[%s7692_s9 + $0x28] sm:$0xff] }
  0x1f   :  { %6008 = vmatprep.subr.mxu0 %v131_v20  ;;  %6018 = vmatpush3.msra.mxu1 %v224_v19  ;;  %v5437_v51 = vld [vmem:[%s7697_s26] ss:$0 sm:$0xff]  ;;  %v6887_v2 = vld [vmem:[%s7698_s8 + $0x8] sm:$0xff]  ;;  %v5467_v15 = vld [vmem:[%s7697_s26 + $0x1] ss:$0 sm:$0xff] }
  0x20   :  { %6009 = vmatpush3.msra.mxu0 %v131_v20  ;;  %6019 = vmatprep.subr.mxu1 %v223_v21  ;;  %v5446_v60 = vld [vmem:[%s7690_s1 + $0x20] sm:$0xff] }
  0x21   :  { %6020 = vmatpush3.msra.mxu1 %v223_v21  ;;  %6024 = vmatprep.subr.mxu0 %v312_v22 }
  0x22   :  { %v5434_v42 = vld [vmem:[%s7695_s29] ss:$0 sm:$0xff] }
  0x23   :  { %v5431_v46 = vld [vmem:[%s7696_s30] ss:$0 sm:$0xff] }
  0x9c   :  { %v90_v4 = vpop.xlane.xlu0 %89 }
  0x9d   :  { %v95_v5 = vmul.f32 0.03125, %v90_v4 }
  0x9f   :  { %v97_v6 = vsub.f32 %v83_v0, %v95_v5  ;;  %v5462_v0 = vld [vmem:[%s7692_s9 + $0x20] sm:$0xff] }
  0xa0   :  { %v93_v7 = vpop.xlane.xlu0 %92  ;;  %v6892_v5 = vld [vmem:[%s7698_s8] sm:$0xff] }
  0xa1   :  { %v96_v8 = vmul.f32 0.03125, %v93_v7  ;;  %v99_v9 = vmul.f32 %v97_v6, %v97_v6 }
  0xa3   :  { %v98_v10 = vsub.f32 %v84_v1, %v96_v8  ;;  %v101_v11 = vsel %vm87_vm0, %v99_v9, 0.0 }
  0xa4   :  { %102 = vadd.xlane.f32.xlu1 %v101_v11 }
  0xa5   :  { %v100_v12 = vmul.f32 %v98_v10, %v98_v10 }
  0xa7   :  { %v104_v13 = vsel %vm87_vm0, %v100_v12, 0.0 }
  0xa8   :  { %105 = vadd.xlane.f32.xlu1 %v104_v13 }
 0x12d   :  { %v103_v23 = vpop.xlane.xlu1 %102 }
 0x12e   :  { %v107_v24 = vmul.f32 0.03125, %v103_v23 }
 0x130   :  { %v109_v25 = vadd.f32 1e-12, %v107_v24 }
 0x131   :  { %v106_v26 = vpop.xlane.xlu1 %105 }
 0x132   :  { %6510 = vrsqrt.f32 %v109_v25  ;;  %v108_v27 = vmul.f32 0.03125, %v106_v26 }
 0x134   :  { %v110_v28 = vadd.f32 1e-12, %v108_v27 }
 0x136   :  { %6512 = vrsqrt.f32 %v110_v28 }
 0x13f   :  { %v6511_v29 = vpop.eup %6510 }
 0x140   :  { %v113_v31 = vmul.f32 %v6511_v29, %v97_v6 }
 0x142   :  { %v121_v33 = vmul.f32 %v5429_v30, %v113_v31 }
 0x143   :  { %v6513_v34 = vpop.eup %6512 }
 0x144   :  { %v6812_v35 = vadd.f32 %v5430_v32, %v121_v33  ;;  %v114_v36 = vmul.f32 %v6513_v34, %v98_v10  ;;  %v5451_v10 = vld [vmem:[%s7696_s30 + $0x1] ss:$0 sm:$0xff] }
 0x146   :  { %v122_v37 = vmul.f32 %v5429_v30, %v114_v36  ;;  %6010 = vmatprep.mubr.msk.f32.mxu0 %vm87_vm0, %v6812_v35  ;;  %6021 = vmatprep.mubr.msk.f32.mxu1 %vm87_vm0, %v6812_v35  ;;  %v5457_v30 = vld [vmem:[%s7691_s4 + $0x38] sm:$0xff] }
 0x148   :  { %v6818_v38 = vadd.f32 %v5430_v32, %v122_v37 }
 0x14a   :  { %6011 = vmatmul.mubr.msk.f32.vlgmr.msra.gmra.mxu0 %vm87_vm0, %v6818_v38  ;;  %6022 = vmatmul.mubr.msk.f32.vlgmr.msra.gmra.mxu1 %vm87_vm0, %v6818_v38 }
 0x14b   :  { %6025 = vmatpush3.msra.mxu0 %v312_v22  ;;  %6032 = vmatprep.mubr.msk.f32.mxu0 %vm87_vm0, %v6812_v35 }
 0x14c   :  { %6026 = vmatprep.subr.mxu0 %v311_v39 }
 0x14d   :  { %6027 = vmatpush3.msra.mxu0 %v311_v39  ;;  %v5456_v39 = vld [vmem:[%s7691_s4 + $0x30] sm:$0xff] }
 0x14e   :  { %6028 = vmatprep.subr.mxu0 %v310_v40 }
 0x14f   :  { %6029 = vmatpush3.msra.mxu0 %v310_v40  ;;  %v5455_v40 = vld [vmem:[%s7691_s4 + $0x28] sm:$0xff] }
 0x150   :  { %6030 = vmatprep.subr.mxu0 %v309_v41 }
 0x151   :  { %6031 = vmatpush3.msra.mxu0 %v309_v41  ;;  %v5454_v41 = vld [vmem:[%s7691_s4 + $0x20] sm:$0xff] }
 0x152   :  { %6033 = vmatmul.mubr.msk.f32.vlgmr.msra.gmra.mxu0 %vm87_vm0, %v6818_v38 }
 0x20a   :  { %v6012_v43 = vpop.f32.mrf.mxu0  ;;  %v6023_v44 = vpop.f32.mrf.mxu1 }
 0x20b   :  { %v306_v45 = vadd.f32 %v6023_v44, %v5434_v42  ;;  %v220_v54 = vadd.f32 %v6012_v43, %v5431_v46 }
 0x20c   :  { %v214_v47 = vpop.f32.mrf.mxu0  ;;  %v300_v48 = vpop.f32.mrf.mxu1 }
 0x20d   :  { %v215_v49 = vadd.f32 %v5431_v46, %v214_v47  ;;  %v301_v50 = vadd.f32 %v5434_v42, %v300_v48  ;;  %6035 = vmatprep.subr.msk.mxu1 %vm395_vm1, %v306_v45 }
 0x20e   :  { %6036 = vmatpush3.xpose.msk.msra.mxu1 %vm395_vm1, %v306_v45  ;;  %v5459_v45 = vld [vmem:[%s7695_s29 + $0x1] ss:$0 sm:$0xff] }
 0x20f   :  { %6037 = vmatprep.subr.msk.mxu1 %vm395_vm1, %v301_v50  ;;  %6039 = vmatprep.mubr.msk.f32.mxu1 %vm395_vm1, %v215_v49 }
 0x212   :  { %v6034_v53 = vpop.f32.mrf.mxu0  ;;  %6038 = vmatpush3.xpose.msk.msra.mxu1 %vm395_vm1, %v301_v50 }
 0x213   :  { %v392_v55 = vadd.f32 %v6034_v53, %v5437_v51  ;;  %6049 = vmatprep.subr.mxu1 %v5449_v52 }
 0x214   :  { %v386_v56 = vpop.f32.mrf.mxu0 }
 0x215   :  { %v387_v57 = vadd.f32 %v5437_v51, %v386_v56  ;;  %6042 = vmatprep.subr.mxu0 %v392_v55  ;;  %6040 = vmatmul.mubr.msk.f32.vlgmr.msra.gmra.mxu1 %vm395_vm1, %v220_v54 }
 0x216   :  { %6043 = vmatpush3.msra.mxu0 %v392_v55  ;;  %6050 = vmatpush3.msra.mxu1 %v5449_v52 }
 0x217   :  { %6044 = vmatprep.subr.mxu0 %v387_v57  ;;  %6057 = vmatprep.mubr.msk.f32.mxu1 %vm87_vm0, %v6812_v35 }
 0x218   :  { %6045 = vmatpush3.msra.mxu0 %v387_v57  ;;  %6051 = vmatprep.subr.mxu1 %v5448_v58 }
 0x219   :  { %6052 = vmatpush3.msra.mxu1 %v5448_v58  ;;  %6060 = vmatprep.subr.mxu0 %v5457_v30 }
 0x21a   :  { %6053 = vmatprep.subr.mxu1 %v5447_v59 }
 0x21b   :  { %6054 = vmatpush3.msra.mxu1 %v5447_v59 }
 0x21c   :  { %6055 = vmatprep.subr.mxu1 %v5446_v60 }
 0x21d   :  { %6056 = vmatpush3.msra.mxu1 %v5446_v60 }
 0x21e   :  { %6058 = vmatmul.mubr.msk.f32.vlgmr.msra.gmra.mxu1 %vm87_vm0, %v6818_v38  ;;  %6071 = vmatprep.subr.mxu1 %v5465_v61 }
 0x21f   :  { %6072 = vmatpush3.msra.mxu1 %v5465_v61  ;;  %6079 = vmatprep.mubr.msk.f32.mxu1 %vm87_vm0, %v6812_v35 }
 0x220   :  { %6073 = vmatprep.subr.mxu1 %v5464_v62 }
 0x221   :  { %6074 = vmatpush3.msra.mxu1 %v5464_v62 }
 0x222   :  { %6075 = vmatprep.subr.mxu1 %v5463_v63 }
 0x223   :  { %6076 = vmatpush3.msra.mxu1 %v5463_v63 }
 0x224   :  { %6077 = vmatprep.subr.mxu1 %v5462_v0 }
 0x225   :  { %6078 = vmatpush3.msra.mxu1 %v5462_v0 }
 0x226   :  { %6080 = vmatmul.mubr.msk.f32.vlgmr.msra.gmra.mxu1 %vm87_vm0, %v6818_v38 }
 0x2d5   :  { %v6041_v1 = vpop.f32.mrf.mxu1 }
 0x2d6   :  { %v484_v3 = vmul.f32 0.35355338, %v6041_v1 }
 0x2d7   :  { %v474_v4 = vpop.f32.mrf.mxu1 }
 0x2d8   :  { %v483_v6 = vmul.f32 0.35355338, %v474_v4  ;;  %v486_v7 = vadd.f32 %v484_v3, %v6887_v2 }
 0x2da   :  { %v491_v8 = vsel %vm487_vm2, %v486_v7, -inf  ;;  %v485_v9 = vadd.f32 %v483_v6, %v6892_v5  ;;  %v591_v6 = vld [vmem:[%s7655_s10] sm:$0xff] }
 0x2db   :  { %492 = vmax.xlane.f32.xlu1 %v491_v8 }
 0x2dc   :  { %v488_v11 = vsel %vm487_vm2, %v485_v9, -inf }
 0x2dd   :  { %489 = vmax.xlane.f32.xlu0 %v488_v11 }
 0x2de   :  { %v6059_v12 = vpop.f32.mrf.mxu1 }
 0x2df   :  { %v677_v13 = vadd.f32 %v6059_v12, %v5451_v10 }
 0x2e0   :  { %v671_v14 = vpop.f32.mrf.mxu1 }
 0x2e1   :  { %v672_v42 = vadd.f32 %v5451_v10, %v671_v14  ;;  %v5491_v14 = vld [vmem:[%s7691_s4 + $0x50] sm:$0xff] }
 0x2e6   :  { %v6081_v16 = vpop.f32.mrf.mxu1 }
 0x2e7   :  { %v853_v17 = vadd.f32 %v6081_v16, %v5467_v15  ;;  %v5489_v16 = vld [vmem:[%s7691_s4 + $0x40] sm:$0xff] }
 0x2e8   :  { %v847_v18 = vpop.f32.mrf.mxu1 }
 0x2e9   :  { %v848_v19 = vadd.f32 %v5467_v15, %v847_v18  ;;  %6089 = vmatprep.subr.mxu1 %v853_v17  ;;  %v5490_v15 = vld [vmem:[%s7691_s4 + $0x48] sm:$0xff]  ;;  %v5484_v18 = vld [vmem:[%s7690_s1 + $0x58] sm:$0xff] }
 0x2ea   :  { %6090 = vmatpush3.msra.mxu1 %v853_v17  ;;  %v5476_v17 = vld [vmem:[%s7655_s10 + $0x8] sm:$0xff] }
 0x2eb   :  { %6091 = vmatprep.subr.mxu1 %v848_v19 }
 0x2ec   :  { %6092 = vmatpush3.msra.mxu1 %v848_v19 }
 0x2ed   :  { %6101 = vmatprep.subr.mxu1 %v591_v6 }
 0x364   :  { %v493_v20 = vpop.xlane.xlu1 %492 }
 0x365   :  { %v495_v21 = vsub.f32 %v486_v7, %v493_v20 }
 0x366   :  { %v490_v22 = vpop.xlane.xlu0 %489 }
 0x367   :  { %v498_v23 = vmul.f32 1.442695, %v495_v21  ;;  %v494_v24 = vsub.f32 %v485_v9, %v490_v22  ;;  %v5483_v21 = vld [vmem:[%s7690_s1 + $0x50] sm:$0xff]  ;;  %v5482_v22 = vld [vmem:[%s7690_s1 + $0x48] sm:$0xff] }
 0x369   :  { %6514 = vpow2.f32 %v498_v23  ;;  %v496_v25 = vmul.f32 1.442695, %v494_v24  ;;  %v5481_v24 = vld [vmem:[%s7690_s1 + $0x40] sm:$0xff] }
 0x36b   :  { %6516 = vpow2.f32 %v496_v25  ;;  %v5500_v25 = vld [vmem:[%s7692_s9 + $0x58] sm:$0xff] }
 0x376   :  { %v6515_v26 = vpop.eup %6514 }
 0x377   :  { %v503_v27 = vsel %vm487_vm2, %v6515_v26, 0.0 }
 0x378   :  { %v6517_v28 = vpop.eup %6516  ;;  %504 = vadd.xlane.f32.xlu1 %v503_v27  ;;  %v5494_v27 = vld [vmem:[%s7695_s29 + $0x2] ss:$0 sm:$0xff] }
 0x379   :  { %v500_v29 = vsel %vm487_vm2, %v6517_v28, 0.0 }
 0x37a   :  { %501 = vadd.xlane.f32.xlu0 %v500_v29 }
 0x401   :  { %v505_v31 = vpop.xlane.xlu1 %504 }
 0x402   :  { %6518 = vrcp.f32 %v505_v31  ;;  %v5498_v31 = vld [vmem:[%s7692_s9 + $0x48] sm:$0xff] }
 0x403   :  { %v502_v32 = vpop.xlane.xlu0 %501 }
 0x404   :  { %6520 = vrcp.f32 %v502_v32 }
 0x40f   :  { %v6519_v33 = vpop.eup %6518 }
 0x410   :  { %v509_v37 = vmul.f32 %v6519_v33, %v6515_v26 }
 0x411   :  { %v6521_v34 = vpop.eup %6520 }
 0x412   :  { %v508_v36 = vmul.f32 %v6521_v34, %v6517_v28  ;;  %v5499_v28 = vld [vmem:[%s7692_s9 + $0x50] sm:$0xff]  ;;  %v5497_v34 = vld [vmem:[%s7692_s9 + $0x40] sm:$0xff] }
 0x414   :  { %6046 = vmatprep.mubr.msk.f32.mxu0 %vm487_vm2, %v508_v36 }
 0x415   :  { %6047 = vmatmul.mubr.msk.f32.vlgmr.msra.gmra.mxu0 %vm487_vm2, %v509_v37 }
 0x416   :  { %6061 = vmatpush3.msra.mxu0 %v5457_v30  ;;  %6068 = vmatprep.mubr.msk.f32.mxu0 %vm87_vm0, %v6812_v35 }
 0x417   :  { %6062 = vmatprep.subr.mxu0 %v5456_v39 }
 0x418   :  { %6063 = vmatpush3.msra.mxu0 %v5456_v39 }
 0x419   :  { %6064 = vmatprep.subr.mxu0 %v5455_v40 }
 0x41a   :  { %6065 = vmatpush3.msra.mxu0 %v5455_v40  ;;  %v5486_v40 = vld [vmem:[%s7696_s30 + $0x2] ss:$0 sm:$0xff] }
 0x41b   :  { %6066 = vmatprep.subr.mxu0 %v5454_v41 }
 0x41c   :  { %6067 = vmatpush3.msra.mxu0 %v5454_v41 }
 0x41d   :  { %6069 = vmatmul.mubr.msk.f32.vlgmr.msra.gmra.mxu0 %vm87_vm0, %v6818_v38 }
 0x41e   :  { %6086 = vmatprep.mubr.msk.f32.mxu0 %vm395_vm1, %v672_v42 }
 0x4d5   :  { %v6048_v43 = vpop.f32.mrf.mxu0 }
 0x4d7   :  { %v582_v44 = vpop.f32.mrf.mxu0 }
 0x4dd   :  { %v6070_v46 = vpop.f32.mrf.mxu0 }
 0x4de   :  { %v765_v47 = vadd.f32 %v6070_v46, %v5459_v45 }
 0x4df   :  { %v759_v48 = vpop.f32.mrf.mxu0 }
 0x4e0   :  { %v760_v49 = vadd.f32 %v5459_v45, %v759_v48  ;;  %6082 = vmatprep.subr.msk.mxu0 %vm395_vm1, %v765_v47 }
 0x4e1   :  { %6083 = vmatpush3.xpose.msk.msra.mxu0 %vm395_vm1, %v765_v47 }
 0x4e2   :  { %6084 = vmatprep.subr.msk.mxu0 %vm395_vm1, %v760_v49 }
 0x4e5   :  { %6085 = vmatpush3.xpose.msk.msra.mxu0 %vm395_vm1, %v760_v49 }
 0x4e6   :  { %6096 = vmatprep.subr.mxu0 %v5476_v17 }
 0x4e8   :  { %6087 = vmatmul.mubr.msk.f32.vlgmr.msra.gmra.mxu0 %vm395_vm1, %v677_v13  ;;  %v5492_v13 = vld [vmem:[%s7691_s4 + $0x58] sm:$0xff] }
 0x4e9   :  { %6097 = vmatpush3.msra.mxu0 %v5476_v17  ;;  %v5531_v17 = vld [vmem:[%s7692_s9 + $0x68] sm:$0xff] }
 0x4ea   :  { %6106 = vmatprep.subr.mxu0 %v5484_v18 }
 0x5a8   :  { %v6088_v50 = vpop.f32.mrf.mxu0 }
 0x5a9   :  { %v944_v51 = vmul.f32 0.35355338, %v6088_v50 }
 0x5aa   :  { %v934_v52 = vpop.f32.mrf.mxu0 }
 0x5ab   :  { %v943_v53 = vmul.f32 0.35355338, %v934_v52  ;;  %v946_v54 = vadd.f32 %v944_v51, %v6887_v2 }
 0x5ad   :  { %v950_v55 = vsel %vm487_vm2, %v946_v54, -inf  ;;  %v945_v56 = vadd.f32 %v943_v53, %v6892_v5 }
 0x5ae   :  { %951 = vmax.xlane.f32.xlu1 %v950_v55 }
 0x5af   :  { %v947_v57 = vsel %vm487_vm2, %v945_v56, -inf }
 0x5b0   :  { %948 = vmax.xlane.f32.xlu0 %v947_v57 }
 0x637   :  { %v952_v58 = vpop.xlane.xlu1 %951 }
 0x638   :  { %v954_v59 = vsub.f32 %v946_v54, %v952_v58 }
 0x639   :  { %v949_v60 = vpop.xlane.xlu0 %948 }
 0x63a   :  { %v957_v61 = vmul.f32 1.442695, %v954_v59  ;;  %v953_v62 = vsub.f32 %v945_v56, %v949_v60 }
 0x63c   :  { %6522 = vpow2.f32 %v957_v61  ;;  %v955_v63 = vmul.f32 1.442695, %v953_v62 }
 0x63e   :  { %6524 = vpow2.f32 %v955_v63 }
 0x649   :  { %v6523_v0 = vpop.eup %6522 }
 0x64a   :  { %v962_v1 = vsel %vm487_vm2, %v6523_v0, 0.0 }
 0x64b   :  { %v6525_v3 = vpop.eup %6524  ;;  %963 = vadd.xlane.f32.xlu1 %v962_v1 }
 0x64c   :  { %v959_v4 = vsel %vm487_vm2, %v6525_v3, 0.0 }
 0x64d   :  { %960 = vadd.xlane.f32.xlu0 %v959_v4  ;;  %v5517_v4 = vld [vmem:[%s7690_s1 + $0x78] sm:$0xff] }
 0x6d4   :  { %v964_v7 = vpop.xlane.xlu1 %963 }
 0x6d5   :  { %6526 = vrcp.f32 %v964_v7 }
 0x6d6   :  { %v961_v8 = vpop.xlane.xlu0 %960 }
 0x6d7   :  { %6528 = vrcp.f32 %v961_v8 }
 0x6e2   :  { %v6527_v9 = vpop.eup %6526 }
 0x6e3   :  { %v968_v12 = vmul.f32 %v6527_v9, %v6523_v0 }
 0x6e4   :  { %v6529_v10 = vpop.eup %6528 }
 0x6e5   :  { %v967_v11 = vmul.f32 %v6529_v10, %v6525_v3 }
 0x6e7   :  { %6093 = vmatprep.mubr.msk.f32.mxu1 %vm487_vm2, %v967_v11 }
 0x6e8   :  { %6094 = vmatmul.mubr.msk.f32.vlgmr.msra.gmra.mxu1 %vm487_vm2, %v968_v12  ;;  %v5516_v12 = vld [vmem:[%s7690_s1 + $0x70] sm:$0xff] }
 0x6e9   :  { %6103 = vmatprep.mubr.msk.f32.mxu1 %vm395_vm1, %v582_v44  ;;  %6102 = vmatpush3.msra.mxu1 %v591_v6  ;;  %v5502_v44 = vld [vmem:[%s7697_s26 + $0x2] ss:$0 sm:$0xff] }
 0x6ea   :  { %6117 = vmatprep.subr.mxu1 %v5492_v13 }
 0x6ec   :  { %6104 = vmatmul.mubr.msk.f32.vlgmr.msra.gmra.mxu1 %vm395_vm1, %v6048_v43 }
 0x6ed   :  { %6118 = vmatpush3.msra.mxu1 %v5492_v13  ;;  %6125 = vmatprep.mubr.msk.f32.mxu1 %vm87_vm0, %v6812_v35  ;;  %v5515_v13 = vld [vmem:[%s7690_s1 + $0x68] sm:$0xff] }
 0x6ee   :  { %6119 = vmatprep.subr.mxu1 %v5491_v14 }
 0x6ef   :  { %6120 = vmatpush3.msra.mxu1 %v5491_v14  ;;  %v5514_v14 = vld [vmem:[%s7690_s1 + $0x60] sm:$0xff] }
 0x6f0   :  { %6121 = vmatprep.subr.mxu1 %v5490_v15 }
 0x6f1   :  { %6122 = vmatpush3.msra.mxu1 %v5490_v15  ;;  %v5533_v15 = vld [vmem:[%s7692_s9 + $0x78] sm:$0xff] }
 0x6f2   :  { %6123 = vmatprep.subr.mxu1 %v5489_v16 }
 0x6f3   :  { %6124 = vmatpush3.msra.mxu1 %v5489_v16  ;;  %v5532_v16 = vld [vmem:[%s7692_s9 + $0x70] sm:$0xff] }
 0x6f4   :  { %6126 = vmatmul.mubr.msk.f32.vlgmr.msra.gmra.mxu1 %vm87_vm0, %v6818_v38 }
 0x7a8   :  { %v6095_v19 = vpop.f32.mrf.mxu1 }
 0x7aa   :  { %v1041_v20 = vpop.f32.mrf.mxu1 }
 0x7ab   :  { %6098 = vmatprep.mubr.msk.f32.mxu0 %vm395_vm1, %v1041_v20  ;;  %v5525_v20 = vld [vmem:[%s7691_s4 + $0x78] sm:$0xff] }
 0x7ac   :  { %6099 = vmatmul.mubr.msk.f32.vlgmr.msra.gmra.mxu0 %vm395_vm1, %v6095_v19  ;;  %v6978_v23 = vpop.f32.mrf.mxu1  ;;  %v5511_v19 = vld [vmem:[%s7655_s10 + $0x10] sm:$0xff] }
 0x7ad   :  { %6107 = vmatpush3.msra.mxu0 %v5484_v18  ;;  %6114 = vmatprep.mubr.msk.f32.mxu0 %vm87_vm0, %v6812_v35  ;;  %v5530_v18 = vld [vmem:[%s7692_s9 + $0x60] sm:$0xff] }
 0x7ae   :  { %6108 = vmatprep.subr.mxu0 %v5483_v21  ;;  %v6986_v26 = vpop.f32.mrf.mxu1 }
 0x7af   :  { %6109 = vmatpush3.msra.mxu0 %v5483_v21 }
 0x7b0   :  { %6110 = vmatprep.subr.mxu0 %v5482_v22 }
 0x7b1   :  { %6111 = vmatpush3.msra.mxu0 %v5482_v22 }
 0x7b2   :  { %6112 = vmatprep.subr.mxu0 %v5481_v24 }
 0x7b3   :  { %6113 = vmatpush3.msra.mxu0 %v5481_v24  ;;  %v5524_v24 = vld [vmem:[%s7691_s4 + $0x70] sm:$0xff] }
 0x7b4   :  { %6115 = vmatmul.mubr.msk.f32.vlgmr.msra.gmra.mxu0 %vm87_vm0, %v6818_v38  ;;  %v6127_v29 = vpop.f32.mrf.mxu1  ;;  %6128 = vmatprep.subr.mxu0 %v5500_v25 }
 0x7b5   :  { %v1387_v30 = vadd.f32 %v6127_v29, %v5494_v27  ;;  %6129 = vmatpush3.msra.mxu0 %v5500_v25  ;;  %6136 = vmatprep.mubr.msk.f32.mxu0 %vm87_vm0, %v6812_v35  ;;  %v5523_v25 = vld [vmem:[%s7691_s4 + $0x68] sm:$0xff] }
 0x7b6   :  { %v1381_v32 = vpop.f32.mrf.mxu1  ;;  %6130 = vmatprep.subr.mxu0 %v5499_v28 }
 0x7b7   :  { %v1382_v33 = vadd.f32 %v5494_v27, %v1381_v32  ;;  %6131 = vmatpush3.msra.mxu0 %v5499_v28  ;;  %6139 = vmatprep.subr.msk.mxu1 %vm395_vm1, %v1387_v30  ;;  %v5519_v27 = vld [vmem:[%s7696_s30 + $0x3] ss:$0 sm:$0xff] }
 0x7b8   :  { %6132 = vmatprep.subr.mxu0 %v5498_v31  ;;  %6140 = vmatpush3.xpose.msk.msra.mxu1 %vm395_vm1, %v1387_v30  ;;  %v5522_v28 = vld [vmem:[%s7691_s4 + $0x60] sm:$0xff] }
 0x7b9   :  { %6133 = vmatpush3.msra.mxu0 %v5498_v31  ;;  %6141 = vmatprep.subr.msk.mxu1 %vm395_vm1, %v1382_v33 }
 0x7ba   :  { %6134 = vmatprep.subr.mxu0 %v5497_v34 }
 0x7bb   :  { %6135 = vmatpush3.msra.mxu0 %v5497_v34 }
 0x7bc   :  { %6137 = vmatmul.mubr.msk.f32.vlgmr.msra.gmra.mxu0 %vm87_vm0, %v6818_v38  ;;  %6142 = vmatpush3.xpose.msk.msra.mxu1 %vm395_vm1, %v1382_v33  ;;  %v5535_v33 = vld [vmem:[%s7697_s26 + $0x3] ss:$0 sm:$0xff] }
 0x7bd   :  { %6153 = vmatprep.subr.mxu1 %v5511_v19 }
 0x86c   :  { %v7010_v36 = vpop.f32.mrf.mxu0 }
 0x86e   :  { %v7012_v37 = vpop.f32.mrf.mxu0 }
 0x874   :  { %v6116_v39 = vpop.f32.mrf.mxu0 }
 0x875   :  { %v1299_v43 = vadd.f32 %v6116_v39, %v5486_v40 }
 0x876   :  { %v1293_v41 = vpop.f32.mrf.mxu0 }
 0x877   :  { %v1294_v42 = vadd.f32 %v5486_v40, %v1293_v41 }
 0x879   :  { %6143 = vmatprep.mubr.msk.f32.mxu1 %vm395_vm1, %v1294_v42  ;;  %v1211_v42 = vadd.f32 %v6978_v23, %v7010_v36 }
 0x87a   :  { %6144 = vmatmul.mubr.msk.f32.vlgmr.msra.gmra.mxu1 %vm395_vm1, %v1299_v43 }
 0x87b   :  { %6154 = vmatpush3.msra.mxu1 %v5511_v19 }
 0x87c   :  { %v6138_v45 = vpop.f32.mrf.mxu0  ;;  %6169 = vmatprep.subr.mxu1 %v5525_v20 }
 0x87d   :  { %v1475_v46 = vadd.f32 %v6138_v45, %v5502_v44 }
 0x87e   :  { %v1469_v47 = vpop.f32.mrf.mxu0 }
 0x87f   :  { %v1470_v48 = vadd.f32 %v5502_v44, %v1469_v47  ;;  %6146 = vmatprep.subr.mxu0 %v1475_v46  ;;  %v1206_v44 = vadd.f32 %v6986_v26, %v7012_v37 }
 0x880   :  { %6147 = vmatpush3.msra.mxu0 %v1475_v46 }
 0x881   :  { %6148 = vmatprep.subr.mxu0 %v1470_v48 }
 0x882   :  { %6149 = vmatpush3.msra.mxu0 %v1470_v48  ;;  %v5527_v48 = vld [vmem:[%s7695_s29 + $0x3] ss:$0 sm:$0xff] }
 0x883   :  { %6158 = vmatprep.subr.mxu0 %v5517_v4 }
 0x93a   :  { %v6145_v49 = vpop.f32.mrf.mxu1 }
 0x93b   :  { %v1566_v50 = vmul.f32 0.35355338, %v6145_v49 }
 0x93c   :  { %v1556_v51 = vpop.f32.mrf.mxu1 }
 0x93d   :  { %v1565_v52 = vmul.f32 0.35355338, %v1556_v51  ;;  %v1568_v53 = vadd.f32 %v1566_v50, %v6887_v2 }
 0x93f   :  { %v1572_v54 = vsel %vm487_vm2, %v1568_v53, -inf  ;;  %v1567_v55 = vadd.f32 %v1565_v52, %v6892_v5 }
 0x940   :  { %1573 = vmax.xlane.f32.xlu1 %v1572_v54 }
 0x941   :  { %v1569_v56 = vsel %vm487_vm2, %v1567_v55, -inf }
 0x942   :  { %1570 = vmax.xlane.f32.xlu0 %v1569_v56 }
 0x9c9   :  { %v1574_v57 = vpop.xlane.xlu1 %1573 }
 0x9ca   :  { %v1576_v58 = vsub.f32 %v1568_v53, %v1574_v57 }
 0x9cb   :  { %v1571_v59 = vpop.xlane.xlu0 %1570 }
 0x9cc   :  { %v1579_v60 = vmul.f32 1.442695, %v1576_v58  ;;  %v1575_v61 = vsub.f32 %v1567_v55, %v1571_v59 }
 0x9ce   :  { %6530 = vpow2.f32 %v1579_v60  ;;  %v1577_v62 = vmul.f32 1.442695, %v1575_v61 }
 0x9d0   :  { %6532 = vpow2.f32 %v1577_v62 }
 0x9db   :  { %v6531_v63 = vpop.eup %6530 }
 0x9dc   :  { %v1584_v0 = vsel %vm487_vm2, %v6531_v63, 0.0 }
 0x9dd   :  { %v6533_v1 = vpop.eup %6532  ;;  %1585 = vadd.xlane.f32.xlu1 %v1584_v0 }
 0x9de   :  { %v1581_v3 = vsel %vm487_vm2, %v6533_v1, 0.0 }
 0x9df   :  { %1582 = vadd.xlane.f32.xlu0 %v1581_v3 }
 0xa66   :  { %v1586_v6 = vpop.xlane.xlu1 %1585 }
 0xa67   :  { %6534 = vrcp.f32 %v1586_v6 }
 0xa68   :  { %v1583_v7 = vpop.xlane.xlu0 %1582 }
 0xa69   :  { %6536 = vrcp.f32 %v1583_v7 }
 0xa74   :  { %v6535_v8 = vpop.eup %6534 }
 0xa75   :  { %v1590_v11 = vmul.f32 %v6535_v8, %v6531_v63 }
 0xa76   :  { %v6537_v9 = vpop.eup %6536 }
 0xa77   :  { %v1589_v10 = vmul.f32 %v6537_v9, %v6533_v1  ;;  %v5544_v9 = vld [vmem:[%s7655_s10 + $0x18] sm:$0xff] }
 0xa79   :  { %6150 = vmatprep.mubr.msk.f32.mxu0 %vm487_vm2, %v1589_v10 }
 0xa7a   :  { %6151 = vmatmul.mubr.msk.f32.vlgmr.msra.gmra.mxu0 %vm487_vm2, %v1590_v11 }
 0xa7b   :  { %6159 = vmatpush3.msra.mxu0 %v5517_v4  ;;  %6166 = vmatprep.mubr.msk.f32.mxu0 %vm87_vm0, %v6812_v35 }
 0xa7c   :  { %6160 = vmatprep.subr.mxu0 %v5516_v12 }
 0xa7d   :  { %6161 = vmatpush3.msra.mxu0 %v5516_v12 }
 0xa7e   :  { %6162 = vmatprep.subr.mxu0 %v5515_v13 }
 0xa7f   :  { %6163 = vmatpush3.msra.mxu0 %v5515_v13  ;;  %v5547_v13 = vld [vmem:[%s7656_s11] ss:$0 sm:$0xff] }
 0xa80   :  { %6164 = vmatprep.subr.mxu0 %v5514_v14 }
 0xa81   :  { %6165 = vmatpush3.msra.mxu0 %v5514_v14 }
 0xa82   :  { %6167 = vmatmul.mubr.msk.f32.vlgmr.msra.gmra.mxu0 %vm87_vm0, %v6818_v38  ;;  %6180 = vmatprep.subr.mxu0 %v5533_v15 }
 0xa83   :  { %6181 = vmatpush3.msra.mxu0 %v5533_v15  ;;  %6188 = vmatprep.mubr.msk.f32.mxu0 %vm87_vm0, %v6812_v35 }
 0xa84   :  { %6182 = vmatprep.subr.mxu0 %v5532_v16 }
 0xa85   :  { %6183 = vmatpush3.msra.mxu0 %v5532_v16 }
 0xa86   :  { %6184 = vmatprep.subr.mxu0 %v5531_v17 }
 0xa87   :  { %6185 = vmatpush3.msra.mxu0 %v5531_v17 }
 0xa88   :  { %6186 = vmatprep.subr.mxu0 %v5530_v18 }
 0xa89   :  { %6187 = vmatpush3.msra.mxu0 %v5530_v18 }
 0xa8a   :  { %6189 = vmatmul.mubr.msk.f32.vlgmr.msra.gmra.mxu0 %vm87_vm0, %v6818_v38 }
 0xb3a   :  { %v6152_v21 = vpop.f32.mrf.mxu0 }
 0xb3c   :  { %v1663_v22 = vpop.f32.mrf.mxu0 }
 0xb3d   :  { %6155 = vmatprep.mubr.msk.f32.mxu1 %vm395_vm1, %v1663_v22 }
 0xb3e   :  { %6156 = vmatmul.mubr.msk.f32.vlgmr.msra.gmra.mxu1 %vm395_vm1, %v6152_v21 }
 0xb3f   :  { %6170 = vmatpush3.msra.mxu1 %v5525_v20  ;;  %6177 = vmatprep.mubr.msk.f32.mxu1 %vm87_vm0, %v6812_v35 }
 0xb40   :  { %6171 = vmatprep.subr.mxu1 %v5524_v24 }
 0xb41   :  { %6172 = vmatpush3.msra.mxu1 %v5524_v24 }
 0xb42   :  { %v6168_v29 = vpop.f32.mrf.mxu0  ;;  %6173 = vmatprep.subr.mxu1 %v5523_v25 }
 0xb43   :  { %v1842_v30 = vadd.f32 %v6168_v29, %v5519_v27  ;;  %6174 = vmatpush3.msra.mxu1 %v5523_v25 }
 0xb44   :  { %v1836_v31 = vpop.f32.mrf.mxu0  ;;  %6175 = vmatprep.subr.mxu1 %v5522_v28 }
 0xb45   :  { %v1837_v32 = vadd.f32 %v5519_v27, %v1836_v31  ;;  %6176 = vmatpush3.msra.mxu1 %v5522_v28 }
 0xb46   :  { %6178 = vmatmul.mubr.msk.f32.vlgmr.msra.gmra.mxu1 %vm87_vm0, %v6818_v38 }
 0xb47   :  { %6195 = vmatprep.mubr.msk.f32.mxu1 %vm395_vm1, %v1837_v32 }
 0xb4a   :  { %v6190_v34 = vpop.f32.mrf.mxu0 }
 0xb4b   :  { %v2018_v39 = vadd.f32 %v6190_v34, %v5535_v33  ;;  %v2357_v34 = vld [vmem:[%s7659_s14 + $0x10] sm:$0xff] }
 0xb4c   :  { %v2012_v40 = vpop.f32.mrf.mxu0 }
 0xb4d   :  { %v2013_v41 = vadd.f32 %v5535_v33, %v2012_v40  ;;  %6198 = vmatprep.subr.mxu0 %v2018_v39  ;;  %v2355_v40 = vld [vmem:[%s7659_s14] sm:$0xff] }
 0xb4e   :  { %6199 = vmatpush3.msra.mxu0 %v2018_v39  ;;  %v2356_v39 = vld [vmem:[%s7659_s14 + $0x8] sm:$0xff] }
 0xb4f   :  { %6200 = vmatprep.subr.mxu0 %v2013_v41 }
 0xb50   :  { %6201 = vmatpush3.msra.mxu0 %v2013_v41 }
 0xbfe   :  { %v6157_v43 = vpop.f32.mrf.mxu1 }
 0xbff   :  { %v1756_v45 = vadd.f32 %v6157_v43, %v1211_v42 }
 0xc00   :  { %v1746_v46 = vpop.f32.mrf.mxu1 }
 0xc01   :  { %v1755_v47 = vadd.f32 %v1746_v46, %v1206_v44 }
 0xc06   :  { %v6179_v49 = vpop.f32.mrf.mxu1 }
 0xc07   :  { %v1930_v50 = vadd.f32 %v6179_v49, %v5527_v48 }
 0xc08   :  { %v1924_v51 = vpop.f32.mrf.mxu1 }
 0xc09   :  { %v1925_v52 = vadd.f32 %v5527_v48, %v1924_v51  ;;  %6191 = vmatprep.subr.msk.mxu1 %vm395_vm1, %v1930_v50  ;;  %v5548_v48 = vld [vmem:[%s7657_s12] ss:$0 sm:$0xff] }
 0xc0a   :  { %6192 = vmatpush3.xpose.msk.msra.mxu1 %vm395_vm1, %v1930_v50 }
 0xc0b   :  { %6193 = vmatprep.subr.msk.mxu1 %vm395_vm1, %v1925_v52 }
 0xc0e   :  { %6194 = vmatpush3.xpose.msk.msra.mxu1 %vm395_vm1, %v1925_v52 }
 0xc0f   :  { %6205 = vmatprep.subr.mxu1 %v5544_v9 }
 0xc11   :  { %6196 = vmatmul.mubr.msk.f32.vlgmr.msra.gmra.mxu1 %vm395_vm1, %v1842_v30 }
 0xc12   :  { %6206 = vmatpush3.msra.mxu1 %v5544_v9 }
 0xcd1   :  { %v6197_v23 = vpop.f32.mrf.mxu1 }
 0xcd2   :  { %v2109_v26 = vmul.f32 0.35355338, %v6197_v23  ;;  %v5549_v23 = vld [vmem:[%s7658_s13] ss:$0 sm:$0xff] }
 0xcd3   :  { %v2099_v36 = vpop.f32.mrf.mxu1 }
 0xcd4   :  { %v2108_v37 = vmul.f32 0.35355338, %v2099_v36  ;;  %v2111_v53 = vadd.f32 %v2109_v26, %v6887_v2 }
 0xcd6   :  { %v2115_v54 = vsel %vm487_vm2, %v2111_v53, -inf  ;;  %v2110_v55 = vadd.f32 %v2108_v37, %v6892_v5 }
 0xcd7   :  { %2116 = vmax.xlane.f32.xlu1 %v2115_v54  ;;  %v2507_v54 = vld [vmem:[%s7661_s16 + $0x30] sm:$0xff] }
 0xcd8   :  { %v2112_v56 = vsel %vm487_vm2, %v2110_v55, -inf }
 0xcd9   :  { %2113 = vmax.xlane.f32.xlu0 %v2112_v56  ;;  %v2505_v56 = vld [vmem:[%s7661_s16 + $0x20] sm:$0xff] }
 0xd60   :  { %v2117_v57 = vpop.xlane.xlu1 %2116 }
 0xd61   :  { %v2119_v58 = vsub.f32 %v2111_v53, %v2117_v57  ;;  %v2508_v53 = vld [vmem:[%s7661_s16 + $0x38] sm:$0xff] }
 0xd62   :  { %v2114_v59 = vpop.xlane.xlu0 %2113  ;;  %6221 = vmatprep.subr.mxu1 %v2508_v53  ;;  %v2504_v57 = vld [vmem:[%s7661_s16 + $0x18] sm:$0xff] }
 0xd63   :  { %v2122_v60 = vmul.f32 1.442695, %v2119_v58  ;;  %v2118_v61 = vsub.f32 %v2110_v55, %v2114_v59  ;;  %v2506_v55 = vld [vmem:[%s7661_s16 + $0x28] sm:$0xff]  ;;  %v2503_v58 = vld [vmem:[%s7661_s16 + $0x10] sm:$0xff] }
 0xd64   :  { %v2502_v59 = vld [vmem:[%s7661_s16 + $0x8] sm:$0xff] }
 0xd65   :  { %6538 = vpow2.f32 %v2122_v60  ;;  %v2120_v62 = vmul.f32 1.442695, %v2118_v61  ;;  %v2501_v60 = vld [vmem:[%s7661_s16] sm:$0xff] }
 0xd66   :  { %v5550_v61 = vld [vmem:[%s7660_s15] ss:$0 sm:$0xff] }
 0xd67   :  { %6540 = vpow2.f32 %v2120_v62 }
 0xd72   :  { %v6539_v63 = vpop.eup %6538 }
 0xd73   :  { %v2127_v0 = vsel %vm487_vm2, %v6539_v63, 0.0 }
 0xd74   :  { %v6541_v2 = vpop.eup %6540  ;;  %2128 = vadd.xlane.f32.xlu1 %v2127_v0 }
 0xd75   :  { %v2124_v1 = vsel %vm487_vm2, %v6541_v2, 0.0 }
 0xd76   :  { %2125 = vadd.xlane.f32.xlu0 %v2124_v1 }
 0xdfd   :  { %v2129_v5 = vpop.xlane.xlu1 %2128 }
 0xdfe   :  { %6542 = vrcp.f32 %v2129_v5 }
 0xdff   :  { %v2126_v3 = vpop.xlane.xlu0 %2125 }
 0xe00   :  { %6544 = vrcp.f32 %v2126_v3 }
 0xe0b   :  { %v6543_v4 = vpop.eup %6542 }
 0xe0c   :  { %v2133_v8 = vmul.f32 %v6543_v4, %v6539_v63 }
 0xe0d   :  { %v6545_v6 = vpop.eup %6544 }
 0xe0e   :  { %v2132_v7 = vmul.f32 %v6545_v6, %v6541_v2 }
 0xe10   :  { %6202 = vmatprep.mubr.msk.f32.mxu0 %vm487_vm2, %v2132_v7 }
 0xe11   :  { %6203 = vmatmul.mubr.msk.f32.vlgmr.msra.gmra.mxu0 %vm487_vm2, %v2133_v8 }
 0xed1   :  { %v6204_v10 = vpop.f32.mrf.mxu0 }
 0xed3   :  { %v2206_v11 = vpop.f32.mrf.mxu0 }
 0xed4   :  { %6207 = vmatprep.mubr.msk.f32.mxu1 %vm395_vm1, %v2206_v11 }
 0xed5   :  { %6208 = vmatmul.mubr.msk.f32.vlgmr.msra.gmra.mxu1 %vm395_vm1, %v6204_v10 }
 0xed6   :  { %6222 = vmatpush3.msra.mxu1 %v2508_v53 }
 0xed7   :  { %6223 = vmatprep.subr.mxu1 %v2507_v54 }
 0xed8   :  { %6224 = vmatpush3.msra.mxu1 %v2507_v54  ;;  %v5553_v54 = vld [vmem:[%s7662_s17] ss:$0 sm:$0xff] }
 0xed9   :  { %6225 = vmatprep.subr.mxu1 %v2506_v55 }
 0xeda   :  { %6226 = vmatpush3.msra.mxu1 %v2506_v55 }
 0xedb   :  { %6227 = vmatprep.subr.mxu1 %v2505_v56 }
 0xedc   :  { %6228 = vmatpush3.msra.mxu1 %v2505_v56 }
 0xedd   :  { %6229 = vmatprep.subr.mxu1 %v2504_v57 }
 0xede   :  { %6230 = vmatpush3.msra.mxu1 %v2504_v57 }
 0xedf   :  { %6231 = vmatprep.subr.mxu1 %v2503_v58 }
 0xee0   :  { %6232 = vmatpush3.msra.mxu1 %v2503_v58 }
 0xee1   :  { %6233 = vmatprep.subr.mxu1 %v2502_v59 }
 0xee2   :  { %6234 = vmatpush3.msra.mxu1 %v2502_v59 }
 0xee3   :  { %6235 = vmatprep.subr.mxu1 %v2501_v60 }
 0xee4   :  { %6236 = vmatpush3.msra.mxu1 %v2501_v60 }
 0xf95   :  { %v6209_v12 = vpop.f32.mrf.mxu1 }
 0xf96   :  { %v2299_v14 = vadd.f32 %v6209_v12, %v1756_v45 }
 0xf97   :  { %v2289_v15 = vpop.f32.mrf.mxu1 }
 0xf98   :  { %v2308_v16 = vadd.f32 %v5547_v13, %v2299_v14  ;;  %v2298_v17 = vadd.f32 %v2289_v15, %v1755_v47 }
 0xf9a   :  { %v2307_v18 = vadd.f32 %v5547_v13, %v2298_v17  ;;  %v2310_v19 = vadd.f32 %v2308_v16, %v6818_v38 }
 0xf9c   :  { %v2316_v20 = vsel %vm87_vm0, %v2310_v19, 0.0  ;;  %v2309_v21 = vadd.f32 %v2307_v18, %v6812_v35  ;;  %v2358_v35 = vld [vmem:[%s7659_s14 + $0x18] sm:$0xff] }
 0xf9d   :  { %2317 = vadd.xlane.f32.xlu1 %v2316_v20  ;;  %6210 = vmatprep.subr.mxu0 %v2358_v35 }
 0xf9e   :  { %v2313_v22 = vsel %vm87_vm0, %v2309_v21, 0.0  ;;  %6211 = vmatpush3.msra.mxu0 %v2358_v35 }
 0xf9f   :  { %2314 = vadd.xlane.f32.xlu0 %v2313_v22  ;;  %6212 = vmatprep.subr.mxu0 %v2357_v34 }
 0xfa0   :  { %6213 = vmatpush3.msra.mxu0 %v2357_v34 }
 0xfa1   :  { %6214 = vmatprep.subr.mxu0 %v2356_v39 }
 0xfa2   :  { %6215 = vmatpush3.msra.mxu0 %v2356_v39 }
 0xfa3   :  { %6216 = vmatprep.subr.mxu0 %v2355_v40 }
 0xfa4   :  { %6217 = vmatpush3.msra.mxu0 %v2355_v40 }
0x1026   :  { %v2318_v24 = vpop.xlane.xlu1 %2317 }
0x1027   :  { %v2320_v25 = vmul.f32 0.03125, %v2318_v24 }
0x1028   :  { %v2315_v27 = vpop.xlane.xlu0 %2314 }
0x1029   :  { %v2322_v28 = vsub.f32 %v2310_v19, %v2320_v25  ;;  %v2319_v29 = vmul.f32 0.03125, %v2315_v27 }
0x102b   :  { %v2321_v30 = vsub.f32 %v2309_v21, %v2319_v29  ;;  %v2324_v31 = vmul.f32 %v2322_v28, %v2322_v28 }
0x102d   :  { %v2328_v32 = vsel %vm87_vm0, %v2324_v31, 0.0  ;;  %v2323_v33 = vmul.f32 %v2321_v30, %v2321_v30 }
0x102e   :  { %2329 = vadd.xlane.f32.xlu1 %v2328_v32 }
0x102f   :  { %v2325_v38 = vsel %vm87_vm0, %v2323_v33, 0.0 }
0x1030   :  { %2326 = vadd.xlane.f32.xlu0 %v2325_v38 }
0x10b7   :  { %v2330_v41 = vpop.xlane.xlu1 %2329 }
0x10b8   :  { %v2332_v42 = vmul.f32 0.03125, %v2330_v41 }
0x10b9   :  { %v2327_v43 = vpop.xlane.xlu0 %2326 }
0x10ba   :  { %v2334_v44 = vadd.f32 1e-12, %v2332_v42  ;;  %v2331_v45 = vmul.f32 0.03125, %v2327_v43 }
0x10bc   :  { %6546 = vrsqrt.f32 %v2334_v44  ;;  %v2333_v46 = vadd.f32 1e-12, %v2331_v45 }
0x10be   :  { %6548 = vrsqrt.f32 %v2333_v46 }
0x10c9   :  { %v6547_v47 = vpop.eup %6546 }
0x10ca   :  { %v2338_v49 = vmul.f32 %v6547_v47, %v2322_v28 }
0x10cb   :  { %v6549_v50 = vpop.eup %6548 }
0x10cc   :  { %v2337_v51 = vmul.f32 %v6549_v50, %v2321_v30  ;;  %v2346_v52 = vmul.f32 %v5548_v48, %v2338_v49 }
0x10ce   :  { %v2345_v26 = vmul.f32 %v5548_v48, %v2337_v51  ;;  %v7144_v37 = vadd.f32 %v5549_v23, %v2346_v52 }
0x10d0   :  { %v7142_v36 = vadd.f32 %v5549_v23, %v2345_v26 }
0x10d2   :  { %6218 = vmatprep.mubr.msk.f32.mxu0 %vm87_vm0, %v7142_v36 }
0x10d3   :  { %6219 = vmatmul.mubr.msk.f32.vlgmr.msra.gmra.mxu0 %vm87_vm0, %v7144_v37 }
0x1193   :  { %v6220_v62 = vpop.f32.mrf.mxu0 }
0x1194   :  { %v2444_v63 = vadd.f32 %v6220_v62, %v5550_v61 }
0x1195   :  { %v2438_v0 = vpop.f32.mrf.mxu0 }
0x1196   :  { %v2448_v2 = vmul.f32 0.70710677, %v2444_v63  ;;  %v2439_v1 = vadd.f32 %v5550_v61, %v2438_v0  ;;  %v2496_v23 = vmul.f32 0.5, %v2444_v63 }
0x1198   :  { %v2450_v5 = vand.u32 2147483647, %v2448_v2  ;;  %v2447_v3 = vmul.f32 0.70710677, %v2439_v1  ;;  %vm2490_vm3 = vcmp.ge.f32.partialorder %v2448_v2, 0.0  ;;  %v2495_v51 = vmul.f32 0.5, %v2439_v1 }
0x119a   :  { %v2452_v4 = vmul.f32 0.3275911, %v2450_v5  ;;  %v2449_v6 = vand.u32 2147483647, %v2447_v3  ;;  %v2478_v10 = vsub.f32 0.0, %v2450_v5  ;;  %vm2489_vm4 = vcmp.ge.f32.partialorder %v2447_v3, 0.0 }
0x119c   :  { %v2454_v7 = vadd.f32 1.0, %v2452_v4  ;;  %v2451_v8 = vmul.f32 0.3275911, %v2449_v6  ;;  %v2477_v11 = vsub.f32 0.0, %v2449_v6  ;;  %v2480_v12 = vmul.f32 %v2478_v10, %v2450_v5  ;;  %v5576_v10 = vld [vmem:[%s7692_s9 + $0x90] sm:$0xff] }
0x119e   :  { %6550 = vrcp.f32 %v2454_v7  ;;  %v2453_v9 = vadd.f32 1.0, %v2451_v8  ;;  %v2479_v14 = vmul.f32 %v2477_v11, %v2449_v6  ;;  %v2483_v16 = vmul.f32 1.442695, %v2480_v12  ;;  %v5577_v8 = vld [vmem:[%s7692_s9 + $0x98] sm:$0xff]  ;;  %v5559_v11 = vld [vmem:[%s7690_s1 + $0x88] sm:$0xff] }
0x119f   :  { %6262 = vmatprep.subr.mxu1 %v5577_v8  ;;  %v5575_v12 = vld [vmem:[%s7692_s9 + $0x88] sm:$0xff] }
0x11a0   :  { %6552 = vrcp.f32 %v2453_v9  ;;  %v2481_v20 = vmul.f32 1.442695, %v2479_v14  ;;  %v5560_v9 = vld [vmem:[%s7690_s1 + $0x90] sm:$0xff]  ;;  %v5574_v14 = vld [vmem:[%s7692_s9 + $0x80] sm:$0xff] }
0x11a1   :  { %6554 = vpow2.f32 %v2483_v16 }
0x11a2   :  { %6556 = vpow2.f32 %v2481_v20 }
0x11ab   :  { %v6551_v13 = vpop.eup %6550 }
0x11ac   :  { %v2460_v15 = vmul.f32 1.0614054, %v6551_v13 }
0x11ad   :  { %v6553_v17 = vpop.eup %6552 }
0x11ae   :  { %v2462_v18 = vadd.f32 -1.4531521, %v2460_v15  ;;  %v2459_v19 = vmul.f32 1.0614054, %v6553_v17  ;;  %v6555_v34 = vpop.eup %6554  ;;  %v5569_v15 = vld [vmem:[%s7691_s4 + $0x98] sm:$0xff] }
0x11af   :  { %v6557_v42 = vpop.eup %6556 }
0x11b0   :  { %v2464_v21 = vmul.f32 %v6551_v13, %v2462_v18  ;;  %v2461_v22 = vadd.f32 -1.4531521, %v2459_v19 }
0x11b2   :  { %v2466_v24 = vadd.f32 1.4214138, %v2464_v21  ;;  %v2463_v25 = vmul.f32 %v6553_v17, %v2461_v22 }
0x11b4   :  { %v2468_v27 = vmul.f32 %v6551_v13, %v2466_v24  ;;  %v2465_v28 = vadd.f32 1.4214138, %v2463_v25  ;;  %v5556_v24 = vld [vmem:[%s7663_s18] ss:$0 sm:$0xff] }
0x11b6   :  { %v2470_v29 = vadd.f32 -0.28449672, %v2468_v27  ;;  %v2467_v30 = vmul.f32 %v6553_v17, %v2465_v28 }
0x11b8   :  { %v2472_v31 = vmul.f32 %v6551_v13, %v2470_v29  ;;  %v2469_v32 = vadd.f32 -0.28449672, %v2467_v30  ;;  %v5557_v30 = vld [vmem:[%s7664_s19] ss:$0 sm:$0xff] }
0x11ba   :  { %v2474_v33 = vadd.f32 0.2548296, %v2472_v31  ;;  %v2471_v38 = vmul.f32 %v6553_v17, %v2469_v32 }
0x11bc   :  { %v2476_v35 = vmul.f32 %v6551_v13, %v2474_v33  ;;  %v2473_v39 = vadd.f32 0.2548296, %v2471_v38  ;;  %v5558_v13 = vld [vmem:[%s7690_s1 + $0x80] sm:$0xff]  ;;  %v5568_v38 = vld [vmem:[%s7691_s4 + $0x90] sm:$0xff] }
0x11be   :  { %v2486_v40 = vmul.f32 %v6555_v34, %v2476_v35  ;;  %v2475_v41 = vmul.f32 %v6553_v17, %v2473_v39  ;;  %v5567_v35 = vld [vmem:[%s7691_s4 + $0x88] sm:$0xff]  ;;  %v5566_v34 = vld [vmem:[%s7691_s4 + $0x80] sm:$0xff] }
0x11bf   :  { %v5579_v39 = vld [vmem:[%s7697_s26 + $0x4] ss:$0 sm:$0xff] }
0x11c0   :  { %v2488_v43 = vsub.f32 1.0, %v2486_v40  ;;  %v2485_v44 = vmul.f32 %v6557_v42, %v2475_v41 }
0x11c2   :  { %v2492_v45 = vsub.f32 0.0, %v2488_v43  ;;  %v2487_v46 = vsub.f32 1.0, %v2485_v44 }
0x11c4   :  { %v2494_v47 = vsel %vm2490_vm3, %v2488_v43, %v2492_v45  ;;  %v2491_v48 = vsub.f32 0.0, %v2487_v46  ;;  %v5563_v43 = vld [vmem:[%s7696_s30 + $0x4] ss:$0 sm:$0xff] }
0x11c5   :  { %v2498_v49 = vadd.f32 1.0, %v2494_v47 }
0x11c6   :  { %v2493_v50 = vsel %vm2489_vm4, %v2487_v46, %v2491_v48  ;;  %v5571_v48 = vld [vmem:[%s7695_s29 + $0x4] ss:$0 sm:$0xff] }
0x11c7   :  { %v2497_v52 = vadd.f32 1.0, %v2493_v50  ;;  %v2500_v53 = vmul.f32 %v2498_v49, %v2496_v23  ;;  %v5600_v23 = vld [vmem:[%s7691_s4 + $0xb8] sm:$0xff] }
0x11c9   :  { %v2499_v26 = vmul.f32 %v2497_v52, %v2495_v51 }
0x11cb   :  { %6237 = vmatprep.mubr.msk.f32.mxu1 %vm2516_vm5, %v2499_v26 }
0x11cc   :  { %6238 = vmatmul.mubr.msk.f32.vlgmr.msra.gmra.mxu1 %vm2516_vm5, %v2500_v53  ;;  %v5599_v53 = vld [vmem:[%s7691_s4 + $0xb0] sm:$0xff] }
0x11cd   :  { %6263 = vmatpush3.msra.mxu1 %v5577_v8 }
0x11ce   :  { %6264 = vmatprep.subr.mxu1 %v5576_v10 }
0x11cf   :  { %6265 = vmatpush3.msra.mxu1 %v5576_v10 }
0x11d0   :  { %6266 = vmatprep.subr.mxu1 %v5575_v12 }
0x11d1   :  { %6267 = vmatpush3.msra.mxu1 %v5575_v12 }
0x11d2   :  { %6268 = vmatprep.subr.mxu1 %v5574_v14 }
0x11d3   :  { %6269 = vmatpush3.msra.mxu1 %v5574_v14 }
0x128c   :  { %v6239_v55 = vpop.f32.mrf.mxu1 }
0x128d   :  { %v2595_v56 = vadd.f32 %v6239_v55, %v5553_v54  ;;  %v5597_v55 = vld [vmem:[%s7691_s4 + $0xa0] sm:$0xff] }
0x128e   :  { %v2589_v57 = vpop.f32.mrf.mxu1 }
0x128f   :  { %v2590_v58 = vadd.f32 %v5553_v54, %v2589_v57  ;;  %v2599_v59 = vadd.f32 %v2595_v56, %v7144_v37  ;;  %v5598_v54 = vld [vmem:[%s7691_s4 + $0xa8] sm:$0xff] }
0x1291   :  { %v2605_v60 = vsel %vm87_vm0, %v2599_v59, 0.0  ;;  %v2598_v61 = vadd.f32 %v2590_v58, %v7142_v36  ;;  %v5561_v36 = vld [vmem:[%s7690_s1 + $0x98] sm:$0xff] }
0x1292   :  { %2606 = vadd.xlane.f32.xlu1 %v2605_v60  ;;  %6240 = vmatprep.subr.mxu0 %v5561_v36  ;;  %v7280_v60 = vld [vmem:[%s7698_s8 + $0x8] sm:$0xff] }
0x1293   :  { %v2602_v62 = vsel %vm87_vm0, %v2598_v61, 0.0  ;;  %6241 = vmatpush3.msra.mxu0 %v5561_v36 }
0x1294   :  { %2603 = vadd.xlane.f32.xlu0 %v2602_v62  ;;  %6242 = vmatprep.subr.mxu0 %v5560_v9 }
0x1295   :  { %6243 = vmatpush3.msra.mxu0 %v5560_v9 }
0x1296   :  { %6244 = vmatprep.subr.mxu0 %v5559_v11 }
0x1297   :  { %6245 = vmatpush3.msra.mxu0 %v5559_v11 }
0x1298   :  { %6246 = vmatprep.subr.mxu0 %v5558_v13 }
0x1299   :  { %6247 = vmatpush3.msra.mxu0 %v5558_v13 }
0x129a   :  { %6251 = vmatprep.subr.mxu0 %v5569_v15 }
0x131b   :  { %v2607_v63 = vpop.xlane.xlu1 %2606 }
0x131c   :  { %v2609_v0 = vmul.f32 0.03125, %v2607_v63  ;;  %v7287_v63 = vld [vmem:[%s7698_s8] sm:$0xff] }
0x131d   :  { %v2604_v2 = vpop.xlane.xlu0 %2603 }
0x131e   :  { %v2611_v1 = vsub.f32 %v2599_v59, %v2609_v0  ;;  %v2608_v5 = vmul.f32 0.03125, %v2604_v2  ;;  %v5602_v2 = vld [vmem:[%s7695_s29 + $0x5] ss:$0 sm:$0xff] }
0x1320   :  { %v2610_v3 = vsub.f32 %v2598_v61, %v2608_v5  ;;  %v2613_v4 = vmul.f32 %v2611_v1, %v2611_v1 }
0x1322   :  { %v2617_v6 = vsel %vm87_vm0, %v2613_v4, 0.0  ;;  %v2612_v7 = vmul.f32 %v2610_v3, %v2610_v3 }
0x1323   :  { %2618 = vadd.xlane.f32.xlu1 %v2617_v6 }
0x1324   :  { %v2614_v37 = vsel %vm87_vm0, %v2612_v7, 0.0 }
0x1325   :  { %2615 = vadd.xlane.f32.xlu0 %v2614_v37 }
0x13ac   :  { %v2619_v16 = vpop.xlane.xlu1 %2618 }
0x13ad   :  { %v2621_v17 = vmul.f32 0.03125, %v2619_v16 }
0x13ae   :  { %v2616_v18 = vpop.xlane.xlu0 %2615 }
0x13af   :  { %v2623_v19 = vadd.f32 1e-12, %v2621_v17  ;;  %v2620_v20 = vmul.f32 0.03125, %v2616_v18 }
0x13b1   :  { %6558 = vrsqrt.f32 %v2623_v19  ;;  %v2622_v21 = vadd.f32 1e-12, %v2620_v20 }
0x13b3   :  { %6560 = vrsqrt.f32 %v2622_v21 }
0x13be   :  { %v6559_v22 = vpop.eup %6558 }
0x13bf   :  { %v2627_v25 = vmul.f32 %v6559_v22, %v2611_v1  ;;  %v5591_v22 = vld [vmem:[%s7690_s1 + $0xb0] sm:$0xff] }
0x13c0   :  { %v6561_v27 = vpop.eup %6560 }
0x13c1   :  { %v2626_v28 = vmul.f32 %v6561_v27, %v2610_v3  ;;  %v2635_v29 = vmul.f32 %v5556_v24, %v2627_v25  ;;  %v5589_v25 = vld [vmem:[%s7690_s1 + $0xa0] sm:$0xff]  ;;  %v5608_v27 = vld [vmem:[%s7692_s9 + $0xb8] sm:$0xff] }
0x13c3   :  { %v2634_v31 = vmul.f32 %v5556_v24, %v2626_v28  ;;  %v7223_v33 = vadd.f32 %v5557_v30, %v2635_v29  ;;  %v5590_v24 = vld [vmem:[%s7690_s1 + $0xa8] sm:$0xff]  ;;  %v5607_v28 = vld [vmem:[%s7692_s9 + $0xb0] sm:$0xff] }
0x13c4   :  { %v5606_v29 = vld [vmem:[%s7692_s9 + $0xa8] sm:$0xff] }
0x13c5   :  { %v7221_v32 = vadd.f32 %v5557_v30, %v2634_v31  ;;  %v5605_v30 = vld [vmem:[%s7692_s9 + $0xa0] sm:$0xff] }
0x13c7   :  { %6248 = vmatprep.mubr.msk.f32.mxu0 %vm87_vm0, %v7221_v32  ;;  %6270 = vmatprep.mubr.msk.f32.mxu1 %vm87_vm0, %v7221_v32 }
0x13c8   :  { %6249 = vmatmul.mubr.msk.f32.vlgmr.msra.gmra.mxu0 %vm87_vm0, %v7223_v33  ;;  %6271 = vmatmul.mubr.msk.f32.vlgmr.msra.gmra.mxu1 %vm87_vm0, %v7223_v33 }
0x13c9   :  { %6252 = vmatpush3.msra.mxu0 %v5569_v15  ;;  %6259 = vmatprep.mubr.msk.f32.mxu0 %vm87_vm0, %v7221_v32  ;;  %v5592_v15 = vld [vmem:[%s7690_s1 + $0xb8] sm:$0xff] }
0x13ca   :  { %6253 = vmatprep.subr.mxu0 %v5568_v38 }
0x13cb   :  { %6254 = vmatpush3.msra.mxu0 %v5568_v38 }
0x13cc   :  { %6255 = vmatprep.subr.mxu0 %v5567_v35 }
0x13cd   :  { %6256 = vmatpush3.msra.mxu0 %v5567_v35 }
0x13ce   :  { %6257 = vmatprep.subr.mxu0 %v5566_v34 }
0x13cf   :  { %6258 = vmatpush3.msra.mxu0 %v5566_v34  ;;  %v5594_v34 = vld [vmem:[%s7696_s30 + $0x5] ss:$0 sm:$0xff] }
0x13d0   :  { %6260 = vmatmul.mubr.msk.f32.vlgmr.msra.gmra.mxu0 %vm87_vm0, %v7223_v33 }
0x1488   :  { %v6250_v40 = vpop.f32.mrf.mxu0  ;;  %v6272_v41 = vpop.f32.mrf.mxu1 }
0x1489   :  { %v2911_v42 = vadd.f32 %v6272_v41, %v5579_v39  ;;  %v2735_v26 = vadd.f32 %v6250_v40, %v5563_v43 }
0x148a   :  { %v2729_v44 = vpop.f32.mrf.mxu0  ;;  %v2905_v45 = vpop.f32.mrf.mxu1 }
0x148b   :  { %v2730_v46 = vadd.f32 %v5563_v43, %v2729_v44  ;;  %v2906_v47 = vadd.f32 %v5579_v39, %v2905_v45  ;;  %6280 = vmatprep.subr.mxu1 %v2911_v42 }
0x148c   :  { %6281 = vmatpush3.msra.mxu1 %v2911_v42  ;;  %v5610_v42 = vld [vmem:[%s7697_s26 + $0x5] ss:$0 sm:$0xff] }
0x148d   :  { %6277 = vmatprep.mubr.msk.f32.mxu0 %vm395_vm1, %v2730_v46  ;;  %6282 = vmatprep.subr.mxu1 %v2906_v47 }
0x148e   :  { %6283 = vmatpush3.msra.mxu1 %v2906_v47 }
0x148f   :  { %6287 = vmatprep.subr.mxu1 %v5592_v15 }
0x1490   :  { %v6261_v49 = vpop.f32.mrf.mxu0 }
0x1491   :  { %v2823_v50 = vadd.f32 %v6261_v49, %v5571_v48 }
0x1492   :  { %v2817_v51 = vpop.f32.mrf.mxu0 }
0x1493   :  { %v2818_v52 = vadd.f32 %v5571_v48, %v2817_v51  ;;  %6273 = vmatprep.subr.msk.mxu0 %vm395_vm1, %v2823_v50 }
0x1494   :  { %6274 = vmatpush3.xpose.msk.msra.mxu0 %vm395_vm1, %v2823_v50 }
0x1495   :  { %6275 = vmatprep.subr.msk.mxu0 %vm395_vm1, %v2818_v52 }
0x1498   :  { %6276 = vmatpush3.xpose.msk.msra.mxu0 %vm395_vm1, %v2818_v52 }
0x1499   :  { %6298 = vmatprep.subr.mxu0 %v5600_v23 }
0x149b   :  { %6278 = vmatmul.mubr.msk.f32.vlgmr.msra.gmra.mxu0 %vm395_vm1, %v2735_v26 }
0x149c   :  { %6299 = vmatpush3.msra.mxu0 %v5600_v23  ;;  %6306 = vmatprep.mubr.msk.f32.mxu0 %vm87_vm0, %v7221_v32 }
0x149d   :  { %6300 = vmatprep.subr.mxu0 %v5599_v53 }
0x149e   :  { %6301 = vmatpush3.msra.mxu0 %v5599_v53 }
0x149f   :  { %6302 = vmatprep.subr.mxu0 %v5598_v54 }
0x14a0   :  { %6303 = vmatpush3.msra.mxu0 %v5598_v54 }
0x14a1   :  { %6304 = vmatprep.subr.mxu0 %v5597_v55 }
0x14a2   :  { %6305 = vmatpush3.msra.mxu0 %v5597_v55 }
0x14a3   :  { %6307 = vmatmul.mubr.msk.f32.vlgmr.msra.gmra.mxu0 %vm87_vm0, %v7223_v33 }
0x155b   :  { %v6279_v56 = vpop.f32.mrf.mxu0 }
0x155c   :  { %v3002_v57 = vmul.f32 0.35355338, %v6279_v56 }
0x155d   :  { %v2992_v58 = vpop.f32.mrf.mxu0 }
0x155e   :  { %v3001_v59 = vmul.f32 0.35355338, %v2992_v58  ;;  %v3004_v61 = vadd.f32 %v7280_v60, %v3002_v57 }
0x1560   :  { %v3008_v62 = vsel %vm487_vm2, %v3004_v61, -inf  ;;  %v3003_v0 = vadd.f32 %v7287_v63, %v3001_v59 }
0x1561   :  { %3009 = vmax.xlane.f32.xlu1 %v3008_v62 }
0x1562   :  { %v3005_v1 = vsel %vm487_vm2, %v3003_v0, -inf }
0x1563   :  { %v6308_v5 = vpop.f32.mrf.mxu0  ;;  %3006 = vmax.xlane.f32.xlu0 %v3005_v1 }
0x1564   :  { %v3283_v3 = vadd.f32 %v6308_v5, %v5602_v2 }
0x1565   :  { %v3277_v4 = vpop.f32.mrf.mxu0 }
0x1566   :  { %v3278_v6 = vadd.f32 %v5602_v2, %v3277_v4  ;;  %6320 = vmatprep.subr.msk.mxu0 %vm395_vm1, %v3283_v3  ;;  %v5588_v2 = vld [vmem:[%s7655_s10 + $0x20] sm:$0xff] }
0x1567   :  { %6321 = vmatpush3.xpose.msk.msra.mxu0 %vm395_vm1, %v3283_v3 }
0x1568   :  { %6322 = vmatprep.subr.msk.mxu0 %vm395_vm1, %v3278_v6 }
0x156b   :  { %6323 = vmatpush3.xpose.msk.msra.mxu0 %vm395_vm1, %v3278_v6 }
0x15ea   :  { %v3010_v7 = vpop.xlane.xlu1 %3009 }
0x15eb   :  { %v3012_v37 = vsub.f32 %v3004_v61, %v3010_v7 }
0x15ec   :  { %v3007_v36 = vpop.xlane.xlu0 %3006 }
0x15ed   :  { %v3015_v8 = vmul.f32 1.442695, %v3012_v37  ;;  %v3011_v9 = vsub.f32 %v3003_v0, %v3007_v36  ;;  %v5635_v37 = vld [vmem:[%s7691_s4 + $0xd8] sm:$0xff]  ;;  %v5634_v36 = vld [vmem:[%s7691_s4 + $0xd0] sm:$0xff] }
0x15ef   :  { %6562 = vpow2.f32 %v3015_v8  ;;  %v3013_v10 = vmul.f32 1.442695, %v3011_v9  ;;  %v5633_v8 = vld [vmem:[%s7691_s4 + $0xc8] sm:$0xff]  ;;  %v5632_v9 = vld [vmem:[%s7691_s4 + $0xc0] sm:$0xff] }
0x15f1   :  { %6564 = vpow2.f32 %v3013_v10  ;;  %v5619_v10 = vld [vmem:[%s7655_s10 + $0x28] sm:$0xff] }
0x15f2   :  { %6334 = vmatprep.subr.mxu0 %v5619_v10 }
0x15fc   :  { %v6563_v11 = vpop.eup %6562 }
0x15fd   :  { %v3020_v12 = vsel %vm487_vm2, %v6563_v11, 0.0 }
0x15fe   :  { %v6565_v13 = vpop.eup %6564  ;;  %3021 = vadd.xlane.f32.xlu1 %v3020_v12 }
0x15ff   :  { %v3017_v14 = vsel %vm487_vm2, %v6565_v13, 0.0 }
0x1600   :  { %3018 = vadd.xlane.f32.xlu0 %v3017_v14  ;;  %v5626_v14 = vld [vmem:[%s7690_s1 + $0xd0] sm:$0xff] }
0x1687   :  { %v3022_v16 = vpop.xlane.xlu1 %3021 }
0x1688   :  { %6566 = vrcp.f32 %v3022_v16 }
0x1689   :  { %v3019_v17 = vpop.xlane.xlu0 %3018 }
0x168a   :  { %6568 = vrcp.f32 %v3019_v17  ;;  %v5624_v17 = vld [vmem:[%s7690_s1 + $0xc0] sm:$0xff] }
0x1695   :  { %v6567_v18 = vpop.eup %6566 }
0x1696   :  { %v3026_v21 = vmul.f32 %v6567_v18, %v6563_v11  ;;  %v5627_v11 = vld [vmem:[%s7690_s1 + $0xd8] sm:$0xff] }
0x1697   :  { %v6569_v19 = vpop.eup %6568  ;;  %v5643_v18 = vld [vmem:[%s7692_s9 + $0xd8] sm:$0xff] }
0x1698   :  { %v3025_v20 = vmul.f32 %v6569_v19, %v6565_v13 }
0x169a   :  { %6284 = vmatprep.mubr.msk.f32.mxu1 %vm487_vm2, %v3025_v20  ;;  %v5637_v20 = vld [vmem:[%s7695_s29 + $0x6] ss:$0 sm:$0xff] }
0x169b   :  { %6285 = vmatmul.mubr.msk.f32.vlgmr.msra.gmra.mxu1 %vm487_vm2, %v3026_v21  ;;  %v5642_v21 = vld [vmem:[%s7692_s9 + $0xd0] sm:$0xff] }
0x169c   :  { %6288 = vmatpush3.msra.mxu1 %v5592_v15  ;;  %6295 = vmatprep.mubr.msk.f32.mxu1 %vm87_vm0, %v7221_v32  ;;  %v5625_v15 = vld [vmem:[%s7690_s1 + $0xc8] sm:$0xff] }
0x169d   :  { %6289 = vmatprep.subr.mxu1 %v5591_v22 }
0x169e   :  { %6290 = vmatpush3.msra.mxu1 %v5591_v22 }
0x169f   :  { %6291 = vmatprep.subr.mxu1 %v5590_v24 }
0x16a0   :  { %6292 = vmatpush3.msra.mxu1 %v5590_v24 }
0x16a1   :  { %6293 = vmatprep.subr.mxu1 %v5589_v25 }
0x16a2   :  { %6294 = vmatpush3.msra.mxu1 %v5589_v25  ;;  %v5641_v25 = vld [vmem:[%s7692_s9 + $0xc8] sm:$0xff] }
0x16a3   :  { %6296 = vmatmul.mubr.msk.f32.vlgmr.msra.gmra.mxu1 %vm87_vm0, %v7223_v33  ;;  %6309 = vmatprep.subr.mxu1 %v5608_v27 }
0x16a4   :  { %6310 = vmatpush3.msra.mxu1 %v5608_v27  ;;  %6317 = vmatprep.mubr.msk.f32.mxu1 %vm87_vm0, %v7221_v32 }
0x16a5   :  { %6311 = vmatprep.subr.mxu1 %v5607_v28 }
0x16a6   :  { %6312 = vmatpush3.msra.mxu1 %v5607_v28 }
0x16a7   :  { %6313 = vmatprep.subr.mxu1 %v5606_v29 }
0x16a8   :  { %6314 = vmatpush3.msra.mxu1 %v5606_v29  ;;  %v5640_v29 = vld [vmem:[%s7692_s9 + $0xc0] sm:$0xff] }
0x16a9   :  { %6315 = vmatprep.subr.mxu1 %v5605_v30 }
0x16aa   :  { %6316 = vmatpush3.msra.mxu1 %v5605_v30 }
0x16ab   :  { %6318 = vmatmul.mubr.msk.f32.vlgmr.msra.gmra.mxu1 %vm87_vm0, %v7223_v33 }
0x175b   :  { %v6286_v31 = vpop.f32.mrf.mxu1 }
0x175d   :  { %v3099_v38 = vpop.f32.mrf.mxu1 }
0x1763   :  { %v6297_v35 = vpop.f32.mrf.mxu1 }
0x1764   :  { %v3195_v41 = vadd.f32 %v6297_v35, %v5594_v34  ;;  %v5629_v35 = vld [vmem:[%s7696_s30 + $0x6] ss:$0 sm:$0xff] }
0x1765   :  { %v3189_v39 = vpop.f32.mrf.mxu1 }
0x1766   :  { %v3190_v40 = vadd.f32 %v5594_v34, %v3189_v39 }
0x1768   :  { %6324 = vmatprep.mubr.msk.f32.mxu0 %vm395_vm1, %v3190_v40 }
0x1769   :  { %6325 = vmatmul.mubr.msk.f32.vlgmr.msra.gmra.mxu0 %vm395_vm1, %v3195_v41  ;;  %v5645_v41 = vld [vmem:[%s7697_s26 + $0x6] ss:$0 sm:$0xff] }
0x176a   :  { %6335 = vmatpush3.msra.mxu0 %v5619_v10  ;;  %v5674_v10 = vld [vmem:[%s7692_s9 + $0xe8] sm:$0xff] }
0x176b   :  { %v6319_v43 = vpop.f32.mrf.mxu1  ;;  %6344 = vmatprep.subr.mxu0 %v5627_v11 }
0x176c   :  { %v3371_v44 = vadd.f32 %v6319_v43, %v5610_v42 }
0x176d   :  { %v3365_v45 = vpop.f32.mrf.mxu1 }
0x176e   :  { %v3366_v46 = vadd.f32 %v5610_v42, %v3365_v45  ;;  %6327 = vmatprep.subr.mxu1 %v3371_v44 }
0x176f   :  { %6328 = vmatpush3.msra.mxu1 %v3371_v44 }
0x1770   :  { %6329 = vmatprep.subr.mxu1 %v3366_v46 }
0x1771   :  { %6330 = vmatpush3.msra.mxu1 %v3366_v46 }
0x1772   :  { %6339 = vmatprep.subr.mxu1 %v5588_v2 }
0x1829   :  { %v6326_v47 = vpop.f32.mrf.mxu0 }
0x182a   :  { %v3462_v48 = vmul.f32 0.35355338, %v6326_v47 }
0x182b   :  { %v3452_v49 = vpop.f32.mrf.mxu0 }
0x182c   :  { %v3461_v50 = vmul.f32 0.35355338, %v3452_v49  ;;  %v3464_v51 = vadd.f32 %v7280_v60, %v3462_v48 }
0x182e   :  { %v3468_v52 = vsel %vm487_vm2, %v3464_v51, -inf  ;;  %v3463_v23 = vadd.f32 %v7287_v63, %v3461_v50 }
0x182f   :  { %3469 = vmax.xlane.f32.xlu1 %v3468_v52 }
0x1830   :  { %v3465_v26 = vsel %vm487_vm2, %v3463_v23, -inf }
0x1831   :  { %3466 = vmax.xlane.f32.xlu0 %v3465_v26 }
0x18b8   :  { %v3470_v53 = vpop.xlane.xlu1 %3469 }
0x18b9   :  { %v3472_v54 = vsub.f32 %v3464_v51, %v3470_v53 }
0x18ba   :  { %v3467_v55 = vpop.xlane.xlu0 %3466 }
0x18bb   :  { %v3475_v56 = vmul.f32 1.442695, %v3472_v54  ;;  %v3471_v57 = vsub.f32 %v3463_v23, %v3467_v55 }
0x18bd   :  { %6570 = vpow2.f32 %v3475_v56  ;;  %v3473_v58 = vmul.f32 1.442695, %v3471_v57 }
0x18bf   :  { %6572 = vpow2.f32 %v3473_v58 }
0x18ca   :  { %v6571_v59 = vpop.eup %6570 }
0x18cb   :  { %v3480_v61 = vsel %vm487_vm2, %v6571_v59, 0.0 }
0x18cc   :  { %v6573_v62 = vpop.eup %6572  ;;  %3481 = vadd.xlane.f32.xlu1 %v3480_v61 }
0x18cd   :  { %v3477_v0 = vsel %vm487_vm2, %v6573_v62, 0.0 }
0x18ce   :  { %3478 = vadd.xlane.f32.xlu0 %v3477_v0  ;;  %v5660_v0 = vld [vmem:[%s7690_s1 + $0xf8] sm:$0xff] }
0x1955   :  { %v3482_v1 = vpop.xlane.xlu1 %3481 }
0x1956   :  { %6574 = vrcp.f32 %v3482_v1 }
0x1957   :  { %v3479_v5 = vpop.xlane.xlu0 %3478 }
0x1958   :  { %6576 = vrcp.f32 %v3479_v5 }
0x1963   :  { %v6575_v3 = vpop.eup %6574 }
0x1964   :  { %v3486_v7 = vmul.f32 %v6575_v3, %v6571_v59 }
0x1965   :  { %v6577_v4 = vpop.eup %6576 }
0x1966   :  { %v3485_v6 = vmul.f32 %v6577_v4, %v6573_v62 }
0x1968   :  { %6331 = vmatprep.mubr.msk.f32.mxu1 %vm487_vm2, %v3485_v6 }
0x1969   :  { %6332 = vmatmul.mubr.msk.f32.vlgmr.msra.gmra.mxu1 %vm487_vm2, %v3486_v7  ;;  %v5659_v7 = vld [vmem:[%s7690_s1 + $0xf0] sm:$0xff] }
0x196a   :  { %6341 = vmatprep.mubr.msk.f32.mxu1 %vm395_vm1, %v3099_v38  ;;  %6340 = vmatpush3.msra.mxu1 %v5588_v2 }
0x196b   :  { %6355 = vmatprep.subr.mxu1 %v5635_v37 }
0x196d   :  { %6342 = vmatmul.mubr.msk.f32.vlgmr.msra.gmra.mxu1 %vm395_vm1, %v6286_v31 }
0x196e   :  { %6356 = vmatpush3.msra.mxu1 %v5635_v37  ;;  %6363 = vmatprep.mubr.msk.f32.mxu1 %vm87_vm0, %v7221_v32  ;;  %v5658_v37 = vld [vmem:[%s7690_s1 + $0xe8] sm:$0xff] }
0x196f   :  { %6357 = vmatprep.subr.mxu1 %v5634_v36 }
0x1970   :  { %6358 = vmatpush3.msra.mxu1 %v5634_v36  ;;  %v5657_v36 = vld [vmem:[%s7690_s1 + $0xe0] sm:$0xff] }
0x1971   :  { %6359 = vmatprep.subr.mxu1 %v5633_v8 }
0x1972   :  { %6360 = vmatpush3.msra.mxu1 %v5633_v8  ;;  %v5676_v8 = vld [vmem:[%s7692_s9 + $0xf8] sm:$0xff] }
0x1973   :  { %6361 = vmatprep.subr.mxu1 %v5632_v9 }
0x1974   :  { %6362 = vmatpush3.msra.mxu1 %v5632_v9  ;;  %v5675_v9 = vld [vmem:[%s7692_s9 + $0xf0] sm:$0xff] }
0x1975   :  { %6364 = vmatmul.mubr.msk.f32.vlgmr.msra.gmra.mxu1 %vm87_vm0, %v7223_v33 }
0x1a29   :  { %v6333_v12 = vpop.f32.mrf.mxu1 }
0x1a2b   :  { %v3559_v13 = vpop.f32.mrf.mxu1 }
0x1a2c   :  { %6336 = vmatprep.mubr.msk.f32.mxu0 %vm395_vm1, %v3559_v13  ;;  %v5668_v13 = vld [vmem:[%s7691_s4 + $0xf8] sm:$0xff] }
0x1a2d   :  { %6337 = vmatmul.mubr.msk.f32.vlgmr.msra.gmra.mxu0 %vm395_vm1, %v6333_v12  ;;  %v7387_v16 = vpop.f32.mrf.mxu1  ;;  %v5654_v12 = vld [vmem:[%s7655_s10 + $0x30] sm:$0xff] }
0x1a2e   :  { %6345 = vmatpush3.msra.mxu0 %v5627_v11  ;;  %6352 = vmatprep.mubr.msk.f32.mxu0 %vm87_vm0, %v7221_v32  ;;  %v5673_v11 = vld [vmem:[%s7692_s9 + $0xe0] sm:$0xff] }
0x1a2f   :  { %6346 = vmatprep.subr.mxu0 %v5626_v14  ;;  %v7395_v19 = vpop.f32.mrf.mxu1 }
0x1a30   :  { %6347 = vmatpush3.msra.mxu0 %v5626_v14 }
0x1a31   :  { %6348 = vmatprep.subr.mxu0 %v5625_v15 }
0x1a32   :  { %6349 = vmatpush3.msra.mxu0 %v5625_v15 }
0x1a33   :  { %6350 = vmatprep.subr.mxu0 %v5624_v17 }
0x1a34   :  { %6351 = vmatpush3.msra.mxu0 %v5624_v17  ;;  %v5667_v17 = vld [vmem:[%s7691_s4 + $0xf0] sm:$0xff] }
0x1a35   :  { %6353 = vmatmul.mubr.msk.f32.vlgmr.msra.gmra.mxu0 %vm87_vm0, %v7223_v33  ;;  %v6365_v22 = vpop.f32.mrf.mxu1  ;;  %6366 = vmatprep.subr.mxu0 %v5643_v18 }
0x1a36   :  { %v3905_v24 = vadd.f32 %v6365_v22, %v5637_v20  ;;  %6367 = vmatpush3.msra.mxu0 %v5643_v18  ;;  %6374 = vmatprep.mubr.msk.f32.mxu0 %vm87_vm0, %v7221_v32  ;;  %v5666_v18 = vld [vmem:[%s7691_s4 + $0xe8] sm:$0xff] }
0x1a37   :  { %v3899_v27 = vpop.f32.mrf.mxu1  ;;  %6368 = vmatprep.subr.mxu0 %v5642_v21 }
0x1a38   :  { %v3900_v28 = vadd.f32 %v5637_v20, %v3899_v27  ;;  %6369 = vmatpush3.msra.mxu0 %v5642_v21  ;;  %6377 = vmatprep.subr.msk.mxu1 %vm395_vm1, %v3905_v24  ;;  %v5662_v20 = vld [vmem:[%s7696_s30 + $0x7] ss:$0 sm:$0xff] }
0x1a39   :  { %6370 = vmatprep.subr.mxu0 %v5641_v25  ;;  %6378 = vmatpush3.xpose.msk.msra.mxu1 %vm395_vm1, %v3905_v24  ;;  %v5665_v21 = vld [vmem:[%s7691_s4 + $0xe0] sm:$0xff] }
0x1a3a   :  { %6371 = vmatpush3.msra.mxu0 %v5641_v25  ;;  %6379 = vmatprep.subr.msk.mxu1 %vm395_vm1, %v3900_v28 }
0x1a3b   :  { %6372 = vmatprep.subr.mxu0 %v5640_v29 }
0x1a3c   :  { %6373 = vmatpush3.msra.mxu0 %v5640_v29 }
0x1a3d   :  { %6375 = vmatmul.mubr.msk.f32.vlgmr.msra.gmra.mxu0 %vm87_vm0, %v7223_v33  ;;  %6380 = vmatpush3.xpose.msk.msra.mxu1 %vm395_vm1, %v3900_v28  ;;  %v5678_v28 = vld [vmem:[%s7697_s26 + $0x7] ss:$0 sm:$0xff] }
0x1a3e   :  { %6391 = vmatprep.subr.mxu1 %v5654_v12 }
0x1aed   :  { %v7419_v30 = vpop.f32.mrf.mxu0 }
0x1aef   :  { %v7421_v31 = vpop.f32.mrf.mxu0 }
0x1af5   :  { %v6354_v38 = vpop.f32.mrf.mxu0 }
0x1af6   :  { %v3817_v40 = vadd.f32 %v6354_v38, %v5629_v35 }
0x1af7   :  { %v3811_v34 = vpop.f32.mrf.mxu0 }
0x1af8   :  { %v3812_v39 = vadd.f32 %v5629_v35, %v3811_v34 }
0x1afa   :  { %6381 = vmatprep.mubr.msk.f32.mxu1 %vm395_vm1, %v3812_v39  ;;  %v3729_v39 = vadd.f32 %v7387_v16, %v7419_v30 }
0x1afb   :  { %6382 = vmatmul.mubr.msk.f32.vlgmr.msra.gmra.mxu1 %vm395_vm1, %v3817_v40 }
0x1afc   :  { %6392 = vmatpush3.msra.mxu1 %v5654_v12 }
0x1afd   :  { %v6376_v42 = vpop.f32.mrf.mxu0  ;;  %6407 = vmatprep.subr.mxu1 %v5668_v13 }
0x1afe   :  { %v3993_v43 = vadd.f32 %v6376_v42, %v5645_v41 }
0x1aff   :  { %v3987_v44 = vpop.f32.mrf.mxu0 }
0x1b00   :  { %v3988_v45 = vadd.f32 %v5645_v41, %v3987_v44  ;;  %6384 = vmatprep.subr.mxu0 %v3993_v43  ;;  %v3724_v41 = vadd.f32 %v7395_v19, %v7421_v31 }
0x1b01   :  { %6385 = vmatpush3.msra.mxu0 %v3993_v43 }
0x1b02   :  { %6386 = vmatprep.subr.mxu0 %v3988_v45 }
0x1b03   :  { %6387 = vmatpush3.msra.mxu0 %v3988_v45  ;;  %v5670_v45 = vld [vmem:[%s7695_s29 + $0x7] ss:$0 sm:$0xff] }
0x1b04   :  { %6396 = vmatprep.subr.mxu0 %v5660_v0 }
0x1bbb   :  { %v6383_v46 = vpop.f32.mrf.mxu1 }
0x1bbc   :  { %v4084_v47 = vmul.f32 0.35355338, %v6383_v46 }
0x1bbd   :  { %v4074_v48 = vpop.f32.mrf.mxu1 }
0x1bbe   :  { %v4083_v49 = vmul.f32 0.35355338, %v4074_v48  ;;  %v4086_v50 = vadd.f32 %v7280_v60, %v4084_v47 }
0x1bc0   :  { %v4090_v51 = vsel %vm487_vm2, %v4086_v50, -inf  ;;  %v4085_v52 = vadd.f32 %v7287_v63, %v4083_v49 }
0x1bc1   :  { %4091 = vmax.xlane.f32.xlu1 %v4090_v51 }
0x1bc2   :  { %v4087_v23 = vsel %vm487_vm2, %v4085_v52, -inf }
0x1bc3   :  { %4088 = vmax.xlane.f32.xlu0 %v4087_v23 }
0x1c4a   :  { %v4092_v26 = vpop.xlane.xlu1 %4091 }
0x1c4b   :  { %v4094_v53 = vsub.f32 %v4086_v50, %v4092_v26 }
0x1c4c   :  { %v4089_v54 = vpop.xlane.xlu0 %4088 }
0x1c4d   :  { %v4097_v55 = vmul.f32 1.442695, %v4094_v53  ;;  %v4093_v56 = vsub.f32 %v4085_v52, %v4089_v54 }
0x1c4f   :  { %6578 = vpow2.f32 %v4097_v55  ;;  %v4095_v57 = vmul.f32 1.442695, %v4093_v56 }
0x1c51   :  { %6580 = vpow2.f32 %v4095_v57 }
0x1c5c   :  { %v6579_v58 = vpop.eup %6578 }
0x1c5d   :  { %v4102_v59 = vsel %vm487_vm2, %v6579_v58, 0.0 }
0x1c5e   :  { %v6581_v61 = vpop.eup %6580  ;;  %4103 = vadd.xlane.f32.xlu1 %v4102_v59 }
0x1c5f   :  { %v4099_v62 = vsel %vm487_vm2, %v6581_v61, 0.0 }
0x1c60   :  { %4100 = vadd.xlane.f32.xlu0 %v4099_v62 }
0x1ce7   :  { %v4104_v2 = vpop.xlane.xlu1 %4103 }
0x1ce8   :  { %6582 = vrcp.f32 %v4104_v2 }
0x1ce9   :  { %v4101_v1 = vpop.xlane.xlu0 %4100 }
0x1cea   :  { %6584 = vrcp.f32 %v4101_v1 }
0x1cf5   :  { %v6583_v5 = vpop.eup %6582 }
0x1cf6   :  { %v4108_v6 = vmul.f32 %v6583_v5, %v6579_v58 }
0x1cf7   :  { %v6585_v3 = vpop.eup %6584 }
0x1cf8   :  { %v4107_v4 = vmul.f32 %v6585_v3, %v6581_v61  ;;  %v5687_v3 = vld [vmem:[%s7655_s10 + $0x38] sm:$0xff] }
0x1cfa   :  { %6388 = vmatprep.mubr.msk.f32.mxu0 %vm487_vm2, %v4107_v4 }
0x1cfb   :  { %6389 = vmatmul.mubr.msk.f32.vlgmr.msra.gmra.mxu0 %vm487_vm2, %v4108_v6 }
0x1cfc   :  { %6397 = vmatpush3.msra.mxu0 %v5660_v0  ;;  %6404 = vmatprep.mubr.msk.f32.mxu0 %vm87_vm0, %v7221_v32 }
0x1cfd   :  { %6398 = vmatprep.subr.mxu0 %v5659_v7 }
0x1cfe   :  { %6399 = vmatpush3.msra.mxu0 %v5659_v7 }
0x1cff   :  { %6400 = vmatprep.subr.mxu0 %v5658_v37 }
0x1d00   :  { %6401 = vmatpush3.msra.mxu0 %v5658_v37  ;;  %v5691_v37 = vld [vmem:[%s7656_s11 + $0x1] ss:$0 sm:$0xff] }
0x1d01   :  { %6402 = vmatprep.subr.mxu0 %v5657_v36 }
0x1d02   :  { %6403 = vmatpush3.msra.mxu0 %v5657_v36 }
0x1d03   :  { %6405 = vmatmul.mubr.msk.f32.vlgmr.msra.gmra.mxu0 %vm87_vm0, %v7223_v33  ;;  %6418 = vmatprep.subr.mxu0 %v5676_v8 }
0x1d04   :  { %6419 = vmatpush3.msra.mxu0 %v5676_v8  ;;  %6426 = vmatprep.mubr.msk.f32.mxu0 %vm87_vm0, %v7221_v32 }
0x1d05   :  { %6420 = vmatprep.subr.mxu0 %v5675_v9 }
0x1d06   :  { %6421 = vmatpush3.msra.mxu0 %v5675_v9 }
0x1d07   :  { %6422 = vmatprep.subr.mxu0 %v5674_v10 }
0x1d08   :  { %6423 = vmatpush3.msra.mxu0 %v5674_v10 }
0x1d09   :  { %6424 = vmatprep.subr.mxu0 %v5673_v11 }
0x1d0a   :  { %6425 = vmatpush3.msra.mxu0 %v5673_v11 }
0x1d0b   :  { %6427 = vmatmul.mubr.msk.f32.vlgmr.msra.gmra.mxu0 %vm87_vm0, %v7223_v33 }
0x1dbb   :  { %v6390_v14 = vpop.f32.mrf.mxu0 }
0x1dbd   :  { %v4181_v15 = vpop.f32.mrf.mxu0 }
0x1dbe   :  { %6393 = vmatprep.mubr.msk.f32.mxu1 %vm395_vm1, %v4181_v15 }
0x1dbf   :  { %6394 = vmatmul.mubr.msk.f32.vlgmr.msra.gmra.mxu1 %vm395_vm1, %v6390_v14 }
0x1dc0   :  { %6408 = vmatpush3.msra.mxu1 %v5668_v13  ;;  %6415 = vmatprep.mubr.msk.f32.mxu1 %vm87_vm0, %v7221_v32 }
0x1dc1   :  { %6409 = vmatprep.subr.mxu1 %v5667_v17 }
0x1dc2   :  { %6410 = vmatpush3.msra.mxu1 %v5667_v17 }
0x1dc3   :  { %v6406_v22 = vpop.f32.mrf.mxu0  ;;  %6411 = vmatprep.subr.mxu1 %v5666_v18 }
0x1dc4   :  { %v4360_v24 = vadd.f32 %v6406_v22, %v5662_v20  ;;  %6412 = vmatpush3.msra.mxu1 %v5666_v18 }
0x1dc5   :  { %v4354_v25 = vpop.f32.mrf.mxu0  ;;  %6413 = vmatprep.subr.mxu1 %v5665_v21 }
0x1dc6   :  { %v4355_v27 = vadd.f32 %v5662_v20, %v4354_v25  ;;  %6414 = vmatpush3.msra.mxu1 %v5665_v21 }
0x1dc7   :  { %6416 = vmatmul.mubr.msk.f32.vlgmr.msra.gmra.mxu1 %vm87_vm0, %v7223_v33 }
0x1dc8   :  { %6433 = vmatprep.mubr.msk.f32.mxu1 %vm395_vm1, %v4355_v27 }
0x1dcb   :  { %v6428_v29 = vpop.f32.mrf.mxu0 }
0x1dcc   :  { %v4536_v38 = vadd.f32 %v6428_v29, %v5678_v28  ;;  %v5698_v29 = vld [vmem:[%s7659_s14 + $0x30] sm:$0xff] }
0x1dcd   :  { %v4530_v35 = vpop.f32.mrf.mxu0 }
0x1dce   :  { %v4531_v34 = vadd.f32 %v5678_v28, %v4530_v35  ;;  %6436 = vmatprep.subr.mxu0 %v4536_v38  ;;  %v5696_v35 = vld [vmem:[%s7659_s14 + $0x20] sm:$0xff] }
0x1dcf   :  { %6437 = vmatpush3.msra.mxu0 %v4536_v38  ;;  %v5697_v38 = vld [vmem:[%s7659_s14 + $0x28] sm:$0xff] }
0x1dd0   :  { %6438 = vmatprep.subr.mxu0 %v4531_v34 }
0x1dd1   :  { %6439 = vmatpush3.msra.mxu0 %v4531_v34 }
0x1e7f   :  { %v6395_v40 = vpop.f32.mrf.mxu1 }
0x1e80   :  { %v4274_v42 = vadd.f32 %v6395_v40, %v3729_v39 }
0x1e81   :  { %v4264_v43 = vpop.f32.mrf.mxu1 }
0x1e82   :  { %v4273_v44 = vadd.f32 %v4264_v43, %v3724_v41 }
0x1e87   :  { %v6417_v46 = vpop.f32.mrf.mxu1 }
0x1e88   :  { %v4448_v47 = vadd.f32 %v6417_v46, %v5670_v45 }
0x1e89   :  { %v4442_v48 = vpop.f32.mrf.mxu1 }
0x1e8a   :  { %v4443_v49 = vadd.f32 %v5670_v45, %v4442_v48  ;;  %6429 = vmatprep.subr.msk.mxu1 %vm395_vm1, %v4448_v47  ;;  %v5694_v45 = vld [vmem:[%s7657_s12 + $0x1] ss:$0 sm:$0xff] }
0x1e8b   :  { %6430 = vmatpush3.xpose.msk.msra.mxu1 %vm395_vm1, %v4448_v47 }
0x1e8c   :  { %6431 = vmatprep.subr.msk.mxu1 %vm395_vm1, %v4443_v49 }
0x1e8f   :  { %6432 = vmatpush3.xpose.msk.msra.mxu1 %vm395_vm1, %v4443_v49 }
0x1e90   :  { %6443 = vmatprep.subr.mxu1 %v5687_v3 }
0x1e92   :  { %6434 = vmatmul.mubr.msk.f32.vlgmr.msra.gmra.mxu1 %vm395_vm1, %v4360_v24 }
0x1e93   :  { %6444 = vmatpush3.msra.mxu1 %v5687_v3 }
0x1f52   :  { %v6435_v16 = vpop.f32.mrf.mxu1 }
0x1f53   :  { %v4627_v19 = vmul.f32 0.35355338, %v6435_v16  ;;  %v5695_v16 = vld [vmem:[%s7658_s13 + $0x1] ss:$0 sm:$0xff] }
0x1f54   :  { %v4617_v30 = vpop.f32.mrf.mxu1 }
0x1f55   :  { %v4626_v31 = vmul.f32 0.35355338, %v4617_v30  ;;  %v4629_v50 = vadd.f32 %v7280_v60, %v4627_v19 }
0x1f57   :  { %v4633_v51 = vsel %vm487_vm2, %v4629_v50, -inf  ;;  %v4628_v52 = vadd.f32 %v7287_v63, %v4626_v31 }
0x1f58   :  { %4634 = vmax.xlane.f32.xlu1 %v4633_v51  ;;  %v5710_v51 = vld [vmem:[%s7661_s16 + $0x70] sm:$0xff] }
0x1f59   :  { %v4630_v23 = vsel %vm487_vm2, %v4628_v52, -inf }
0x1f5a   :  { %4631 = vmax.xlane.f32.xlu0 %v4630_v23  ;;  %v5708_v23 = vld [vmem:[%s7661_s16 + $0x60] sm:$0xff] }
0x1fe1   :  { %v4635_v26 = vpop.xlane.xlu1 %4634 }
0x1fe2   :  { %v4637_v53 = vsub.f32 %v4629_v50, %v4635_v26  ;;  %v5711_v50 = vld [vmem:[%s7661_s16 + $0x78] sm:$0xff] }
0x1fe3   :  { %v4632_v54 = vpop.xlane.xlu0 %4631  ;;  %6459 = vmatprep.subr.mxu1 %v5711_v50  ;;  %v5707_v26 = vld [vmem:[%s7661_s16 + $0x58] sm:$0xff] }
0x1fe4   :  { %v4640_v55 = vmul.f32 1.442695, %v4637_v53  ;;  %v4636_v56 = vsub.f32 %v4628_v52, %v4632_v54  ;;  %v5709_v52 = vld [vmem:[%s7661_s16 + $0x68] sm:$0xff]  ;;  %v5706_v53 = vld [vmem:[%s7661_s16 + $0x50] sm:$0xff] }
0x1fe5   :  { %v5705_v54 = vld [vmem:[%s7661_s16 + $0x48] sm:$0xff] }
0x1fe6   :  { %6586 = vpow2.f32 %v4640_v55  ;;  %v4638_v57 = vmul.f32 1.442695, %v4636_v56  ;;  %v5704_v55 = vld [vmem:[%s7661_s16 + $0x40] sm:$0xff]  ;;  %s6638_s16 = smov [#allocation2]  }
0x1fe7   :  { %v5701_v56 = vld [vmem:[%s7660_s15 + $0x1] ss:$0 sm:$0xff] }
0x1fe8   :  { %6588 = vpow2.f32 %v4638_v57 }
0x1ff3   :  { %v6587_v58 = vpop.eup %6586 }
0x1ff4   :  { %v4645_v59 = vsel %vm487_vm2, %v6587_v58, 0.0 }
0x1ff5   :  { %v6589_v60 = vpop.eup %6588  ;;  %4646 = vadd.xlane.f32.xlu1 %v4645_v59 }
0x1ff6   :  { %v4642_v61 = vsel %vm487_vm2, %v6589_v60, 0.0 }
0x1ff7   :  { %4643 = vadd.xlane.f32.xlu0 %v4642_v61 }
0x207e   :  { %v4647_v63 = vpop.xlane.xlu1 %4646 }
0x207f   :  { %6590 = vrcp.f32 %v4647_v63 }
0x2080   :  { %v4644_v62 = vpop.xlane.xlu0 %4643 }
0x2081   :  { %6592 = vrcp.f32 %v4644_v62 }
0x208c   :  { %v6591_v0 = vpop.eup %6590 }
0x208d   :  { %v4651_v5 = vmul.f32 %v6591_v0, %v6587_v58 }
0x208e   :  { %v6593_v2 = vpop.eup %6592 }
0x208f   :  { %v4650_v1 = vmul.f32 %v6593_v2, %v6589_v60 }
0x2091   :  { %6440 = vmatprep.mubr.msk.f32.mxu0 %vm487_vm2, %v4650_v1 }
0x2092   :  { %6441 = vmatmul.mubr.msk.f32.vlgmr.msra.gmra.mxu0 %vm487_vm2, %v4651_v5 }
0x2152   :  { %v6442_v4 = vpop.f32.mrf.mxu0 }
0x2154   :  { %v4724_v6 = vpop.f32.mrf.mxu0 }
0x2155   :  { %6445 = vmatprep.mubr.msk.f32.mxu1 %vm395_vm1, %v4724_v6 }
0x2156   :  { %6446 = vmatmul.mubr.msk.f32.vlgmr.msra.gmra.mxu1 %vm395_vm1, %v6442_v4 }
0x2157   :  { %6460 = vmatpush3.msra.mxu1 %v5711_v50 }
0x2158   :  { %6461 = vmatprep.subr.mxu1 %v5710_v51 }
0x2159   :  { %6462 = vmatpush3.msra.mxu1 %v5710_v51  ;;  %v5713_v51 = vld [vmem:[%s7662_s17 + $0x1] ss:$0 sm:$0xff] }
0x215a   :  { %6463 = vmatprep.subr.mxu1 %v5709_v52 }
0x215b   :  { %6464 = vmatpush3.msra.mxu1 %v5709_v52 }
0x215c   :  { %6465 = vmatprep.subr.mxu1 %v5708_v23 }
0x215d   :  { %6466 = vmatpush3.msra.mxu1 %v5708_v23 }
0x215e   :  { %6467 = vmatprep.subr.mxu1 %v5707_v26 }
0x215f   :  { %6468 = vmatpush3.msra.mxu1 %v5707_v26 }
0x2160   :  { %6469 = vmatprep.subr.mxu1 %v5706_v53 }
0x2161   :  { %6470 = vmatpush3.msra.mxu1 %v5706_v53 }
0x2162   :  { %6471 = vmatprep.subr.mxu1 %v5705_v54 }
0x2163   :  { %6472 = vmatpush3.msra.mxu1 %v5705_v54 }
0x2164   :  { %6473 = vmatprep.subr.mxu1 %v5704_v55 }
0x2165   :  { %6474 = vmatpush3.msra.mxu1 %v5704_v55 }
0x2216   :  { %v6447_v7 = vpop.f32.mrf.mxu1 }
0x2217   :  { %v4817_v36 = vadd.f32 %v6447_v7, %v4274_v42 }
0x2218   :  { %v4807_v8 = vpop.f32.mrf.mxu1 }
0x2219   :  { %v4827_v9 = vadd.f32 %v5691_v37, %v4817_v36  ;;  %v4816_v10 = vadd.f32 %v4807_v8, %v4273_v44 }
0x221b   :  { %v4826_v11 = vadd.f32 %v5691_v37, %v4816_v10  ;;  %v4829_v12 = vadd.f32 %v4827_v9, %v7223_v33 }
0x221d   :  { %v4837_v13 = vsel %vm87_vm0, %v4829_v12, 0.0  ;;  %v4828_v14 = vadd.f32 %v4826_v11, %v7221_v32  ;;  %v5699_v32 = vld [vmem:[%s7659_s14 + $0x38] sm:$0xff] }
0x221e   :  { %4838 = vadd.xlane.f32.xlu1 %v4837_v13  ;;  %6448 = vmatprep.subr.mxu0 %v5699_v32 }
0x221f   :  { %v4834_v15 = vsel %vm87_vm0, %v4828_v14, 0.0  ;;  %6449 = vmatpush3.msra.mxu0 %v5699_v32 }
0x2220   :  { %4835 = vadd.xlane.f32.xlu0 %v4834_v15  ;;  %6450 = vmatprep.subr.mxu0 %v5698_v29 }
0x2221   :  { %6451 = vmatpush3.msra.mxu0 %v5698_v29 }
0x2222   :  { %6452 = vmatprep.subr.mxu0 %v5697_v38 }
0x2223   :  { %6453 = vmatpush3.msra.mxu0 %v5697_v38 }
0x2224   :  { %6454 = vmatprep.subr.mxu0 %v5696_v35 }
0x2225   :  { %6455 = vmatpush3.msra.mxu0 %v5696_v35 }
0x22a7   :  { %v4839_v17 = vpop.xlane.xlu1 %4838 }
0x22a8   :  { %v4841_v18 = vmul.f32 0.03125, %v4839_v17 }
0x22a9   :  { %v4836_v20 = vpop.xlane.xlu0 %4835 }
0x22aa   :  { %v4843_v21 = vsub.f32 %v4829_v12, %v4841_v18  ;;  %v4840_v22 = vmul.f32 0.03125, %v4836_v20 }
0x22ac   :  { %v4842_v24 = vsub.f32 %v4828_v14, %v4840_v22  ;;  %v4845_v25 = vmul.f32 %v4843_v21, %v4843_v21 }
0x22ae   :  { %v4849_v27 = vsel %vm87_vm0, %v4845_v25, 0.0  ;;  %v4844_v28 = vmul.f32 %v4842_v24, %v4842_v24 }
0x22af   :  { %4850 = vadd.xlane.f32.xlu1 %v4849_v27 }
0x22b0   :  { %v4846_v33 = vsel %vm87_vm0, %v4844_v28, 0.0 }
0x22b1   :  { %4847 = vadd.xlane.f32.xlu0 %v4846_v33 }
0x2338   :  { %v4851_v34 = vpop.xlane.xlu1 %4850 }
0x2339   :  { %v4853_v39 = vmul.f32 0.03125, %v4851_v34 }
0x233a   :  { %v4848_v40 = vpop.xlane.xlu0 %4847 }
0x233b   :  { %v4855_v41 = vadd.f32 1e-12, %v4853_v39  ;;  %v4852_v42 = vmul.f32 0.03125, %v4848_v40 }
0x233d   :  { %6594 = vrsqrt.f32 %v4855_v41  ;;  %v4854_v43 = vadd.f32 1e-12, %v4852_v42 }
0x233f   :  { %6596 = vrsqrt.f32 %v4854_v43 }
0x234a   :  { %v6595_v44 = vpop.eup %6594 }
0x234b   :  { %v4859_v46 = vmul.f32 %v6595_v44, %v4843_v21 }
0x234c   :  { %v6597_v47 = vpop.eup %6596 }
0x234d   :  { %v4858_v48 = vmul.f32 %v6597_v47, %v4842_v24  ;;  %v4867_v49 = vmul.f32 %v5694_v45, %v4859_v46 }
0x234f   :  { %v4866_v19 = vmul.f32 %v5694_v45, %v4858_v48  ;;  %v7553_v31 = vadd.f32 %v5695_v16, %v4867_v49 }
0x2351   :  { %v7551_v30 = vadd.f32 %v5695_v16, %v4866_v19 }
0x2353   :  { %6456 = vmatprep.mubr.msk.f32.mxu0 %vm87_vm0, %v7551_v30 }
0x2354   :  { %6457 = vmatmul.mubr.msk.f32.vlgmr.msra.gmra.mxu0 %vm87_vm0, %v7553_v31 }
0x2414   :  { %v6458_v57 = vpop.f32.mrf.mxu0 }
0x2415   :  { %v4967_v58 = vadd.f32 %v6458_v57, %v5701_v56 }
0x2416   :  { %v4961_v59 = vpop.f32.mrf.mxu0 }
0x2417   :  { %v4971_v60 = vmul.f32 0.70710677, %v4967_v58  ;;  %v4962_v61 = vadd.f32 %v5701_v56, %v4961_v59  ;;  %v5019_v16 = vmul.f32 0.5, %v4967_v58 }
0x2419   :  { %v4973_v63 = vand.u32 2147483647, %v4971_v60  ;;  %v4970_v62 = vmul.f32 0.70710677, %v4962_v61  ;;  %vm5013_vm6 = vcmp.ge.f32.partialorder %v4971_v60, 0.0  ;;  %v5018_v48 = vmul.f32 0.5, %v4962_v61 }
0x241b   :  { %v4975_v0 = vmul.f32 0.3275911, %v4973_v63  ;;  %v4972_v2 = vand.u32 2147483647, %v4970_v62  ;;  %v5001_v4 = vsub.f32 0.0, %v4973_v63  ;;  %vm5012_vm7 = vcmp.ge.f32.partialorder %v4970_v62, 0.0 }
0x241d   :  { %v4977_v1 = vadd.f32 1.0, %v4975_v0  ;;  %v4974_v5 = vmul.f32 0.3275911, %v4972_v2  ;;  %v5000_v6 = vsub.f32 0.0, %v4972_v2  ;;  %v5003_v7 = vmul.f32 %v5001_v4, %v4973_v63 }
0x241f   :  { %6598 = vrcp.f32 %v4977_v1  ;;  %v4976_v3 = vadd.f32 1.0, %v4974_v5  ;;  %v5002_v36 = vmul.f32 %v5000_v6, %v4972_v2  ;;  %v5006_v9 = vmul.f32 1.442695, %v5003_v7 }
0x2420   :  { %v6636_v5 = vmov 0.0  }
0x2421   :  { %6600 = vrcp.f32 %v4976_v3  ;;  %v5004_v13 = vmul.f32 1.442695, %v5002_v36  ;;  %6478 = vmatprep.subr.mxu0 %v6636_v5  ;;  %6496 = vmatprep.subr.mxu1 %v6636_v5 }
0x2422   :  { %6602 = vpow2.f32 %v5006_v9  ;;  %6482 = vmatprep.mubr.msk.f32.mxu0 %vm6637_vm8, %v6636_v5 }
0x2423   :  { %6604 = vpow2.f32 %v5004_v13 }
0x242c   :  { %v6599_v37 = vpop.eup %6598 }
0x242d   :  { %v4983_v8 = vmul.f32 1.0614054, %v6599_v37 }
0x242e   :  { %v6601_v10 = vpop.eup %6600 }
0x242f   :  { %v4985_v11 = vadd.f32 -1.4531521, %v4983_v8  ;;  %v4982_v12 = vmul.f32 1.0614054, %v6601_v10  ;;  %v6603_v29 = vpop.eup %6602  ;;  %v5718_v8 = vld [vmem:[%s7663_s18 + $0x1] ss:$0 sm:$0xff] }
0x2430   :  { %v6605_v39 = vpop.eup %6604 }
0x2431   :  { %v4987_v14 = vmul.f32 %v6599_v37, %v4985_v11  ;;  %v4984_v15 = vadd.f32 -1.4531521, %v4982_v12  ;;  %v5719_v11 = vld [vmem:[%s7664_s19 + $0x1] ss:$0 sm:$0xff] }
0x2433   :  { %v4989_v17 = vadd.f32 1.4214138, %v4987_v14  ;;  %v4986_v18 = vmul.f32 %v6601_v10, %v4984_v15 }
0x2435   :  { %v4991_v20 = vmul.f32 %v6599_v37, %v4989_v17  ;;  %v4988_v21 = vadd.f32 1.4214138, %v4986_v18  ;;  %v5170_v18 = vld [vmem:[%s7665_s20] sm:$0x3] }
0x2437   :  { %v4993_v22 = vadd.f32 -0.28449672, %v4991_v20  ;;  %v4990_v24 = vmul.f32 %v6601_v10, %v4988_v21  ;;  %v5247_v20 = vld [vmem:[%s7666_s21 + $0x18] sm:$0xff]  ;;  %v5246_v21 = vld [vmem:[%s7666_s21 + $0x10] sm:$0xff] }
0x2439   :  { %v4995_v25 = vmul.f32 %v6599_v37, %v4993_v22  ;;  %v4992_v27 = vadd.f32 -0.28449672, %v4990_v24  ;;  %v5245_v22 = vld [vmem:[%s7666_s21 + $0x8] sm:$0xff]  ;;  %v5244_v24 = vld [vmem:[%s7666_s21] sm:$0xff] }
0x243b   :  { %v4997_v28 = vadd.f32 0.2548296, %v4995_v25  ;;  %v4994_v33 = vmul.f32 %v6601_v10, %v4992_v27 }
0x243d   :  { %v4999_v32 = vmul.f32 %v6599_v37, %v4997_v28  ;;  %v4996_v38 = vadd.f32 0.2548296, %v4994_v33  ;;  %v5332_v28 = vld [vmem:[%s7668_s23 + $0x18] sm:$0xff]  ;;  %v5331_v33 = vld [vmem:[%s7668_s23 + $0x10] sm:$0xff] }
0x243f   :  { %v5009_v35 = vmul.f32 %v6603_v29, %v4999_v32  ;;  %v4998_v34 = vmul.f32 %v6601_v10, %v4996_v38  ;;  %v5330_v32 = vld [vmem:[%s7668_s23 + $0x8] sm:$0xff]  ;;  %v5329_v29 = vld [vmem:[%s7668_s23] sm:$0xff]  ;;  %s5421_s23 = sshll.u32 %s6638_s16, 4  ;;  %s5422_s23 = int_to_ptr.vmem [resolvable:$true] %s5421_s23 }
0x2440   :  { %v5721_v38 = vld [vmem:[%s7667_s22] ss:$0 sm:$0xff]  ;;  %s6614_s22 = scalar_lea.vmem %s5422_s23, 32  ;;  %p6619_p1 = scmp.lt.s32.totalorder %s5422_s23, %s5422_s23 }
0x2441   :  { %v5011_v40 = vsub.f32 1.0, %v5009_v35  ;;  %v5008_v41 = vmul.f32 %v6605_v39, %v4998_v34  ;;  %p6615_p0 = scmp.ne.s32.totalorder %s5422_s23, %s6614_s22  ;;  %p6620_p2 = scmp.lt.s32.totalorder %s6614_s22, %s6614_s22 }
0x2443   :  { %v5015_v42 = vsub.f32 0.0, %v5011_v40  ;;  %v5010_v43 = vsub.f32 1.0, %v5008_v41  ;;  %v5723_v41 = vld [vmem:[%s7669_s24] ss:$0 sm:$0xff]  ;;  %p6621_p3 = por %p6620_p2, %p6619_p1 }
0x2445   :  { %v5017_v44 = vsel %vm5013_vm6, %v5011_v40, %v5015_v42  ;;  %v5014_v45 = vsub.f32 0.0, %v5010_v43  ;;  %p6622_p4 = pnand %p6621_p3, %p6615_p0 }
0x2446   :  { %v5021_v46 = vadd.f32 1.0, %v5017_v44 }
0x2447   :  { %v5016_v47 = vsel %vm5012_vm7, %v5010_v43, %v5014_v45 }
0x2448   :  { %v5020_v49 = vadd.f32 1.0, %v5016_v47  ;;  %v5023_v50 = vmul.f32 %v5021_v46, %v5019_v16 }
0x244a   :  { %v5022_v19 = vmul.f32 %v5020_v49, %v5018_v48 }
0x244c   :  { %6475 = vmatprep.mubr.msk.f32.mxu1 %vm2516_vm5, %v5022_v19 }
0x244d   :  { %6476 = vmatmul.mubr.msk.f32.vlgmr.msra.gmra.mxu1 %vm2516_vm5, %v5023_v50 }
0x244e   :  { %6504 = vmatprep.mubr.msk.f32.mxu1 %vm6637_vm8, %v6636_v5  ;;  %6497 = vmatpush3.msra.mxu1 %v5332_v28 }
0x244f   :  { %6498 = vmatprep.subr.mxu1 %v6636_v5 }
0x2450   :  { %6499 = vmatpush3.msra.mxu1 %v5331_v33 }
0x2451   :  { %6500 = vmatprep.subr.mxu1 %v6636_v5 }
0x2452   :  { %6501 = vmatpush3.msra.mxu1 %v5330_v32 }
0x2453   :  { %6502 = vmatprep.subr.mxu1 %v6636_v5 }
0x2454   :  { %6503 = vmatpush3.msra.mxu1 %v5329_v29 }
0x250d   :  { %v6477_v52 = vpop.f32.mrf.mxu1 }
0x250e   :  { %v5119_v23 = vadd.f32 %v6477_v52, %v5713_v51 }
0x250f   :  { %v5113_v26 = vpop.f32.mrf.mxu1 }
0x2510   :  { %v5114_v53 = vadd.f32 %v5713_v51, %v5113_v26  ;;  %v5123_v54 = vadd.f32 %v5119_v23, %v7553_v31 }
0x2512   :  { %v5131_v55 = vsel %vm87_vm0, %v5123_v54, 0.0  ;;  %v5122_v56 = vadd.f32 %v5114_v53, %v7551_v30 }
0x2513   :  { %5132 = vadd.xlane.f32.xlu0 %v5131_v55 }
0x2514   :  { %v5128_v57 = vsel %vm87_vm0, %v5122_v56, 0.0 }
0x2515   :  { %5129 = vadd.xlane.f32.xlu1 %v5128_v57 }
0x259c   :  { %v5133_v58 = vpop.xlane.xlu0 %5132 }
0x259d   :  { %v5135_v59 = vmul.f32 0.03125, %v5133_v58 }
0x259e   :  { %v5130_v60 = vpop.xlane.xlu1 %5129 }
0x259f   :  { %v5137_v61 = vsub.f32 %v5123_v54, %v5135_v59  ;;  %v5134_v63 = vmul.f32 0.03125, %v5130_v60 }
0x25a1   :  { %v5136_v62 = vsub.f32 %v5122_v56, %v5134_v63  ;;  %v5139_v0 = vmul.f32 %v5137_v61, %v5137_v61 }
0x25a3   :  { %v5143_v2 = vsel %vm87_vm0, %v5139_v0, 0.0  ;;  %v5138_v1 = vmul.f32 %v5136_v62, %v5136_v62 }
0x25a4   :  { %5144 = vadd.xlane.f32.xlu0 %v5143_v2 }
0x25a5   :  { %v5140_v31 = vsel %vm87_vm0, %v5138_v1, 0.0 }
0x25a6   :  { %5141 = vadd.xlane.f32.xlu1 %v5140_v31 }
0x262d   :  { %v5145_v30 = vpop.xlane.xlu0 %5144 }
0x262e   :  { %v5147_v3 = vmul.f32 0.03125, %v5145_v30 }
0x262f   :  { %v5142_v4 = vpop.xlane.xlu1 %5141 }
0x2630   :  { %v5149_v6 = vadd.f32 1e-12, %v5147_v3  ;;  %v5146_v7 = vmul.f32 0.03125, %v5142_v4 }
0x2632   :  { %6606 = vrsqrt.f32 %v5149_v6  ;;  %v5148_v37 = vadd.f32 1e-12, %v5146_v7 }
0x2634   :  { %6608 = vrsqrt.f32 %v5148_v37 }
0x263f   :  { %v6607_v36 = vpop.eup %6606 }
0x2640   :  { %v5153_v9 = vmul.f32 %v6607_v36, %v5137_v61 }
0x2641   :  { %v6609_v10 = vpop.eup %6608 }
0x2642   :  { %v5161_v12 = vmul.f32 %v5718_v8, %v5153_v9  ;;  %v5152_v13 = vmul.f32 %v6609_v10, %v5136_v62 }
0x2644   :  { %v5169_v14 = vadd.f32 %v5719_v11, %v5161_v12  ;;  %v5160_v15 = vmul.f32 %v5718_v8, %v5152_v13 }
0x2646   :  { %6479 = vmatpush3.msra.mxu0 %v5169_v14  ;;  %v5168_v17 = vadd.f32 %v5719_v11, %v5160_v15 }
0x2647   :  { %6480 = vmatprep.subr.mxu0 %v6636_v5 }
0x2648   :  { %6481 = vmatpush3.msra.mxu0 %v5168_v17 }
0x2649   :  { %6483 = vmatmul.mubr.msk.f32.vlgmr.msra.gmra.mxu0 %vm487_vm2, %v5170_v18  ;;  %6485 = vmatprep.subr.mxu0 %v6636_v5 }
0x264a   :  { %6486 = vmatpush3.msra.mxu0 %v5247_v20  ;;  %6493 = vmatprep.mubr.msk.f32.mxu0 %vm6637_vm8, %v6636_v5 }
0x264b   :  { %6487 = vmatprep.subr.mxu0 %v6636_v5 }
0x264c   :  { %6488 = vmatpush3.msra.mxu0 %v5246_v21 }
0x264d   :  { %6489 = vmatprep.subr.mxu0 %v6636_v5 }
0x264e   :  { %6490 = vmatpush3.msra.mxu0 %v5245_v22 }
0x264f   :  { %6491 = vmatprep.subr.mxu0 %v6636_v5 }
0x2650   :  { %6492 = vmatpush3.msra.mxu0 %v5244_v24 }
0x2709   :  { %v5240_v25 = vpop.f32.mrf.mxu0 }
0x270a   :  { %6494 = vmatmul.mubr.msk.f32.vlgmr.msra.gmra.mxu0 %vm87_vm0, %v5240_v25 }
0x270b   :  { %v6484_v27 = vpop.f32.mrf.mxu0 }
0x27ca   :  { %v5324_v35 = vpop.f32.mrf.mxu0 }
0x27cb   :  { %v5325_v34 = vadd.f32 %v5721_v38, %v5324_v35 }
0x27cc   :  { %v6495_v39 = vpop.f32.mrf.mxu0 }
0x27cd   :  { %6610 = vtanh.f32 %v5325_v34 }
0x27da   :  { %v6611_v40 = vpop.eup %6610 }
0x27db   :  { %6505 = vmatmul.mubr.msk.f32.vlgmr.msra.gmra.mxu1 %vm87_vm0, %v6611_v40 }
0x289b   :  { %v5409_v42 = vpop.f32.mrf.mxu1 }
0x289c   :  { %v5410_v43 = vadd.f32 %v5723_v41, %v5409_v42 }
0x289d   :  { %v6506_v44 = vpop.f32.mrf.mxu1 }
0x289e   :  { %5414 = vst.msk [vmem:[#allocation2] sm:$0x3] %vm5413_vm9, %v5410_v43 }
0x289f   :  { %6625 = shalt.err (!%p6622_p4)
}
0x28a0   :  { %5424 = dma.vmem_to_hbm [thread:$0]  %s5422_s23, 32, %s7670_s25, [#allocation3]  }
0x28a1   :  { %6634 = dma.done.wait [#allocation3], 32  }
0x28a2   :  { %6635 = vsyncadd [#allocation3], 4294967264 }
0x28a3   :  { %5428 = vsyncpa [#allocation3], 1 }

</bundles_post_ra>
